<compile_context>
chip_gen: v7x
topology: tpu7x:2x2x1
jax: 0.10.0
libtpu: 0.0.40
codegen_flags: <defaults>
</compile_context>

<pallas_src>
import math

import jax
import jax.numpy as jnp
from jax.experimental import pallas as pl
from jax.experimental.pallas import tpu as pltpu


# Kept tight (v7x scoped default). At real shapes raise on v5e/v6e (128 MiB VMEM).
_VMEM_LIMIT_BYTES = 32 * 1024 * 1024


def _time_chunk(t):
    """Largest of {8,4,2,1} dividing t — in-kernel time-chunk size."""
    for c in (8, 4, 2, 1):
        if t % c == 0:
            return c
    return 1


def _pick_nm_block(nm, tbg, v, row_target=512):
    """Samples per grid step: grow the matmul M dim toward the MXU, but keep >=2 grid
    steps (megacore) and bound the kron-adjacency size (B*TB*V <= row_target)."""
    for b in (8, 4, 2):
        if nm % b == 0 and nm // b >= 2 and b * tbg * v <= row_target:
            return b
    return 1


def _hint(x, m):
    """pl.multiple_of only for traced starts (static ints fold anyway)."""
    if isinstance(x, int) or m <= 1:
        return x
    return pl.multiple_of(x, m)


# ----------------------------------------------------------------------------
# Fused st_gcn block kernel (gcn + BN1 + ReLU + temporal conv + BN2 + residual + ReLU)
# ----------------------------------------------------------------------------

def make_block_kernel(*, K, KT, B, TBg, TBo, stride, residual_kind, has_data_bn,
                      emit_pooled, T_in, T_out, V, Cin, Cout):
    n_gc = T_in // TBg          # gcn time chunks
    n_tc = T_out // TBo         # tcn output-time chunks
    Rg = B * TBg * V            # matmul rows per gcn chunk
    Ro = B * TBo * V            # matmul rows per tcn chunk

    def chunk_loop(n, body):
        # Short fixed trip counts: static unroll (full LLO visibility).
        # Long (real T=300): scf.for so the Mosaic program stays small.
        if n <= 8:
            for i in range(n):
                body(i)
        else:
            @pl.loop(0, n)
            def _(i):
                body(i)

    def kernel(*refs):
        it = iter(refs)
        x_ref = next(it)                               # (B, T_in, V, Cin)  bf16
        if has_data_bn:
            dbs_ref = next(it)                         # (V, Cin) f32
            dbb_ref = next(it)                         # (V, Cin) f32
        abd_ref = next(it)                             # (K, Rg, Rg) bf16
        wg_ref = next(it)                              # (K*Cin, Cout) bf16 (K-fused 1x1)
        s1_ref = next(it)                              # (V, Cout) f32  BN1 scale
        b1_ref = next(it)                              # (V, Cout) f32  BN1 shift (+gcn bias thru A)
        wt_ref = next(it)                              # (KT, Cout, Cout) bf16
        s2_ref = next(it)                              # (V, Cout) f32  BN2 scale
        b2_ref = next(it)                              # (V, Cout) f32  BN2 shift (+tcn bias)
        if residual_kind == "conv":
            wr_ref = next(it)                          # (Cin, Cout) bf16
            rs_ref = next(it)                          # (V, Cout) f32
            rb_ref = next(it)                          # (V, Cout) f32
        if emit_pooled:
            pooled_ref = next(it)                      # (B, 1, Cout) f32
        else:
            o_ref = next(it)                           # (B, T_out, V, Cout) bf16
        hpad_ref = next(it)                            # scratch (B, T_in+8, V, Cout) bf16

        # Hoisted (pre-broadcast on the host) per-(v,c) affines — loaded once,
        # broadcast over (B, TB) major dims is free.
        s1 = s1_ref[...]
        b1 = b1_ref[...]
        s2 = s2_ref[...]
        b2 = b2_ref[...]
        if has_data_bn:
            dbs = dbs_ref[...]
            dbb = dbb_ref[...]
        if residual_kind == "conv":
            rs = rs_ref[...]
            rb = rb_ref[...]

        # Temporal zero-pad halos only (interior rows are fully overwritten below).
        zpad = jnp.zeros((B, 4, V, Cout), hpad_ref.dtype)
        hpad_ref[:, pl.ds(0, 4)] = zpad
        hpad_ref[:, pl.ds(4 + T_in, 4)] = zpad

        # ---- GCN (A-first, K-fused conv) + BN1 + ReLU, written into hpad ----
        def gcn_chunk(c):
            t0 = _hint(c * TBg, TBg)
            xc = x_ref[:, pl.ds(t0, TBg)]                       # (B, TBg, V, Cin)
            if has_data_bn:
                xc = xc.astype(jnp.float32) * dbs + dbb
            xr = xc.reshape(Rg, Cin).astype(jnp.bfloat16)
            # Graph contraction first: kron(I_{B*TBg}, A_k^T) @ x keeps the matmul
            # N dim at Cin (cheapest on channel-expanding layers).
            ys = [jnp.dot(abd_ref[k], xr,
                          preferred_element_type=jnp.float32).astype(jnp.bfloat16)
                  for k in range(K)]
            y_all = ys[0] if K == 1 else jnp.concatenate(ys, axis=-1)   # (Rg, K*Cin)
            # Single K-fused 1x1 conv matmul (N = Cout).
            acc = jnp.dot(y_all, wg_ref[...],
                          preferred_element_type=jnp.float32)            # (Rg, Cout)
            h = acc.reshape(B, TBg, V, Cout)
            h = jnp.maximum(h * s1 + b1, 0.0)                   # BN1 (+gcn bias) + ReLU
            w0 = _hint(4 + c * TBg, math.gcd(4, TBg))
            hpad_ref[:, pl.ds(w0, TBg)] = h.astype(hpad_ref.dtype)

        chunk_loop(n_gc, gcn_chunk)

        # ---- TCN: 9-tap temporal conv + BN2 + residual + ReLU, chunked over T_out ----
        if emit_pooled:
            pooled_ref[...] = jnp.zeros_like(pooled_ref)

        def tcn_chunk(co):
            o0 = _hint(co * TBo, TBo)
            i0 = co * TBo * stride
            acc = jnp.zeros((Ro, Cout), jnp.float32)
            for dt in range(KT):
                start = i0 + dt
                if stride == 1:
                    hs = hpad_ref[:, pl.ds(start, TBo)]
                else:
                    # Contiguous load + free major-dim subsample (no strided DMA).
                    hs = hpad_ref[:, pl.ds(start, stride * TBo)]
                    hs = hs.reshape(B, TBo, stride, V, Cout)[:, :, 0]
                acc = acc + jnp.dot(hs.reshape(Ro, Cout), wt_ref[dt],
                                    preferred_element_type=jnp.float32)
            acc = acc.reshape(B, TBo, V, Cout) * s2 + b2        # BN2 (+tcn bias)

            if residual_kind == "identity":
                xres = x_ref[:, pl.ds(o0, TBo)]                 # stride==1, Cin==Cout
                acc = acc + xres.astype(jnp.float32)
            elif residual_kind == "conv":
                if stride == 1:
                    xs = x_ref[:, pl.ds(_hint(i0, TBo), TBo)]
                else:
                    xs = x_ref[:, pl.ds(_hint(i0, TBo * stride), stride * TBo)]
                    xs = xs.reshape(B, TBo, stride, V, Cin)[:, :, 0]
                r = jnp.dot(xs.reshape(Ro, Cin), wr_ref[...],
                            preferred_element_type=jnp.float32)
                acc = acc + (r.reshape(B, TBo, V, Cout) * rs + rb)
            # residual_kind == "none": nothing to add.

            out_c = jnp.maximum(acc, 0.0)
            if emit_pooled:
                pooled_ref[...] += jnp.sum(out_c.reshape(B, TBo * V, Cout),
                                           axis=1, keepdims=True)
            else:
                o_ref[:, pl.ds(o0, TBo)] = out_c.astype(o_ref.dtype)

        chunk_loop(n_tc, tcn_chunk)

        if emit_pooled:
            pooled_ref[...] = pooled_ref[...] * (1.0 / float(T_out * V))

    return kernel


def stgcn_block_call(x, lp, a_eff, dbn=None, emit_pooled=False):
    """One fused st_gcn block. x: (NM, T_in, V, Cin) bf16. a_eff: (K, V, V) f32."""
    NM, T_in, V, Cin = x.shape
    K = a_eff.shape[0]
    Cout = lp["w_gcn"].shape[2]
    stride = lp["stride"]
    residual_kind = lp["residual_kind"]
    KT = lp["wt"].shape[0]
    T_out = (T_in - 1) // stride + 1
    TBg = _time_chunk(T_in)
    TBo = _time_chunk(T_out)
    B = _pick_nm_block(NM, TBg, V)
    Rg = B * TBg * V

    # Time/sample block-diagonal adjacency: abd[k] = kron(I_{B*TBg}, A_eff[k]^T), so
    # the graph contraction is one MXU-sized matmul per k per chunk (no transposes).
    at = jnp.transpose(a_eff, (0, 2, 1))                         # at[k, w, v] = A[k, v, w]
    eye = jnp.eye(B * TBg, dtype=jnp.float32)
    abd = jnp.einsum("ij,kwv->kiwjv", eye, at).reshape(K, Rg, Rg).astype(jnp.bfloat16)

    # K-fused 1x1 conv weight for the A-first order: (K*Cin, Cout), k-major rows.
    w_stack = lp["w_gcn"].reshape(K * Cin, Cout).astype(jnp.bfloat16)

    # gcn bias flows through the adjacency: bias_eff[w,c] = sum_k (sum_v A[k,v,w]) b_k[c].
    # Fold it, together with BN1, into per-(v,c) affines (hoisted out of the kernel).
    colsum = jnp.sum(a_eff, axis=1)                              # (K, V)
    bias_eff = jnp.einsum("kw,kc->wc", colsum, lp["b_gcn"][:, 0, :])
    scale1 = jnp.broadcast_to(lp["bn1s"], (V, Cout)).astype(jnp.float32)
    shift1 = (lp["bn1b"] + lp["bn1s"] * bias_eff).astype(jnp.float32)      # (V, Cout)

    # tcn conv bias folded into BN2's shift; pre-broadcast to (V, Cout).
    scale2 = jnp.broadcast_to(lp["bn2s"], (V, Cout)).astype(jnp.float32)
    shift2 = jnp.broadcast_to(lp["bn2b"] + lp["bn2s"] * lp["bt"],
                              (V, Cout)).astype(jnp.float32)

    kernel = make_block_kernel(
        K=K, KT=KT, B=B, TBg=TBg, TBo=TBo, stride=stride,
        residual_kind=residual_kind, has_data_bn=dbn is not None,
        emit_pooled=emit_pooled, T_in=T_in, T_out=T_out, V=V, Cin=Cin, Cout=Cout)

    inputs = [x]
    in_specs = [pl.BlockSpec((B, T_in, V, Cin), lambda n: (n, 0, 0, 0))]
    if dbn is not None:
        inputs += [dbn[0], dbn[1]]
        in_specs += [pl.BlockSpec((V, Cin), lambda n: (0, 0)),
                     pl.BlockSpec((V, Cin), lambda n: (0, 0))]
    inputs += [abd, w_stack, scale1, shift1,
               lp["wt"].astype(jnp.bfloat16), scale2, shift2]
    in_specs += [pl.BlockSpec((K, Rg, Rg), lambda n: (0, 0, 0)),
                 pl.BlockSpec((K * Cin, Cout), lambda n: (0, 0)),
                 pl.BlockSpec((V, Cout), lambda n: (0, 0)),
                 pl.BlockSpec((V, Cout), lambda n: (0, 0)),
                 pl.BlockSpec((KT, Cout, Cout), lambda n: (0, 0, 0)),
                 pl.BlockSpec((V, Cout), lambda n: (0, 0)),
                 pl.BlockSpec((V, Cout), lambda n: (0, 0))]
    if residual_kind == "conv":
        rscale = jnp.broadcast_to(lp["rs"], (V, Cout)).astype(jnp.float32)
        rshift = jnp.broadcast_to(lp["rb"], (V, Cout)).astype(jnp.float32)
        inputs += [lp["wr"].astype(jnp.bfloat16), rscale, rshift]
        in_specs += [pl.BlockSpec((Cin, Cout), lambda n: (0, 0)),
                     pl.BlockSpec((V, Cout), lambda n: (0, 0)),
                     pl.BlockSpec((V, Cout), lambda n: (0, 0))]

    if emit_pooled:
        out_shape = jax.ShapeDtypeStruct((NM, 1, Cout), jnp.float32)
        out_specs = pl.BlockSpec((B, 1, Cout), lambda n: (n, 0, 0))
    else:
        out_shape = jax.ShapeDtypeStruct((NM, T_out, V, Cout), jnp.bfloat16)
        out_specs = pl.BlockSpec((B, T_out, V, Cout), lambda n: (n, 0, 0, 0))

    return pl.pallas_call(
        kernel,
        out_shape=out_shape,
        grid=(NM // B,),
        in_specs=in_specs,
        out_specs=out_specs,
        scratch_shapes=[pltpu.VMEM((B, T_in + 8, V, Cout), jnp.bfloat16)],
        compiler_params=pltpu.CompilerParams(
            dimension_semantics=("parallel",),
            vmem_limit_bytes=_VMEM_LIMIT_BYTES),
    )(*inputs)


# ----------------------------------------------------------------------------
# Parameter construction (deterministic, inference-mode BN folded to affine)
# ----------------------------------------------------------------------------

def make_params(key, c_in, V, K, hidden, hidden_dim, num_class):
    keys = iter(jax.random.split(key, 256))
    eps = 1e-5

    def nrm(shape, scale=1.0):
        return scale * jax.random.normal(next(keys), shape, dtype=jnp.float32)

    params = {}

    # Synthetic (K, V, V) adjacency, column-normalized.
    a_raw = jax.random.uniform(next(keys), (K, V, V), dtype=jnp.float32) + 0.1
    params["A"] = a_raw / jnp.sum(a_raw, axis=1, keepdims=True)

    # data_bn (BatchNorm1d over V*C channels, channel index = v*C + c), inference fold.
    gamma = 1.0 + 0.1 * nrm((V, c_in))
    beta = 0.1 * nrm((V, c_in))
    params["bn_scale"] = gamma / jnp.sqrt(1.0 + eps)
    params["bn_shift"] = beta

    cfg = [
        (c_in, hidden, 1, False),
        (hidden, hidden, 1, True),
        (hidden, hidden, 1, True),
        (hidden, hidden, 1, True),
        (hidden, 2 * hidden, 2, True),
        (2 * hidden, 2 * hidden, 1, True),
        (2 * hidden, 2 * hidden, 1, True),
        (2 * hidden, 4 * hidden, 2, True),
        (4 * hidden, 4 * hidden, 1, True),
        (4 * hidden, hidden_dim, 1, True),
    ]

    layers = []
    for (cin, cout, stride, residual) in cfg:
        lp = {"stride": stride}
        lp["importance"] = jnp.ones((K, V, V), jnp.float32)   # edge_importance (init=1)
        lp["w_gcn"] = nrm((K, cin, cout), 1.0 / math.sqrt(cin))
        lp["b_gcn"] = nrm((K, 1, cout), 0.05)

        g1 = 1.0 + 0.1 * nrm((1, cout))
        lp["bn1s"] = g1 / jnp.sqrt(1.0 + eps)
        lp["bn1b"] = 0.05 * nrm((1, cout))

        lp["wt"] = nrm((9, cout, cout), 1.0 / math.sqrt(9 * cout))
        lp["bt"] = nrm((1, cout), 0.05)

        g2 = 1.0 + 0.1 * nrm((1, cout))
        lp["bn2s"] = g2 / jnp.sqrt(1.0 + eps)
        lp["bn2b"] = 0.05 * nrm((1, cout))

        if not residual:
            lp["residual_kind"] = "none"
        elif cin == cout and stride == 1:
            lp["residual_kind"] = "identity"
        else:
            lp["residual_kind"] = "conv"
            wc = nrm((cin, cout), 1.0 / math.sqrt(cin))
            bc = nrm((1, cout), 0.05)
            gr = 1.0 + 0.1 * nrm((1, cout))
            br = 0.05 * nrm((1, cout))
            scale = gr / jnp.sqrt(1.0 + eps)
            lp["wr"] = wc
            lp["rs"] = scale
            lp["rb"] = bc * scale + br
        layers.append(lp)

    params["layers"] = layers
    params["wfc"] = nrm((hidden_dim, num_class), 1.0 / math.sqrt(hidden_dim))
    params["bfc"] = nrm((1, num_class), 0.05)
    return params


# ----------------------------------------------------------------------------
# Model forward (drop=False path)
# ----------------------------------------------------------------------------

def model_forward(x, params):
    # x: (N, C, T, V, M) float32 — PyTorch input convention.
    N, C, T, V, M = x.shape

    # (N,C,T,V,M) -> (N,M,T,V,C) -> (NM, T, V, C) bf16  [kernel layout: (V,C) tiled]
    xk = jnp.transpose(x, (0, 4, 2, 3, 1)).reshape(N * M, T, V, C)
    xk = xk.astype(jnp.bfloat16)

    A = params["A"]
    layers = params["layers"]
    n_layers = len(layers)
    for li, lp in enumerate(layers):
        a_eff = A * lp["importance"]
        dbn = (params["bn_scale"], params["bn_shift"]) if li == 0 else None
        xk = stgcn_block_call(xk, lp, a_eff, dbn=dbn,
                              emit_pooled=(li == n_layers - 1))

    # xk is the per-(n,m) pooled feature: (NM, 1, Cf) f32. Tiny head in plain XLA
    # (mean over persons M + fc) — not worth a kernel launch.
    NM, _, Cf = xk.shape
    pooled = xk.reshape(N, M, Cf).mean(axis=1)                   # (N, Cf)
    return pooled @ params["wfc"] + params["bfc"]                # (N, num_class)


if __name__ == "__main__":
    key = jax.random.PRNGKey(0)
    N, C, T, V, M = 2, 3, 16, 16, 2       # small shapes; V multiple of 8
    K = 3                                 # spatial kernel size (A.shape[0])
    hidden, hidden_dim, num_class = 16, 64, 10

    kx, kp = jax.random.split(key)
    x = jax.random.normal(kx, (N, C, T, V, M), dtype=jnp.float32)
    params = make_params(kp, C, V, K, hidden, hidden_dim, num_class)

    out = model_forward(x, params)
    out = jax.block_until_ready(out)

    assert out.shape == (N, num_class), out.shape
    assert bool(jnp.all(jnp.isfinite(out)))
    print("KERNEL_OK")
</pallas_src>

<mosaic_0001>
module attributes {stable_mosaic.version = 11 : i64} {
  func.func @kernel(%arg0: i32, %arg1: memref<2x16x16x3xbf16, #tpu.memory_space<vmem>>, %arg2: memref<16x3xf32, #tpu.memory_space<vmem>>, %arg3: memref<16x3xf32, #tpu.memory_space<vmem>>, %arg4: memref<3x256x256xbf16, #tpu.memory_space<vmem>>, %arg5: memref<9x16xbf16, #tpu.memory_space<vmem>>, %arg6: memref<16x16xf32, #tpu.memory_space<vmem>>, %arg7: memref<16x16xf32, #tpu.memory_space<vmem>>, %arg8: memref<9x16x16xbf16, #tpu.memory_space<vmem>>, %arg9: memref<16x16xf32, #tpu.memory_space<vmem>>, %arg10: memref<16x16xf32, #tpu.memory_space<vmem>>, %arg11: memref<2x16x16x16xbf16, #tpu.memory_space<vmem>>, %arg12: memref<2x24x16x16xbf16, #tpu.memory_space<vmem>>) attributes {dimension_semantics = [#tpu.dimension_semantics<parallel>], iteration_bounds = array<i64: 2>, scalar_prefetch = 0 : i64, scratch_operands = 1 : i64, tpu.core_type = #tpu.core_type<tc>, window_params = [{transform_indices = @transform_0, window_bounds = array<i64: 2, 16, 16, 3>}, {pipeline_mode = #tpu.pipeline_mode<synchronous>, transform_indices = @transform_1, window_bounds = array<i64: 16, 3>}, {pipeline_mode = #tpu.pipeline_mode<synchronous>, transform_indices = @transform_2, window_bounds = array<i64: 16, 3>}, {pipeline_mode = #tpu.pipeline_mode<synchronous>, transform_indices = @transform_3, window_bounds = array<i64: 3, 256, 256>}, {pipeline_mode = #tpu.pipeline_mode<synchronous>, transform_indices = @transform_4, window_bounds = array<i64: 9, 16>}, {pipeline_mode = #tpu.pipeline_mode<synchronous>, transform_indices = @transform_5, window_bounds = array<i64: 16, 16>}, {pipeline_mode = #tpu.pipeline_mode<synchronous>, transform_indices = @transform_6, window_bounds = array<i64: 16, 16>}, {pipeline_mode = #tpu.pipeline_mode<synchronous>, transform_indices = @transform_7, window_bounds = array<i64: 9, 16, 16>}, {pipeline_mode = #tpu.pipeline_mode<synchronous>, transform_indices = @transform_8, window_bounds = array<i64: 16, 16>}, {pipeline_mode = #tpu.pipeline_mode<synchronous>, transform_indices = @transform_9, window_bounds = array<i64: 16, 16>}, {transform_indices = @transform_10, window_bounds = array<i64: 2, 16, 16, 16>}]} {
    %c0 = arith.constant 0 : index
    %c0_0 = arith.constant 0 : index
    %0 = vector.load %arg6[%c0, %c0_0] : memref<16x16xf32, #tpu.memory_space<vmem>>, vector<16x16xf32>
    %c0_1 = arith.constant 0 : index
    %c0_2 = arith.constant 0 : index
    %1 = vector.load %arg7[%c0_1, %c0_2] : memref<16x16xf32, #tpu.memory_space<vmem>>, vector<16x16xf32>
    %c0_3 = arith.constant 0 : index
    %c0_4 = arith.constant 0 : index
    %2 = vector.load %arg9[%c0_3, %c0_4] : memref<16x16xf32, #tpu.memory_space<vmem>>, vector<16x16xf32>
    %c0_5 = arith.constant 0 : index
    %c0_6 = arith.constant 0 : index
    %3 = vector.load %arg10[%c0_5, %c0_6] : memref<16x16xf32, #tpu.memory_space<vmem>>, vector<16x16xf32>
    %c0_7 = arith.constant 0 : index
    %c0_8 = arith.constant 0 : index
    %4 = vector.load %arg2[%c0_7, %c0_8] : memref<16x3xf32, #tpu.memory_space<vmem>>, vector<16x3xf32>
    %c0_9 = arith.constant 0 : index
    %c0_10 = arith.constant 0 : index
    %5 = vector.load %arg3[%c0_9, %c0_10] : memref<16x3xf32, #tpu.memory_space<vmem>>, vector<16x3xf32>
    %cst = arith.constant 0.000000e+00 : bf16
    %6 = vector.broadcast %cst : bf16 to vector<2x4x16x16xbf16>
    %c0_11 = arith.constant 0 : index
    %c0_12 = arith.constant 0 : index
    %c0_13 = arith.constant 0 : index
    %c0_14 = arith.constant 0 : index
    %7 = vector.load %arg12[%c0_11, %c0_12, %c0_13, %c0_14] : memref<2x24x16x16xbf16, #tpu.memory_space<vmem>>, vector<2x4x16x16xbf16>
    tpu.vector_store %arg12[%c0_11, %c0_12, %c0_13, %c0_14], %6 {strides = array<i32>} : memref<2x24x16x16xbf16, #tpu.memory_space<vmem>>, vector<2x4x16x16xbf16>,
    %c0_15 = arith.constant 0 : index
    %c20 = arith.constant 20 : index
    %c0_16 = arith.constant 0 : index
    %c0_17 = arith.constant 0 : index
    %8 = vector.load %arg12[%c0_15, %c20, %c0_16, %c0_17] : memref<2x24x16x16xbf16, #tpu.memory_space<vmem>>, vector<2x4x16x16xbf16>
    tpu.vector_store %arg12[%c0_15, %c20, %c0_16, %c0_17], %6 {strides = array<i32>} : memref<2x24x16x16xbf16, #tpu.memory_space<vmem>>, vector<2x4x16x16xbf16>,
    %c0_18 = arith.constant 0 : index
    %c0_19 = arith.constant 0 : index
    %c0_20 = arith.constant 0 : index
    %c0_21 = arith.constant 0 : index
    %9 = vector.load %arg1[%c0_18, %c0_19, %c0_20, %c0_21] : memref<2x16x16x3xbf16, #tpu.memory_space<vmem>>, vector<2x8x16x3xbf16>
    %10 = arith.extf %9 : vector<2x8x16x3xbf16> to vector<2x8x16x3xf32>
    %11 = vector.shape_cast %4 : vector<16x3xf32> to vector<1x1x16x3xf32>
    %12 = vector.broadcast %11 : vector<1x1x16x3xf32> to vector<2x8x16x3xf32>
    %13 = arith.mulf %10, %12 : vector<2x8x16x3xf32>
    %14 = vector.shape_cast %5 : vector<16x3xf32> to vector<1x1x16x3xf32>
    %15 = vector.broadcast %14 : vector<1x1x16x3xf32> to vector<2x8x16x3xf32>
    %16 = arith.addf %13, %15 : vector<2x8x16x3xf32>
    %17 = vector.shape_cast %16 : vector<2x8x16x3xf32> to vector<256x3xf32>
    %18 = arith.truncf %17 : vector<256x3xf32> to vector<256x3xbf16>
    %c0_22 = arith.constant 0 : index
    %c0_23 = arith.constant 0 : index
    %c0_24 = arith.constant 0 : index
    %19 = vector.load %arg4[%c0_22, %c0_23, %c0_24] : memref<3x256x256xbf16, #tpu.memory_space<vmem>>, vector<1x256x256xbf16>
    %20 = vector.shape_cast %19 : vector<1x256x256xbf16> to vector<256x256xbf16>
    %cst_25 = arith.constant dense<0.000000e+00> : vector<256x3xf32>
    %21 = tpu.matmul %20, %18, %cst_25 {dimension_numbers = #tpu.dot_dimension_numbers<[1], [0], [0], [1], [0, 0, 1, 1], [], []>} : vector<256x256xbf16>, vector<256x3xbf16>, vector<256x3xf32> -> vector<256x3xf32>
    %22 = arith.truncf %21 : vector<256x3xf32> to vector<256x3xbf16>
    %c1 = arith.constant 1 : index
    %c0_26 = arith.constant 0 : index
    %c0_27 = arith.constant 0 : index
    %23 = vector.load %arg4[%c1, %c0_26, %c0_27] : memref<3x256x256xbf16, #tpu.memory_space<vmem>>, vector<1x256x256xbf16>
    %24 = vector.shape_cast %23 : vector<1x256x256xbf16> to vector<256x256xbf16>
    %cst_28 = arith.constant dense<0.000000e+00> : vector<256x3xf32>
    %25 = tpu.matmul %24, %18, %cst_28 {dimension_numbers = #tpu.dot_dimension_numbers<[1], [0], [0], [1], [0, 0, 1, 1], [], []>} : vector<256x256xbf16>, vector<256x3xbf16>, vector<256x3xf32> -> vector<256x3xf32>
    %26 = arith.truncf %25 : vector<256x3xf32> to vector<256x3xbf16>
    %c2 = arith.constant 2 : index
    %c0_29 = arith.constant 0 : index
    %c0_30 = arith.constant 0 : index
    %27 = vector.load %arg4[%c2, %c0_29, %c0_30] : memref<3x256x256xbf16, #tpu.memory_space<vmem>>, vector<1x256x256xbf16>
    %28 = vector.shape_cast %27 : vector<1x256x256xbf16> to vector<256x256xbf16>
    %cst_31 = arith.constant dense<0.000000e+00> : vector<256x3xf32>
    %29 = tpu.matmul %28, %18, %cst_31 {dimension_numbers = #tpu.dot_dimension_numbers<[1], [0], [0], [1], [0, 0, 1, 1], [], []>} : vector<256x256xbf16>, vector<256x3xbf16>, vector<256x3xf32> -> vector<256x3xf32>
    %30 = arith.truncf %29 : vector<256x3xf32> to vector<256x3xbf16>
    %31 = tpu.concatenate %22, %26, %30 in 1 : vector<256x3xbf16>, vector<256x3xbf16>, vector<256x3xbf16> -> vector<256x9xbf16>
    %c0_32 = arith.constant 0 : index
    %c0_33 = arith.constant 0 : index
    %32 = vector.load %arg5[%c0_32, %c0_33] : memref<9x16xbf16, #tpu.memory_space<vmem>>, vector<9x16xbf16>
    %cst_34 = arith.constant dense<0.000000e+00> : vector<256x16xf32>
    %33 = tpu.matmul %31, %32, %cst_34 {dimension_numbers = #tpu.dot_dimension_numbers<[1], [0], [0], [1], [0, 0, 1, 1], [], []>} : vector<256x9xbf16>, vector<9x16xbf16>, vector<256x16xf32> -> vector<256x16xf32>
    %34 = vector.shape_cast %33 : vector<256x16xf32> to vector<2x8x16x16xf32>
    %35 = vector.shape_cast %0 : vector<16x16xf32> to vector<1x1x16x16xf32>
    %36 = vector.broadcast %35 : vector<1x1x16x16xf32> to vector<2x8x16x16xf32>
    %37 = arith.mulf %34, %36 : vector<2x8x16x16xf32>
    %38 = vector.shape_cast %1 : vector<16x16xf32> to vector<1x1x16x16xf32>
    %39 = vector.broadcast %38 : vector<1x1x16x16xf32> to vector<2x8x16x16xf32>
    %40 = arith.addf %37, %39 : vector<2x8x16x16xf32>
    %cst_35 = arith.constant 0.000000e+00 : f32
    %41 = vector.broadcast %cst_35 : f32 to vector<2x8x16x16xf32>
    %42 = arith.maximumf %40, %41 : vector<2x8x16x16xf32>
    %43 = arith.truncf %42 : vector<2x8x16x16xf32> to vector<2x8x16x16xbf16>
    %c0_36 = arith.constant 0 : index
    %c4 = arith.constant 4 : index
    %c0_37 = arith.constant 0 : index
    %c0_38 = arith.constant 0 : index
    %44 = vector.load %arg12[%c0_36, %c4, %c0_37, %c0_38] : memref<2x24x16x16xbf16, #tpu.memory_space<vmem>>, vector<2x8x16x16xbf16>
    tpu.vector_store %arg12[%c0_36, %c4, %c0_37, %c0_38], %43 {strides = array<i32>} : memref<2x24x16x16xbf16, #tpu.memory_space<vmem>>, vector<2x8x16x16xbf16>,
    %c0_39 = arith.constant 0 : index
    %c8 = arith.constant 8 : index
    %c0_40 = arith.constant 0 : index
    %c0_41 = arith.constant 0 : index
    %45 = vector.load %arg1[%c0_39, %c8, %c0_40, %c0_41] : memref<2x16x16x3xbf16, #tpu.memory_space<vmem>>, vector<2x8x16x3xbf16>
    %46 = arith.extf %45 : vector<2x8x16x3xbf16> to vector<2x8x16x3xf32>
    %47 = vector.shape_cast %4 : vector<16x3xf32> to vector<1x1x16x3xf32>
    %48 = vector.broadcast %47 : vector<1x1x16x3xf32> to vector<2x8x16x3xf32>
    %49 = arith.mulf %46, %48 : vector<2x8x16x3xf32>
    %50 = vector.shape_cast %5 : vector<16x3xf32> to vector<1x1x16x3xf32>
    %51 = vector.broadcast %50 : vector<1x1x16x3xf32> to vector<2x8x16x3xf32>
    %52 = arith.addf %49, %51 : vector<2x8x16x3xf32>
    %53 = vector.shape_cast %52 : vector<2x8x16x3xf32> to vector<256x3xf32>
    %54 = arith.truncf %53 : vector<256x3xf32> to vector<256x3xbf16>
    %c0_42 = arith.constant 0 : index
    %c0_43 = arith.constant 0 : index
    %c0_44 = arith.constant 0 : index
    %55 = vector.load %arg4[%c0_42, %c0_43, %c0_44] : memref<3x256x256xbf16, #tpu.memory_space<vmem>>, vector<1x256x256xbf16>
    %56 = vector.shape_cast %55 : vector<1x256x256xbf16> to vector<256x256xbf16>
    %cst_45 = arith.constant dense<0.000000e+00> : vector<256x3xf32>
    %57 = tpu.matmul %56, %54, %cst_45 {dimension_numbers = #tpu.dot_dimension_numbers<[1], [0], [0], [1], [0, 0, 1, 1], [], []>} : vector<256x256xbf16>, vector<256x3xbf16>, vector<256x3xf32> -> vector<256x3xf32>
    %58 = arith.truncf %57 : vector<256x3xf32> to vector<256x3xbf16>
    %c1_46 = arith.constant 1 : index
    %c0_47 = arith.constant 0 : index
    %c0_48 = arith.constant 0 : index
    %59 = vector.load %arg4[%c1_46, %c0_47, %c0_48] : memref<3x256x256xbf16, #tpu.memory_space<vmem>>, vector<1x256x256xbf16>
    %60 = vector.shape_cast %59 : vector<1x256x256xbf16> to vector<256x256xbf16>
    %cst_49 = arith.constant dense<0.000000e+00> : vector<256x3xf32>
    %61 = tpu.matmul %60, %54, %cst_49 {dimension_numbers = #tpu.dot_dimension_numbers<[1], [0], [0], [1], [0, 0, 1, 1], [], []>} : vector<256x256xbf16>, vector<256x3xbf16>, vector<256x3xf32> -> vector<256x3xf32>
    %62 = arith.truncf %61 : vector<256x3xf32> to vector<256x3xbf16>
    %c2_50 = arith.constant 2 : index
    %c0_51 = arith.constant 0 : index
    %c0_52 = arith.constant 0 : index
    %63 = vector.load %arg4[%c2_50, %c0_51, %c0_52] : memref<3x256x256xbf16, #tpu.memory_space<vmem>>, vector<1x256x256xbf16>
    %64 = vector.shape_cast %63 : vector<1x256x256xbf16> to vector<256x256xbf16>
    %cst_53 = arith.constant dense<0.000000e+00> : vector<256x3xf32>
    %65 = tpu.matmul %64, %54, %cst_53 {dimension_numbers = #tpu.dot_dimension_numbers<[1], [0], [0], [1], [0, 0, 1, 1], [], []>} : vector<256x256xbf16>, vector<256x3xbf16>, vector<256x3xf32> -> vector<256x3xf32>
    %66 = arith.truncf %65 : vector<256x3xf32> to vector<256x3xbf16>
    %67 = tpu.concatenate %58, %62, %66 in 1 : vector<256x3xbf16>, vector<256x3xbf16>, vector<256x3xbf16> -> vector<256x9xbf16>
    %c0_54 = arith.constant 0 : index
    %c0_55 = arith.constant 0 : index
    %68 = vector.load %arg5[%c0_54, %c0_55] : memref<9x16xbf16, #tpu.memory_space<vmem>>, vector<9x16xbf16>
    %cst_56 = arith.constant dense<0.000000e+00> : vector<256x16xf32>
    %69 = tpu.matmul %67, %68, %cst_56 {dimension_numbers = #tpu.dot_dimension_numbers<[1], [0], [0], [1], [0, 0, 1, 1], [], []>} : vector<256x9xbf16>, vector<9x16xbf16>, vector<256x16xf32> -> vector<256x16xf32>
    %70 = vector.shape_cast %69 : vector<256x16xf32> to vector<2x8x16x16xf32>
    %71 = vector.shape_cast %0 : vector<16x16xf32> to vector<1x1x16x16xf32>
    %72 = vector.broadcast %71 : vector<1x1x16x16xf32> to vector<2x8x16x16xf32>
    %73 = arith.mulf %70, %72 : vector<2x8x16x16xf32>
    %74 = vector.shape_cast %1 : vector<16x16xf32> to vector<1x1x16x16xf32>
    %75 = vector.broadcast %74 : vector<1x1x16x16xf32> to vector<2x8x16x16xf32>
    %76 = arith.addf %73, %75 : vector<2x8x16x16xf32>
    %cst_57 = arith.constant 0.000000e+00 : f32
    %77 = vector.broadcast %cst_57 : f32 to vector<2x8x16x16xf32>
    %78 = arith.maximumf %76, %77 : vector<2x8x16x16xf32>
    %79 = arith.truncf %78 : vector<2x8x16x16xf32> to vector<2x8x16x16xbf16>
    %c0_58 = arith.constant 0 : index
    %c12 = arith.constant 12 : index
    %c0_59 = arith.constant 0 : index
    %c0_60 = arith.constant 0 : index
    %80 = vector.load %arg12[%c0_58, %c12, %c0_59, %c0_60] : memref<2x24x16x16xbf16, #tpu.memory_space<vmem>>, vector<2x8x16x16xbf16>
    tpu.vector_store %arg12[%c0_58, %c12, %c0_59, %c0_60], %79 {strides = array<i32>} : memref<2x24x16x16xbf16, #tpu.memory_space<vmem>>, vector<2x8x16x16xbf16>,
    %cst_61 = arith.constant 0.000000e+00 : f32
    %81 = vector.broadcast %cst_61 : f32 to vector<256x16xf32>
    %c0_62 = arith.constant 0 : index
    %c0_63 = arith.constant 0 : index
    %c0_64 = arith.constant 0 : index
    %c0_65 = arith.constant 0 : index
    %82 = vector.load %arg12[%c0_62, %c0_63, %c0_64, %c0_65] : memref<2x24x16x16xbf16, #tpu.memory_space<vmem>>, vector<2x8x16x16xbf16>
    %83 = vector.shape_cast %82 : vector<2x8x16x16xbf16> to vector<256x16xbf16>
    %c0_66 = arith.constant 0 : index
    %c0_67 = arith.constant 0 : index
    %c0_68 = arith.constant 0 : index
    %84 = vector.load %arg8[%c0_66, %c0_67, %c0_68] : memref<9x16x16xbf16, #tpu.memory_space<vmem>>, vector<1x16x16xbf16>
    %85 = vector.shape_cast %84 : vector<1x16x16xbf16> to vector<16x16xbf16>
    %cst_69 = arith.constant dense<0.000000e+00> : vector<256x16xf32>
    %86 = tpu.matmul %83, %85, %cst_69 {dimension_numbers = #tpu.dot_dimension_numbers<[1], [0], [0], [1], [0, 0, 1, 1], [], []>} : vector<256x16xbf16>, vector<16x16xbf16>, vector<256x16xf32> -> vector<256x16xf32>
    %87 = arith.addf %81, %86 : vector<256x16xf32>
    %c0_70 = arith.constant 0 : index
    %c1_71 = arith.constant 1 : index
    %c0_72 = arith.constant 0 : index
    %c0_73 = arith.constant 0 : index
    %88 = vector.load %arg12[%c0_70, %c1_71, %c0_72, %c0_73] : memref<2x24x16x16xbf16, #tpu.memory_space<vmem>>, vector<2x8x16x16xbf16>
    %89 = vector.shape_cast %88 : vector<2x8x16x16xbf16> to vector<256x16xbf16>
    %c1_74 = arith.constant 1 : index
    %c0_75 = arith.constant 0 : index
    %c0_76 = arith.constant 0 : index
    %90 = vector.load %arg8[%c1_74, %c0_75, %c0_76] : memref<9x16x16xbf16, #tpu.memory_space<vmem>>, vector<1x16x16xbf16>
    %91 = vector.shape_cast %90 : vector<1x16x16xbf16> to vector<16x16xbf16>
    %cst_77 = arith.constant dense<0.000000e+00> : vector<256x16xf32>
    %92 = tpu.matmul %89, %91, %cst_77 {dimension_numbers = #tpu.dot_dimension_numbers<[1], [0], [0], [1], [0, 0, 1, 1], [], []>} : vector<256x16xbf16>, vector<16x16xbf16>, vector<256x16xf32> -> vector<256x16xf32>
    %93 = arith.addf %87, %92 : vector<256x16xf32>
    %c0_78 = arith.constant 0 : index
    %c2_79 = arith.constant 2 : index
    %c0_80 = arith.constant 0 : index
    %c0_81 = arith.constant 0 : index
    %94 = vector.load %arg12[%c0_78, %c2_79, %c0_80, %c0_81] : memref<2x24x16x16xbf16, #tpu.memory_space<vmem>>, vector<2x8x16x16xbf16>
    %95 = vector.shape_cast %94 : vector<2x8x16x16xbf16> to vector<256x16xbf16>
    %c2_82 = arith.constant 2 : index
    %c0_83 = arith.constant 0 : index
    %c0_84 = arith.constant 0 : index
    %96 = vector.load %arg8[%c2_82, %c0_83, %c0_84] : memref<9x16x16xbf16, #tpu.memory_space<vmem>>, vector<1x16x16xbf16>
    %97 = vector.shape_cast %96 : vector<1x16x16xbf16> to vector<16x16xbf16>
    %cst_85 = arith.constant dense<0.000000e+00> : vector<256x16xf32>
    %98 = tpu.matmul %95, %97, %cst_85 {dimension_numbers = #tpu.dot_dimension_numbers<[1], [0], [0], [1], [0, 0, 1, 1], [], []>} : vector<256x16xbf16>, vector<16x16xbf16>, vector<256x16xf32> -> vector<256x16xf32>
    %99 = arith.addf %93, %98 : vector<256x16xf32>
    %c0_86 = arith.constant 0 : index
    %c3 = arith.constant 3 : index
    %c0_87 = arith.constant 0 : index
    %c0_88 = arith.constant 0 : index
    %100 = vector.load %arg12[%c0_86, %c3, %c0_87, %c0_88] : memref<2x24x16x16xbf16, #tpu.memory_space<vmem>>, vector<2x8x16x16xbf16>
    %101 = vector.shape_cast %100 : vector<2x8x16x16xbf16> to vector<256x16xbf16>
    %c3_89 = arith.constant 3 : index
    %c0_90 = arith.constant 0 : index
    %c0_91 = arith.constant 0 : index
    %102 = vector.load %arg8[%c3_89, %c0_90, %c0_91] : memref<9x16x16xbf16, #tpu.memory_space<vmem>>, vector<1x16x16xbf16>
    %103 = vector.shape_cast %102 : vector<1x16x16xbf16> to vector<16x16xbf16>
    %cst_92 = arith.constant dense<0.000000e+00> : vector<256x16xf32>
    %104 = tpu.matmul %101, %103, %cst_92 {dimension_numbers = #tpu.dot_dimension_numbers<[1], [0], [0], [1], [0, 0, 1, 1], [], []>} : vector<256x16xbf16>, vector<16x16xbf16>, vector<256x16xf32> -> vector<256x16xf32>
    %105 = arith.addf %99, %104 : vector<256x16xf32>
    %c0_93 = arith.constant 0 : index
    %c4_94 = arith.constant 4 : index
    %c0_95 = arith.constant 0 : index
    %c0_96 = arith.constant 0 : index
    %106 = vector.load %arg12[%c0_93, %c4_94, %c0_95, %c0_96] : memref<2x24x16x16xbf16, #tpu.memory_space<vmem>>, vector<2x8x16x16xbf16>
    %107 = vector.shape_cast %106 : vector<2x8x16x16xbf16> to vector<256x16xbf16>
    %c4_97 = arith.constant 4 : index
    %c0_98 = arith.constant 0 : index
    %c0_99 = arith.constant 0 : index
    %108 = vector.load %arg8[%c4_97, %c0_98, %c0_99] : memref<9x16x16xbf16, #tpu.memory_space<vmem>>, vector<1x16x16xbf16>
    %109 = vector.shape_cast %108 : vector<1x16x16xbf16> to vector<16x16xbf16>
    %cst_100 = arith.constant dense<0.000000e+00> : vector<256x16xf32>
    %110 = tpu.matmul %107, %109, %cst_100 {dimension_numbers = #tpu.dot_dimension_numbers<[1], [0], [0], [1], [0, 0, 1, 1], [], []>} : vector<256x16xbf16>, vector<16x16xbf16>, vector<256x16xf32> -> vector<256x16xf32>
    %111 = arith.addf %105, %110 : vector<256x16xf32>
    %c0_101 = arith.constant 0 : index
    %c5 = arith.constant 5 : index
    %c0_102 = arith.constant 0 : index
    %c0_103 = arith.constant 0 : index
    %112 = vector.load %arg12[%c0_101, %c5, %c0_102, %c0_103] : memref<2x24x16x16xbf16, #tpu.memory_space<vmem>>, vector<2x8x16x16xbf16>
    %113 = vector.shape_cast %112 : vector<2x8x16x16xbf16> to vector<256x16xbf16>
    %c5_104 = arith.constant 5 : index
    %c0_105 = arith.constant 0 : index
    %c0_106 = arith.constant 0 : index
    %114 = vector.load %arg8[%c5_104, %c0_105, %c0_106] : memref<9x16x16xbf16, #tpu.memory_space<vmem>>, vector<1x16x16xbf16>
    %115 = vector.shape_cast %114 : vector<1x16x16xbf16> to vector<16x16xbf16>
    %cst_107 = arith.constant dense<0.000000e+00> : vector<256x16xf32>
    %116 = tpu.matmul %113, %115, %cst_107 {dimension_numbers = #tpu.dot_dimension_numbers<[1], [0], [0], [1], [0, 0, 1, 1], [], []>} : vector<256x16xbf16>, vector<16x16xbf16>, vector<256x16xf32> -> vector<256x16xf32>
    %117 = arith.addf %111, %116 : vector<256x16xf32>
    %c0_108 = arith.constant 0 : index
    %c6 = arith.constant 6 : index
    %c0_109 = arith.constant 0 : index
    %c0_110 = arith.constant 0 : index
    %118 = vector.load %arg12[%c0_108, %c6, %c0_109, %c0_110] : memref<2x24x16x16xbf16, #tpu.memory_space<vmem>>, vector<2x8x16x16xbf16>
    %119 = vector.shape_cast %118 : vector<2x8x16x16xbf16> to vector<256x16xbf16>
    %c6_111 = arith.constant 6 : index
    %c0_112 = arith.constant 0 : index
    %c0_113 = arith.constant 0 : index
    %120 = vector.load %arg8[%c6_111, %c0_112, %c0_113] : memref<9x16x16xbf16, #tpu.memory_space<vmem>>, vector<1x16x16xbf16>
    %121 = vector.shape_cast %120 : vector<1x16x16xbf16> to vector<16x16xbf16>
    %cst_114 = arith.constant dense<0.000000e+00> : vector<256x16xf32>
    %122 = tpu.matmul %119, %121, %cst_114 {dimension_numbers = #tpu.dot_dimension_numbers<[1], [0], [0], [1], [0, 0, 1, 1], [], []>} : vector<256x16xbf16>, vector<16x16xbf16>, vector<256x16xf32> -> vector<256x16xf32>
    %123 = arith.addf %117, %122 : vector<256x16xf32>
    %c0_115 = arith.constant 0 : index
    %c7 = arith.constant 7 : index
    %c0_116 = arith.constant 0 : index
    %c0_117 = arith.constant 0 : index
    %124 = vector.load %arg12[%c0_115, %c7, %c0_116, %c0_117] : memref<2x24x16x16xbf16, #tpu.memory_space<vmem>>, vector<2x8x16x16xbf16>
    %125 = vector.shape_cast %124 : vector<2x8x16x16xbf16> to vector<256x16xbf16>
    %c7_118 = arith.constant 7 : index
    %c0_119 = arith.constant 0 : index
    %c0_120 = arith.constant 0 : index
    %126 = vector.load %arg8[%c7_118, %c0_119, %c0_120] : memref<9x16x16xbf16, #tpu.memory_space<vmem>>, vector<1x16x16xbf16>
    %127 = vector.shape_cast %126 : vector<1x16x16xbf16> to vector<16x16xbf16>
    %cst_121 = arith.constant dense<0.000000e+00> : vector<256x16xf32>
    %128 = tpu.matmul %125, %127, %cst_121 {dimension_numbers = #tpu.dot_dimension_numbers<[1], [0], [0], [1], [0, 0, 1, 1], [], []>} : vector<256x16xbf16>, vector<16x16xbf16>, vector<256x16xf32> -> vector<256x16xf32>
    %129 = arith.addf %123, %128 : vector<256x16xf32>
    %c0_122 = arith.constant 0 : index
    %c8_123 = arith.constant 8 : index
    %c0_124 = arith.constant 0 : index
    %c0_125 = arith.constant 0 : index
    %130 = vector.load %arg12[%c0_122, %c8_123, %c0_124, %c0_125] : memref<2x24x16x16xbf16, #tpu.memory_space<vmem>>, vector<2x8x16x16xbf16>
    %131 = vector.shape_cast %130 : vector<2x8x16x16xbf16> to vector<256x16xbf16>
    %c8_126 = arith.constant 8 : index
    %c0_127 = arith.constant 0 : index
    %c0_128 = arith.constant 0 : index
    %132 = vector.load %arg8[%c8_126, %c0_127, %c0_128] : memref<9x16x16xbf16, #tpu.memory_space<vmem>>, vector<1x16x16xbf16>
    %133 = vector.shape_cast %132 : vector<1x16x16xbf16> to vector<16x16xbf16>
    %cst_129 = arith.constant dense<0.000000e+00> : vector<256x16xf32>
    %134 = tpu.matmul %131, %133, %cst_129 {dimension_numbers = #tpu.dot_dimension_numbers<[1], [0], [0], [1], [0, 0, 1, 1], [], []>} : vector<256x16xbf16>, vector<16x16xbf16>, vector<256x16xf32> -> vector<256x16xf32>
    %135 = arith.addf %129, %134 : vector<256x16xf32>
    %136 = vector.shape_cast %135 : vector<256x16xf32> to vector<2x8x16x16xf32>
    %137 = vector.shape_cast %2 : vector<16x16xf32> to vector<1x1x16x16xf32>
    %138 = vector.broadcast %137 : vector<1x1x16x16xf32> to vector<2x8x16x16xf32>
    %139 = arith.mulf %136, %138 : vector<2x8x16x16xf32>
    %140 = vector.shape_cast %3 : vector<16x16xf32> to vector<1x1x16x16xf32>
    %141 = vector.broadcast %140 : vector<1x1x16x16xf32> to vector<2x8x16x16xf32>
    %142 = arith.addf %139, %141 : vector<2x8x16x16xf32>
    %cst_130 = arith.constant 0.000000e+00 : f32
    %143 = vector.broadcast %cst_130 : f32 to vector<2x8x16x16xf32>
    %144 = arith.maximumf %142, %143 : vector<2x8x16x16xf32>
    %145 = arith.truncf %144 : vector<2x8x16x16xf32> to vector<2x8x16x16xbf16>
    %c0_131 = arith.constant 0 : index
    %c0_132 = arith.constant 0 : index
    %c0_133 = arith.constant 0 : index
    %c0_134 = arith.constant 0 : index
    %146 = vector.load %arg11[%c0_131, %c0_132, %c0_133, %c0_134] : memref<2x16x16x16xbf16, #tpu.memory_space<vmem>>, vector<2x8x16x16xbf16>
    tpu.vector_store %arg11[%c0_131, %c0_132, %c0_133, %c0_134], %145 {strides = array<i32>} : memref<2x16x16x16xbf16, #tpu.memory_space<vmem>>, vector<2x8x16x16xbf16>,
    %cst_135 = arith.constant 0.000000e+00 : f32
    %147 = vector.broadcast %cst_135 : f32 to vector<256x16xf32>
    %c0_136 = arith.constant 0 : index
    %c8_137 = arith.constant 8 : index
    %c0_138 = arith.constant 0 : index
    %c0_139 = arith.constant 0 : index
    %148 = vector.load %arg12[%c0_136, %c8_137, %c0_138, %c0_139] : memref<2x24x16x16xbf16, #tpu.memory_space<vmem>>, vector<2x8x16x16xbf16>
    %149 = vector.shape_cast %148 : vector<2x8x16x16xbf16> to vector<256x16xbf16>
    %c0_140 = arith.constant 0 : index
    %c0_141 = arith.constant 0 : index
    %c0_142 = arith.constant 0 : index
    %150 = vector.load %arg8[%c0_140, %c0_141, %c0_142] : memref<9x16x16xbf16, #tpu.memory_space<vmem>>, vector<1x16x16xbf16>
    %151 = vector.shape_cast %150 : vector<1x16x16xbf16> to vector<16x16xbf16>
    %cst_143 = arith.constant dense<0.000000e+00> : vector<256x16xf32>
    %152 = tpu.matmul %149, %151, %cst_143 {dimension_numbers = #tpu.dot_dimension_numbers<[1], [0], [0], [1], [0, 0, 1, 1], [], []>} : vector<256x16xbf16>, vector<16x16xbf16>, vector<256x16xf32> -> vector<256x16xf32>
    %153 = arith.addf %147, %152 : vector<256x16xf32>
    %c0_144 = arith.constant 0 : index
    %c9 = arith.constant 9 : index
    %c0_145 = arith.constant 0 : index
    %c0_146 = arith.constant 0 : index
    %154 = vector.load %arg12[%c0_144, %c9, %c0_145, %c0_146] : memref<2x24x16x16xbf16, #tpu.memory_space<vmem>>, vector<2x8x16x16xbf16>
    %155 = vector.shape_cast %154 : vector<2x8x16x16xbf16> to vector<256x16xbf16>
    %c1_147 = arith.constant 1 : index
    %c0_148 = arith.constant 0 : index
    %c0_149 = arith.constant 0 : index
    %156 = vector.load %arg8[%c1_147, %c0_148, %c0_149] : memref<9x16x16xbf16, #tpu.memory_space<vmem>>, vector<1x16x16xbf16>
    %157 = vector.shape_cast %156 : vector<1x16x16xbf16> to vector<16x16xbf16>
    %cst_150 = arith.constant dense<0.000000e+00> : vector<256x16xf32>
    %158 = tpu.matmul %155, %157, %cst_150 {dimension_numbers = #tpu.dot_dimension_numbers<[1], [0], [0], [1], [0, 0, 1, 1], [], []>} : vector<256x16xbf16>, vector<16x16xbf16>, vector<256x16xf32> -> vector<256x16xf32>
    %159 = arith.addf %153, %158 : vector<256x16xf32>
    %c0_151 = arith.constant 0 : index
    %c10 = arith.constant 10 : index
    %c0_152 = arith.constant 0 : index
    %c0_153 = arith.constant 0 : index
    %160 = vector.load %arg12[%c0_151, %c10, %c0_152, %c0_153] : memref<2x24x16x16xbf16, #tpu.memory_space<vmem>>, vector<2x8x16x16xbf16>
    %161 = vector.shape_cast %160 : vector<2x8x16x16xbf16> to vector<256x16xbf16>
    %c2_154 = arith.constant 2 : index
    %c0_155 = arith.constant 0 : index
    %c0_156 = arith.constant 0 : index
    %162 = vector.load %arg8[%c2_154, %c0_155, %c0_156] : memref<9x16x16xbf16, #tpu.memory_space<vmem>>, vector<1x16x16xbf16>
    %163 = vector.shape_cast %162 : vector<1x16x16xbf16> to vector<16x16xbf16>
    %cst_157 = arith.constant dense<0.000000e+00> : vector<256x16xf32>
    %164 = tpu.matmul %161, %163, %cst_157 {dimension_numbers = #tpu.dot_dimension_numbers<[1], [0], [0], [1], [0, 0, 1, 1], [], []>} : vector<256x16xbf16>, vector<16x16xbf16>, vector<256x16xf32> -> vector<256x16xf32>
    %165 = arith.addf %159, %164 : vector<256x16xf32>
    %c0_158 = arith.constant 0 : index
    %c11 = arith.constant 11 : index
    %c0_159 = arith.constant 0 : index
    %c0_160 = arith.constant 0 : index
    %166 = vector.load %arg12[%c0_158, %c11, %c0_159, %c0_160] : memref<2x24x16x16xbf16, #tpu.memory_space<vmem>>, vector<2x8x16x16xbf16>
    %167 = vector.shape_cast %166 : vector<2x8x16x16xbf16> to vector<256x16xbf16>
    %c3_161 = arith.constant 3 : index
    %c0_162 = arith.constant 0 : index
    %c0_163 = arith.constant 0 : index
    %168 = vector.load %arg8[%c3_161, %c0_162, %c0_163] : memref<9x16x16xbf16, #tpu.memory_space<vmem>>, vector<1x16x16xbf16>
    %169 = vector.shape_cast %168 : vector<1x16x16xbf16> to vector<16x16xbf16>
    %cst_164 = arith.constant dense<0.000000e+00> : vector<256x16xf32>
    %170 = tpu.matmul %167, %169, %cst_164 {dimension_numbers = #tpu.dot_dimension_numbers<[1], [0], [0], [1], [0, 0, 1, 1], [], []>} : vector<256x16xbf16>, vector<16x16xbf16>, vector<256x16xf32> -> vector<256x16xf32>
    %171 = arith.addf %165, %170 : vector<256x16xf32>
    %c0_165 = arith.constant 0 : index
    %c12_166 = arith.constant 12 : index
    %c0_167 = arith.constant 0 : index
    %c0_168 = arith.constant 0 : index
    %172 = vector.load %arg12[%c0_165, %c12_166, %c0_167, %c0_168] : memref<2x24x16x16xbf16, #tpu.memory_space<vmem>>, vector<2x8x16x16xbf16>
    %173 = vector.shape_cast %172 : vector<2x8x16x16xbf16> to vector<256x16xbf16>
    %c4_169 = arith.constant 4 : index
    %c0_170 = arith.constant 0 : index
    %c0_171 = arith.constant 0 : index
    %174 = vector.load %arg8[%c4_169, %c0_170, %c0_171] : memref<9x16x16xbf16, #tpu.memory_space<vmem>>, vector<1x16x16xbf16>
    %175 = vector.shape_cast %174 : vector<1x16x16xbf16> to vector<16x16xbf16>
    %cst_172 = arith.constant dense<0.000000e+00> : vector<256x16xf32>
    %176 = tpu.matmul %173, %175, %cst_172 {dimension_numbers = #tpu.dot_dimension_numbers<[1], [0], [0], [1], [0, 0, 1, 1], [], []>} : vector<256x16xbf16>, vector<16x16xbf16>, vector<256x16xf32> -> vector<256x16xf32>
    %177 = arith.addf %171, %176 : vector<256x16xf32>
    %c0_173 = arith.constant 0 : index
    %c13 = arith.constant 13 : index
    %c0_174 = arith.constant 0 : index
    %c0_175 = arith.constant 0 : index
    %178 = vector.load %arg12[%c0_173, %c13, %c0_174, %c0_175] : memref<2x24x16x16xbf16, #tpu.memory_space<vmem>>, vector<2x8x16x16xbf16>
    %179 = vector.shape_cast %178 : vector<2x8x16x16xbf16> to vector<256x16xbf16>
    %c5_176 = arith.constant 5 : index
    %c0_177 = arith.constant 0 : index
    %c0_178 = arith.constant 0 : index
    %180 = vector.load %arg8[%c5_176, %c0_177, %c0_178] : memref<9x16x16xbf16, #tpu.memory_space<vmem>>, vector<1x16x16xbf16>
    %181 = vector.shape_cast %180 : vector<1x16x16xbf16> to vector<16x16xbf16>
    %cst_179 = arith.constant dense<0.000000e+00> : vector<256x16xf32>
    %182 = tpu.matmul %179, %181, %cst_179 {dimension_numbers = #tpu.dot_dimension_numbers<[1], [0], [0], [1], [0, 0, 1, 1], [], []>} : vector<256x16xbf16>, vector<16x16xbf16>, vector<256x16xf32> -> vector<256x16xf32>
    %183 = arith.addf %177, %182 : vector<256x16xf32>
    %c0_180 = arith.constant 0 : index
    %c14 = arith.constant 14 : index
    %c0_181 = arith.constant 0 : index
    %c0_182 = arith.constant 0 : index
    %184 = vector.load %arg12[%c0_180, %c14, %c0_181, %c0_182] : memref<2x24x16x16xbf16, #tpu.memory_space<vmem>>, vector<2x8x16x16xbf16>
    %185 = vector.shape_cast %184 : vector<2x8x16x16xbf16> to vector<256x16xbf16>
    %c6_183 = arith.constant 6 : index
    %c0_184 = arith.constant 0 : index
    %c0_185 = arith.constant 0 : index
    %186 = vector.load %arg8[%c6_183, %c0_184, %c0_185] : memref<9x16x16xbf16, #tpu.memory_space<vmem>>, vector<1x16x16xbf16>
    %187 = vector.shape_cast %186 : vector<1x16x16xbf16> to vector<16x16xbf16>
    %cst_186 = arith.constant dense<0.000000e+00> : vector<256x16xf32>
    %188 = tpu.matmul %185, %187, %cst_186 {dimension_numbers = #tpu.dot_dimension_numbers<[1], [0], [0], [1], [0, 0, 1, 1], [], []>} : vector<256x16xbf16>, vector<16x16xbf16>, vector<256x16xf32> -> vector<256x16xf32>
    %189 = arith.addf %183, %188 : vector<256x16xf32>
    %c0_187 = arith.constant 0 : index
    %c15 = arith.constant 15 : index
    %c0_188 = arith.constant 0 : index
    %c0_189 = arith.constant 0 : index
    %190 = vector.load %arg12[%c0_187, %c15, %c0_188, %c0_189] : memref<2x24x16x16xbf16, #tpu.memory_space<vmem>>, vector<2x8x16x16xbf16>
    %191 = vector.shape_cast %190 : vector<2x8x16x16xbf16> to vector<256x16xbf16>
    %c7_190 = arith.constant 7 : index
    %c0_191 = arith.constant 0 : index
    %c0_192 = arith.constant 0 : index
    %192 = vector.load %arg8[%c7_190, %c0_191, %c0_192] : memref<9x16x16xbf16, #tpu.memory_space<vmem>>, vector<1x16x16xbf16>
    %193 = vector.shape_cast %192 : vector<1x16x16xbf16> to vector<16x16xbf16>
    %cst_193 = arith.constant dense<0.000000e+00> : vector<256x16xf32>
    %194 = tpu.matmul %191, %193, %cst_193 {dimension_numbers = #tpu.dot_dimension_numbers<[1], [0], [0], [1], [0, 0, 1, 1], [], []>} : vector<256x16xbf16>, vector<16x16xbf16>, vector<256x16xf32> -> vector<256x16xf32>
    %195 = arith.addf %189, %194 : vector<256x16xf32>
    %c0_194 = arith.constant 0 : index
    %c16 = arith.constant 16 : index
    %c0_195 = arith.constant 0 : index
    %c0_196 = arith.constant 0 : index
    %196 = vector.load %arg12[%c0_194, %c16, %c0_195, %c0_196] : memref<2x24x16x16xbf16, #tpu.memory_space<vmem>>, vector<2x8x16x16xbf16>
    %197 = vector.shape_cast %196 : vector<2x8x16x16xbf16> to vector<256x16xbf16>
    %c8_197 = arith.constant 8 : index
    %c0_198 = arith.constant 0 : index
    %c0_199 = arith.constant 0 : index
    %198 = vector.load %arg8[%c8_197, %c0_198, %c0_199] : memref<9x16x16xbf16, #tpu.memory_space<vmem>>, vector<1x16x16xbf16>
    %199 = vector.shape_cast %198 : vector<1x16x16xbf16> to vector<16x16xbf16>
    %cst_200 = arith.constant dense<0.000000e+00> : vector<256x16xf32>
    %200 = tpu.matmul %197, %199, %cst_200 {dimension_numbers = #tpu.dot_dimension_numbers<[1], [0], [0], [1], [0, 0, 1, 1], [], []>} : vector<256x16xbf16>, vector<16x16xbf16>, vector<256x16xf32> -> vector<256x16xf32>
    %201 = arith.addf %195, %200 : vector<256x16xf32>
    %202 = vector.shape_cast %201 : vector<256x16xf32> to vector<2x8x16x16xf32>
    %203 = vector.shape_cast %2 : vector<16x16xf32> to vector<1x1x16x16xf32>
    %204 = vector.broadcast %203 : vector<1x1x16x16xf32> to vector<2x8x16x16xf32>
    %205 = arith.mulf %202, %204 : vector<2x8x16x16xf32>
    %206 = vector.shape_cast %3 : vector<16x16xf32> to vector<1x1x16x16xf32>
    %207 = vector.broadcast %206 : vector<1x1x16x16xf32> to vector<2x8x16x16xf32>
    %208 = arith.addf %205, %207 : vector<2x8x16x16xf32>
    %cst_201 = arith.constant 0.000000e+00 : f32
    %209 = vector.broadcast %cst_201 : f32 to vector<2x8x16x16xf32>
    %210 = arith.maximumf %208, %209 : vector<2x8x16x16xf32>
    %211 = arith.truncf %210 : vector<2x8x16x16xf32> to vector<2x8x16x16xbf16>
    %c0_202 = arith.constant 0 : index
    %c8_203 = arith.constant 8 : index
    %c0_204 = arith.constant 0 : index
    %c0_205 = arith.constant 0 : index
    %212 = vector.load %arg11[%c0_202, %c8_203, %c0_204, %c0_205] : memref<2x16x16x16xbf16, #tpu.memory_space<vmem>>, vector<2x8x16x16xbf16>
    tpu.vector_store %arg11[%c0_202, %c8_203, %c0_204, %c0_205], %211 {strides = array<i32>} : memref<2x16x16x16xbf16, #tpu.memory_space<vmem>>, vector<2x8x16x16xbf16>,
    return
  }
  func.func @transform_0(%arg0: i32) -> (i32, i32, i32, i32) {
    %c0_i32 = arith.constant 0 : i32
    %c0_i32_0 = arith.constant 0 : i32
    %c0_i32_1 = arith.constant 0 : i32
    %c0_i32_2 = arith.constant 0 : i32
    return %arg0, %c0_i32, %c0_i32_0, %c0_i32_1 : i32, i32, i32, i32
  }
  func.func @transform_1(%arg0: i32) -> (i32, i32) {
    %c0_i32 = arith.constant 0 : i32
    %c0_i32_0 = arith.constant 0 : i32
    %c0_i32_1 = arith.constant 0 : i32
    return %c0_i32, %c0_i32_0 : i32, i32
  }
  func.func @transform_2(%arg0: i32) -> (i32, i32) {
    %c0_i32 = arith.constant 0 : i32
    %c0_i32_0 = arith.constant 0 : i32
    %c0_i32_1 = arith.constant 0 : i32
    return %c0_i32, %c0_i32_0 : i32, i32
  }
  func.func @transform_3(%arg0: i32) -> (i32, i32, i32) {
    %c0_i32 = arith.constant 0 : i32
    %c0_i32_0 = arith.constant 0 : i32
    %c0_i32_1 = arith.constant 0 : i32
    %c0_i32_2 = arith.constant 0 : i32
    return %c0_i32, %c0_i32_0, %c0_i32_1 : i32, i32, i32
  }
  func.func @transform_4(%arg0: i32) -> (i32, i32) {
    %c0_i32 = arith.constant 0 : i32
    %c0_i32_0 = arith.constant 0 : i32
    %c0_i32_1 = arith.constant 0 : i32
    return %c0_i32, %c0_i32_0 : i32, i32
  }
  func.func @transform_5(%arg0: i32) -> (i32, i32) {
    %c0_i32 = arith.constant 0 : i32
    %c0_i32_0 = arith.constant 0 : i32
    %c0_i32_1 = arith.constant 0 : i32
    return %c0_i32, %c0_i32_0 : i32, i32
  }
  func.func @transform_6(%arg0: i32) -> (i32, i32) {
    %c0_i32 = arith.constant 0 : i32
    %c0_i32_0 = arith.constant 0 : i32
    %c0_i32_1 = arith.constant 0 : i32
    return %c0_i32, %c0_i32_0 : i32, i32
  }
  func.func @transform_7(%arg0: i32) -> (i32, i32, i32) {
    %c0_i32 = arith.constant 0 : i32
    %c0_i32_0 = arith.constant 0 : i32
    %c0_i32_1 = arith.constant 0 : i32
    %c0_i32_2 = arith.constant 0 : i32
    return %c0_i32, %c0_i32_0, %c0_i32_1 : i32, i32, i32
  }
  func.func @transform_8(%arg0: i32) -> (i32, i32) {
    %c0_i32 = arith.constant 0 : i32
    %c0_i32_0 = arith.constant 0 : i32
    %c0_i32_1 = arith.constant 0 : i32
    return %c0_i32, %c0_i32_0 : i32, i32
  }
  func.func @transform_9(%arg0: i32) -> (i32, i32) {
    %c0_i32 = arith.constant 0 : i32
    %c0_i32_0 = arith.constant 0 : i32
    %c0_i32_1 = arith.constant 0 : i32
    return %c0_i32, %c0_i32_0 : i32, i32
  }
  func.func @transform_10(%arg0: i32) -> (i32, i32, i32, i32) {
    %c0_i32 = arith.constant 0 : i32
    %c0_i32_0 = arith.constant 0 : i32
    %c0_i32_1 = arith.constant 0 : i32
    %c0_i32_2 = arith.constant 0 : i32
    return %arg0, %c0_i32, %c0_i32_0, %c0_i32_1 : i32, i32, i32, i32
  }
}

</mosaic_0001>

<bundles_post_ra>
// kernel: tpu_custom_call.1
= control target key start
LH: loop header
LB: loop body
LE: loop exit
PB: predicated region body
PF: predicated region fallthrough
CT: control target
= control target key end

     0   :  { %15 = vsyncpa [#allocation4], 0  ;;  %s15246_s0 = inlined_call_operand.vmem [shape: bf16[4,16,16,3], index: 0, kind: input, shape index: {}]   ;;  %s15247_s1 = inlined_call_operand.vmem [shape: f32[16,3], index: 1, kind: input, shape index: {}]   ;;  %s15248_s2 = inlined_call_operand.vmem [shape: f32[16,3], index: 2, kind: input, shape index: {}]   ;;  %s15249_s3 = inlined_call_operand.hbm [shape: bf16[3,256,256], index: 3, kind: input, shape index: {}]   ;;  %s15250_s4 = inlined_call_operand.vmem [shape: bf16[9,16], index: 4, kind: input, shape index: {}]   ;;  %s15251_s5 = inlined_call_operand.vmem [shape: f32[16,16], index: 5, kind: input, shape index: {}]   ;;  %s15252_s6 = inlined_call_operand.vmem [shape: f32[16,16], index: 6, kind: input, shape index: {}]   ;;  %s15253_s7 = inlined_call_operand.vmem [shape: bf16[9,16,16], index: 7, kind: input, shape index: {}]   ;;  %s15254_s8 = inlined_call_operand.vmem [shape: f32[16,16], index: 8, kind: input, shape index: {}]   ;;  %s15255_s9 = inlined_call_operand.vmem [shape: f32[16,16], index: 9, kind: input, shape index: {}]   ;;  %s15256_s10 = inlined_call_operand.hbm [shape: bf16[4,16,16,16], index: 10, kind: output, shape index: {}]  }
   0x1   :  { %16 = vsyncpa [#allocation5], 0 }
   0x2   :  { %18 = vsyncpa [#allocation5 + $0x1], 0  ;;  %s12878_s13 = smov 0   ;;  %s12880_s14 = smov 0  }
   0x3   :  { %s12882_s15 = smov 0   ;;  %s12884_s16 = smov 0  }
   0x4 LB: > { %s12899_s17 = sadd.s32 4294967295, %s12811_s16   ;;  %s9205_s18 = sadd.s32 4294967294, %s12811_s16   ;;  %s12811_s16 = sphi %s12884_s16, %s15471_s16   ;;  %s12807_s15 = sphi %s12882_s15, %s15470_s15   ;;  %s12803_s14 = sphi %s12880_s14, %s15469_s14   ;;  %s12799_s13 = sphi %s12878_s13, %s15468_s13  }
   0x5   : > { %s12903_s19 = sadd.s32 1, %s12811_s16   ;;  %s246_s20 = sadd.s32 1, %s12807_s15 }
   0x6   : > { %s243_s21 = ssub.s32 %s12811_s16, %s12903_s19  ;;  %p256_p0 = scmp.ne.s32.totalorder %s12807_s15, %s12803_s14 }
   0x7   : > { %p244_p1 = scmp.eq.s32.totalorder %s243_s21, 0  ;;  %p257_p2 = scmp.eq.s32.totalorder %s12899_s17, 1 }
   0x8   : > { %p262_p3 = scmp.ne.s32.totalorder %s12803_s14, %s12799_s13  ;;  %p263_p4 = scmp.eq.s32.totalorder %s9205_s18, 1 }
   0x9   : > { %s12914_s22 = scalar_select %p244_p1, %s12807_s15, %s246_s20  }
   0xa   : > { %p12916_p5 = por %p257_p2, %p256_p0  ;;  %p12920_p6 = por %p263_p4, %p262_p3 }
   0xb   : > { %p9206_p7 = scmp.ge.s32.totalorder %s12811_s16, 1  ;;  %p270_p8 = scmp.lt.s32.totalorder %s12811_s16, 3 }
   0xc   : > { %s15310_s23 = scalar_select %p12916_p5, 1, 0 }
   0xd   : > { %s15311_s24 = scalar_select %p12920_p6, 1, 0 }
   0xe   : > { %p15257_p9 = scmp.eq.s32.totalorder %s12899_s17, 0  ;;  %p12927_p10 = pnand %p9206_p7, %p270_p8 }
   0xf   : > { %s12813_s26 = smov [#allocation3]   ;;  %s12717_s11 = scalar_lea.hbm %s15249_s3, 12288 }
  0x10   : > { %s15312_s25 = scalar_select %p12927_p10, 1, 0 }
  0x11   : > { %s288_s27 = sshll.u32 %s12813_s26, 4  ;;  %p12349_p11 = pneg %p12927_p10  ;;  %s289_s27 = int_to_ptr.vmem [resolvable:$true] %s288_s27 }
  0x12   : > { %p12718_p13 = scmp.ne.s32.totalorder %s15249_s3, %s12717_s11  ;;  %p12724_p3 = scmp.lt.u32.totalorder %s12717_s11, %s15249_s3 }
  0x13   : > { %p12935_p12 = pnand %p15257_p9, %p12349_p11 }
  0x15   : > { %p12719_p0 = pneg %p12935_p12 }
  0x17   : > { %p12720_p1 = pnand %p12719_p0, %p12718_p13 }
  0x19   : > { %p12721_p2 = pneg %p12720_p1 }
  0x1b   : > { %p12726_p4 = pnand %p12724_p3, %p12721_p2 }
  0x1d   : > { %12729 = shalt.err (!%p12726_p4)
}
  0x1e   : > { %s12730_s26 = scalar_lea.vmem %s289_s27, 12288  ;;  %p12738_p9 = scmp.lt.s32.totalorder %s289_s27, %s289_s27 }
  0x1f   : > { %p12731_p7 = scmp.ne.s32.totalorder %s289_s27, %s12730_s26  ;;  %p12739_p6 = scmp.lt.s32.totalorder %s12730_s26, %s12730_s26 }
  0x21   : > { %p12733_p8 = pnand %p12731_p7, %p12719_p0  ;;  %p12740_p5 = por %p12739_p6, %p12738_p9 }
  0x23   : > { %p12734_p11 = pneg %p12733_p8 }
  0x25   : > { %p12741_p10 = pnand %p12740_p5, %p12734_p11 }
  0x27   : > { %12744 = shalt.err (!%p12741_p10)
}
  0x28   : > { %s12814_s29 = smov 128   ;;  %s12815_s30 = smov 8  }
  0x29   : > { %12352 = dma.hbm_to_vmem [thread:$0]  (!%p12935_p12), %s15249_s3, 12288, %s289_s27, [#allocation4], %s12814_s29, %s12814_s29, %s12815_s30  }
  0x2a   : > { %p15314_p13 = scmp.ne.s32.totalorder %s15312_s25, 0 }
  0x2c   : > { %332 = sbr.rel (%p15314_p13) target bundleno = 2240 (0x8c0), region = 60 }
  0x33   : > { %p15315_p1 = scmp.eq.s32.totalorder %s12899_s17, 0 }
  0x35   : > { %12790 = dma.done.wait (%p15315_p1), [#allocation4], 12288   ;;  %p15316_p0 = pmov %p15315_p1 }
  0x36   : > { %s9212_s11 = sshll.u32 %s12899_s17, 1  ;;  %v12970_v0 = vld [vmem:[%s15247_s1] sm:$0xff]  ;;  %v12975_v1 = vld [vmem:[%s15247_s1 + $0x8] sm:$0xff]  ;;  %s12816_s21 = smov 3   ;;  %vm1881_vm0 = vcmask 1043456   ;;  %vm1882_vm1 = vcmask 1044480  }
  0x37   : > { %12792 = vsyncadd (%p15316_p0), [#allocation4], 4294955008  ;;  %p372_p5 = scmp.lt.s32.totalorder %s9212_s11, 3  ;;  %v12984_v10 = vld [vmem:[%s15248_s2] sm:$0xff]  ;;  %v12989_v11 = vld [vmem:[%s15248_s2 + $0x8] sm:$0xff]  ;;  %vm1759_vm2 = vcmask 23552  }
  0x38   : > { %v12403_v36 = vld [vmem:[#allocation3 + $0x4] ss:$8 sps:$4 sm:$0xff]   ;;  %vm1808_vm3 = vcmask 48128   ;;  %vm1848_vm4 = vcmask 72704   ;;  %vm392_vm5 = vcmask 130048   ;;  %s368_s30 = sand.u32 1, %s12803_s14  }
  0x39   : > { %s15473_s11 = smov (!%p372_p5, %s9212_s11), 3  ;;  %778 = vmatprep.mubr.bf16.mxu0 %v12403_v36  ;;  %v12406_v46 = vld [vmem:[#allocation3 + $0x104] ss:$8 sps:$4 sm:$0xff]   ;;  %s9211_s28 = sshll.u32 %s368_s30, 8  ;;  %vm6498_vm6 = vcmask 125952  }
  0x3a   : > { %s9913_s20 = sshll.u32 %s15473_s11, 7  ;;  %1148 = vmatprep.mubr.bf16.mxu1 %v12406_v46  ;;  %s14944_s27 = scalar_lea.vmem [#allocation6], %s9211_s28 }
  0x3b   : > { %s12965_s26 = scalar_lea.vmem %s15246_s0, %s9913_s20  ;;  %s9979_s29 = sshll.u32 %s12899_s17, 12 }
  0x3c   : > { %v10115_v2 = vld [vmem:[%s12965_s26 + $0x80] sm:$0xff]   ;;  %v10116_v8 = vld [vmem:[%s12965_s26 + $0x88] sm:$0xff]   ;;  %v10117_v24 = vld [vmem:[%s12965_s26 + $0x90] sm:$0xff]   ;;  %s9131_s25 = sshll.u32 %s14944_s27, 4  ;;  %s15205_s17 = scalar_lea.sflag [#allocation5], %s368_s30  ;;  %s15195_s25 = int_to_ptr.vmem [resolvable:$true] %s9131_s25 }
  0x3d   : > { %v9981_v3 = vld [vmem:[%s12965_s26] sm:$0xff]   ;;  %v10014_v4 = vunpack.c.l.bf16 %v10115_v2  ;;  %v10015_v5 = vunpack.c.h.bf16 %v10115_v2  ;;  %v10108_v9 = vld [vmem:[%s12965_s26 + $0x8] sm:$0xff]   ;;  %v10018_v12 = vunpack.c.l.bf16 %v10116_v8  ;;  %v10019_v13 = vunpack.c.h.bf16 %v10116_v8  ;;  %v10109_v29 = vld [vmem:[%s12965_s26 + $0x10] sm:$0xff]   ;;  %s12745_s18 = scalar_lea.vmem %s15195_s25, 4096  ;;  %p15466_p9 = scmp.ne.s32.totalorder %s15310_s23, 0 }
  0x3e   : > { %v9982_v6 = vunpack.c.l.bf16 %v9981_v3  ;;  %v9983_v7 = vunpack.c.h.bf16 %v9981_v3  ;;  %v9986_v14 = vunpack.c.l.bf16 %v10108_v9  ;;  %v9987_v15 = vunpack.c.h.bf16 %v10108_v9  ;;  %v10118_v30 = vld [vmem:[%s12965_s26 + $0x98] sm:$0xff]   ;;  %v10119_v41 = vld [vmem:[%s12965_s26 + $0xa0] sm:$0xff]   ;;  %p12746_p6 = scmp.ne.s32.totalorder %s15195_s25, %s12745_s18  ;;  %s12820_s11 = smov [#allocation6]  }
  0x3f   : > { %v490_v16 = vmul.f32 %v10014_v4, %v12970_v0  ;;  %v491_v17 = vmul.f32 %v10015_v5, %v12975_v1  ;;  %v492_v20 = vmul.f32 %v10018_v12, %v12970_v0  ;;  %v493_v21 = vmul.f32 %v10019_v13, %v12975_v1  ;;  %v10110_v35 = vld [vmem:[%s12965_s26 + $0x18] sm:$0xff]   ;;  %v10111_v59 = vld [vmem:[%s12965_s26 + $0x20] sm:$0xff]   ;;  %s12749_s20 = sshll.u32 %s12820_s11, 4  ;;  %s12750_s20 = int_to_ptr.vmem [resolvable:$false] %s12749_s20 }
  0x40   : > { %v474_v18 = vmul.f32 %v9982_v6, %v12970_v0  ;;  %v475_v19 = vmul.f32 %v9983_v7, %v12975_v1  ;;  %v476_v22 = vmul.f32 %v9986_v14, %v12970_v0  ;;  %v477_v23 = vmul.f32 %v9987_v15, %v12975_v1  ;;  %v10120_v6 = vld [vmem:[%s12965_s26 + $0xa8] sm:$0xff]   ;;  %p12747_p10 = pnand %p12746_p6, %p15466_p9  ;;  %s12751_s28 = scalar_lea.vmem %s12750_s20, 8192 }
  0x41   : > { %v522_v25 = vadd.f32 %v490_v16, %v12984_v10  ;;  %v523_v26 = vadd.f32 %v491_v17, %v12989_v11  ;;  %v524_v31 = vadd.f32 %v492_v20, %v12984_v10  ;;  %v525_v32 = vadd.f32 %v493_v21, %v12989_v11  ;;  %v10112_v17 = vld [vmem:[%s12965_s26 + $0x28] sm:$0xff]   ;;  %p12752_p2 = scmp.lt.s32.totalorder %s15195_s25, %s12750_s20  ;;  %p12753_p3 = scmp.lt.s32.totalorder %s12751_s28, %s12745_s18 }
  0x42   : > { %v506_v27 = vadd.f32 %v474_v18, %v12984_v10  ;;  %v507_v28 = vadd.f32 %v475_v19, %v12989_v11  ;;  %v508_v33 = vadd.f32 %v476_v22, %v12984_v10  ;;  %v509_v34 = vadd.f32 %v477_v23, %v12989_v11  ;;  %v10121_v22 = vld [vmem:[%s12965_s26 + $0xb0] sm:$0xff]   ;;  %p12748_p12 = pneg %p12747_p10 }
  0x43   : > { %v13011_v37 = vpack.c.bf16 %v523_v26, %v522_v25  ;;  %v10022_v39 = vunpack.c.l.bf16 %v10117_v24  ;;  %v10023_v40 = vunpack.c.h.bf16 %v10117_v24  ;;  %v13016_v42 = vpack.c.bf16 %v525_v32, %v524_v31  ;;  %v10113_v31 = vld [vmem:[%s12965_s26 + $0x30] sm:$0xff]   ;;  %p12754_p4 = por %p12753_p3, %p12752_p2 }
  0x44   : > { %v13013_v38 = vpack.c.bf16 %v507_v28, %v506_v27  ;;  %v13018_v43 = vpack.c.bf16 %v509_v34, %v508_v33  ;;  %v9990_v44 = vunpack.c.l.bf16 %v10109_v29  ;;  %v9991_v45 = vunpack.c.h.bf16 %v10109_v29 }
  0x45   : > { %10139 = vmatprep.subr.bf16.mxu0 %v13011_v37  ;;  %10251 = vmatprep.subr.bf16.mxu1 %v13011_v37  ;;  %v494_v47 = vmul.f32 %v10022_v39, %v12970_v0  ;;  %v495_v48 = vmul.f32 %v10023_v40, %v12975_v1  ;;  %v10026_v49 = vunpack.c.l.bf16 %v10118_v30  ;;  %v10027_v50 = vunpack.c.h.bf16 %v10118_v30  ;;  %p12755_p7 = pnand %p12754_p4, %p12748_p12 }
  0x46   : > { %10140 = vmatpush3.bf16.msra.mxu0 %v13013_v38  ;;  %10252 = vmatpush3.bf16.msra.mxu1 %v13013_v38  ;;  %v478_v51 = vmul.f32 %v9990_v44, %v12970_v0  ;;  %v479_v52 = vmul.f32 %v9991_v45, %v12975_v1  ;;  %v9994_v53 = vunpack.c.l.bf16 %v10110_v35  ;;  %v9995_v54 = vunpack.c.h.bf16 %v10110_v35  ;;  %v10122_v44 = vld [vmem:[%s12965_s26 + $0xb8] sm:$0xff]  }
  0x47   : > { %10141 = vmatprep.subr.bf16.mxu0 %v13016_v42  ;;  %10253 = vmatprep.subr.bf16.mxu1 %v13016_v42  ;;  %v526_v55 = vadd.f32 %v494_v47, %v12984_v10  ;;  %v527_v56 = vadd.f32 %v495_v48, %v12989_v11  ;;  %v496_v57 = vmul.f32 %v10026_v49, %v12970_v0  ;;  %v10030_v58 = vunpack.c.l.bf16 %v10119_v41  ;;  %v10114_v49 = vld [vmem:[%s12965_s26 + $0x38] sm:$0xff]  }
  0x48   : > { %v510_v60 = vadd.f32 %v478_v51, %v12984_v10  ;;  %v511_v61 = vadd.f32 %v479_v52, %v12989_v11  ;;  %v497_v62 = vmul.f32 %v10027_v50, %v12975_v1  ;;  %v480_v63 = vmul.f32 %v9994_v53, %v12970_v0 }
  0x49   : > { %v13038_v2 = vpack.c.bf16 %v527_v56, %v526_v55  ;;  %v528_v3 = vadd.f32 %v496_v57, %v12984_v10  ;;  %v481_v4 = vmul.f32 %v9995_v54, %v12975_v1  ;;  %v10031_v5 = vunpack.c.h.bf16 %v10119_v41 }
  0x4a   : > { %10142 = vmatpush3.bf16.msra.mxu0 %v13018_v43  ;;  %10254 = vmatpush3.bf16.msra.mxu1 %v13018_v43  ;;  %v13045_v7 = vpack.c.bf16 %v511_v61, %v510_v60  ;;  %v529_v8 = vadd.f32 %v497_v62, %v12989_v11  ;;  %v512_v9 = vadd.f32 %v480_v63, %v12984_v10  ;;  %v9998_v12 = vunpack.c.l.bf16 %v10111_v59 }
  0x4b   : > { %10143 = vmatprep.subr.bf16.mxu0 %v13038_v2  ;;  %10255 = vmatprep.subr.bf16.mxu1 %v13038_v2  ;;  %v513_v13 = vadd.f32 %v481_v4, %v12989_v11  ;;  %v498_v14 = vmul.f32 %v10030_v58, %v12970_v0  ;;  %v499_v15 = vmul.f32 %v10031_v5, %v12975_v1  ;;  %v9999_v16 = vunpack.c.h.bf16 %v10111_v59 }
  0x4c   : > { %v13055_v18 = vpack.c.bf16 %v529_v8, %v528_v3  ;;  %v482_v19 = vmul.f32 %v9998_v12, %v12970_v0  ;;  %v10034_v20 = vunpack.c.l.bf16 %v10120_v6  ;;  %v10035_v21 = vunpack.c.h.bf16 %v10120_v6 }
  0x4d   : > { %v13059_v23 = vpack.c.bf16 %v513_v13, %v512_v9  ;;  %v530_v24 = vadd.f32 %v498_v14, %v12984_v10  ;;  %v531_v25 = vadd.f32 %v499_v15, %v12989_v11  ;;  %v483_v26 = vmul.f32 %v9999_v16, %v12975_v1 }
  0x4e   : > { %10144 = vmatpush3.bf16.msra.mxu0 %v13045_v7  ;;  %10256 = vmatpush3.bf16.msra.mxu1 %v13045_v7  ;;  %v514_v27 = vadd.f32 %v482_v19, %v12984_v10  ;;  %v500_v28 = vmul.f32 %v10034_v20, %v12970_v0  ;;  %v501_v29 = vmul.f32 %v10035_v21, %v12975_v1  ;;  %v10002_v30 = vunpack.c.l.bf16 %v10112_v17  ;;  %v12404_v20 = vld [vmem:[#allocation3 + $0x100] ss:$8 sps:$4 sm:$0xff]   ;;  %v12407_v21 = vld [vmem:[#allocation3 + $0x14] ss:$8 sps:$4 sm:$0xff]  }
  0x4f   : > { %10145 = vmatprep.subr.bf16.mxu0 %v13055_v18  ;;  %10257 = vmatprep.subr.bf16.mxu1 %v13055_v18  ;;  %v13072_v32 = vpack.c.bf16 %v531_v25, %v530_v24  ;;  %v515_v33 = vadd.f32 %v483_v26, %v12989_v11  ;;  %v10003_v34 = vunpack.c.h.bf16 %v10112_v17  ;;  %v10038_v35 = vunpack.c.l.bf16 %v10121_v22  ;;  %v12413_v24 = vld [vmem:[#allocation3 + $0x24] ss:$8 sps:$4 sm:$0xff]   ;;  %v12418_v26 = vld [vmem:[#allocation3 + $0x120] ss:$8 sps:$4 sm:$0xff]  }
  0x50   : > { %v532_v36 = vadd.f32 %v500_v28, %v12984_v10  ;;  %v533_v39 = vadd.f32 %v501_v29, %v12989_v11  ;;  %v484_v40 = vmul.f32 %v10002_v30, %v12970_v0  ;;  %v10039_v41 = vunpack.c.h.bf16 %v10121_v22  ;;  %v12409_v22 = vld [vmem:[#allocation3 + $0x114] ss:$8 sps:$4 sm:$0xff]   ;;  %v12415_v25 = vld [vmem:[#allocation3 + $0x124] ss:$8 sps:$4 sm:$0xff]   ;;  %v12427_v30 = vld [vmem:[#allocation3 + $0x50] ss:$8 sps:$4 sm:$0xff]  }
  0x51   : > { %v13079_v45 = vpack.c.bf16 %v515_v33, %v514_v27  ;;  %v485_v46 = vmul.f32 %v10003_v34, %v12975_v1  ;;  %v502_v47 = vmul.f32 %v10038_v35, %v12970_v0  ;;  %v10006_v48 = vunpack.c.l.bf16 %v10113_v31  ;;  %v12464_v27 = vld [vmem:[#allocation3 + $0x134] ss:$8 sps:$4 sm:$0xff]   ;;  %v12482_v33 = vld [vmem:[#allocation3 + $0x164] ss:$8 sps:$4 sm:$0xff]   ;;  %v12430_v34 = vld [vmem:[#allocation3 + $0x60] ss:$8 sps:$4 sm:$0xff]  }
  0x52   : > { %10146 = vmatpush3.bf16.msra.mxu0 %v13059_v23  ;;  %10258 = vmatpush3.bf16.msra.mxu1 %v13059_v23  ;;  %v13086_v50 = vpack.c.bf16 %v533_v39, %v532_v36  ;;  %v516_v51 = vadd.f32 %v484_v40, %v12984_v10  ;;  %v503_v52 = vmul.f32 %v10039_v41, %v12975_v1  ;;  %v10007_v53 = vunpack.c.h.bf16 %v10113_v31  ;;  %v12425_v28 = vld [vmem:[#allocation3 + $0x54] ss:$8 sps:$4 sm:$0xff]   ;;  %v12478_v31 = vld [vmem:[#allocation3 + $0x150] ss:$8 sps:$4 sm:$0xff]   ;;  %v12484_v35 = vld [vmem:[#allocation3 + $0x160] ss:$8 sps:$4 sm:$0xff]  }
  0x53   : > { %10147 = vmatprep.subr.bf16.mxu0 %v13072_v32  ;;  %10259 = vmatprep.subr.bf16.mxu1 %v13072_v32  ;;  %v517_v54 = vadd.f32 %v485_v46, %v12989_v11  ;;  %v534_v55 = vadd.f32 %v502_v47, %v12984_v10  ;;  %v486_v56 = vmul.f32 %v10006_v48, %v12970_v0  ;;  %v10042_v57 = vunpack.c.l.bf16 %v10122_v44  ;;  %v12476_v29 = vld [vmem:[#allocation3 + $0x154] ss:$8 sps:$4 sm:$0xff]   ;;  %v12433_v40 = vld [vmem:[#allocation3 + $0x70] ss:$8 sps:$4 sm:$0xff]   ;;  %v12436_v46 = vld [vmem:[#allocation3 + $0x80] ss:$8 sps:$4 sm:$0xff]  }
  0x54   : > { %v535_v58 = vadd.f32 %v503_v52, %v12989_v11  ;;  %v487_v59 = vmul.f32 %v10007_v53, %v12975_v1  ;;  %v10043_v60 = vunpack.c.h.bf16 %v10122_v44  ;;  %v10010_v61 = vunpack.c.l.bf16 %v10114_v49  ;;  %v12431_v36 = vld [vmem:[#allocation3 + $0x74] ss:$8 sps:$4 sm:$0xff]   ;;  %v12490_v41 = vld [vmem:[#allocation3 + $0x170] ss:$8 sps:$4 sm:$0xff]   ;;  %v12434_v44 = vld [vmem:[#allocation3 + $0x84] ss:$8 sps:$4 sm:$0xff]  }
  0x55   : > { %v13097_v62 = vpack.c.bf16 %v517_v54, %v516_v51  ;;  %v518_v63 = vadd.f32 %v486_v56, %v12984_v10  ;;  %v504_v3 = vmul.f32 %v10042_v57, %v12970_v0  ;;  %v10011_v4 = vunpack.c.h.bf16 %v10114_v49  ;;  %v12488_v39 = vld [vmem:[#allocation3 + $0x174] ss:$8 sps:$4 sm:$0xff]   ;;  %v12496_v47 = vld [vmem:[#allocation3 + $0x180] ss:$8 sps:$4 sm:$0xff]   ;;  %v12502_v51 = vld [vmem:[#allocation3 + $0x190] ss:$8 sps:$4 sm:$0xff]  }
  0x56   : > { %10148 = vmatpush3.bf16.msra.mxu0 %v13079_v45  ;;  %10260 = vmatpush3.bf16.msra.mxu1 %v13079_v45  ;;  %v13103_v5 = vpack.c.bf16 %v535_v58, %v534_v55  ;;  %v519_v6 = vadd.f32 %v487_v59, %v12989_v11  ;;  %v505_v8 = vmul.f32 %v10043_v60, %v12975_v1  ;;  %v12437_v48 = vld [vmem:[#allocation3 + $0x94] ss:$8 sps:$4 sm:$0xff]   ;;  %v12440_v52 = vld [vmem:[#allocation3 + $0xa4] ss:$8 sps:$4 sm:$0xff]   ;;  %v12442_v54 = vld [vmem:[#allocation3 + $0xa0] ss:$8 sps:$4 sm:$0xff]  }
  0x57   : > { %10149 = vmatprep.subr.bf16.mxu0 %v13086_v50  ;;  %10261 = vmatprep.subr.bf16.mxu1 %v13086_v50  ;;  %v536_v9 = vadd.f32 %v504_v3, %v12984_v10  ;;  %v488_v12 = vmul.f32 %v10010_v61, %v12970_v0  ;;  %v489_v13 = vmul.f32 %v10011_v4, %v12975_v1  ;;  %v12401_v1 = vld [vmem:[#allocation3] ss:$8 sps:$4 sm:$0xff]   ;;  %v12500_v49 = vld [vmem:[#allocation3 + $0x194] ss:$8 sps:$4 sm:$0xff]   ;;  %v12506_v53 = vld [vmem:[#allocation3 + $0x1a4] ss:$8 sps:$4 sm:$0xff]  }
  0x58   : > { %v537_v14 = vadd.f32 %v505_v8, %v12989_v11  ;;  %v544_v15 = vpack.c.bf16 %v519_v6, %v518_v63  ;;  %v12508_v55 = vld [vmem:[#allocation3 + $0x1a0] ss:$8 sps:$4 sm:$0xff]   ;;  %v12443_v56 = vld [vmem:[#allocation3 + $0xb4] ss:$8 sps:$4 sm:$0xff]   ;;  %v12445_v58 = vld [vmem:[#allocation3 + $0xb0] ss:$8 sps:$4 sm:$0xff]  }
  0x59   : > { %v520_v16 = vadd.f32 %v488_v12, %v12984_v10  ;;  %v521_v17 = vadd.f32 %v489_v13, %v12989_v11  ;;  %v12411_v10 = vld [vmem:[#allocation3 + $0x10] ss:$8 sps:$4 sm:$0xff]   ;;  %v12512_v57 = vld [vmem:[#allocation3 + $0x1b4] ss:$8 sps:$4 sm:$0xff]   ;;  %v12446_v60 = vld [vmem:[#allocation3 + $0xc4] ss:$8 sps:$4 sm:$0xff]  }
  0x5a   : > { %10150 = vmatpush3.bf16.msra.mxu0 %v13097_v62  ;;  %10262 = vmatpush3.bf16.msra.mxu1 %v13097_v62  ;;  %v553_v19 = vpack.c.bf16 %v537_v14, %v536_v9  ;;  %v12412_v11 = vld [vmem:[#allocation3 + $0x110] ss:$8 sps:$4 sm:$0xff]   ;;  %v12518_v61 = vld [vmem:[#allocation3 + $0x1c4] ss:$8 sps:$4 sm:$0xff]   ;;  %v12520_v63 = vld [vmem:[#allocation3 + $0x1c0] ss:$8 sps:$4 sm:$0xff]  }
  0x5b   : > { %10151 = vmatprep.subr.bf16.mxu0 %v13103_v5  ;;  %10263 = vmatprep.subr.bf16.mxu1 %v13103_v5  ;;  %v545_v0 = vpack.c.bf16 %v521_v17, %v520_v16  ;;  %v12514_v59 = vld [vmem:[#allocation3 + $0x1b0] ss:$8 sps:$4 sm:$0xff]   ;;  %v12449_v3 = vld [vmem:[#allocation3 + $0xd4] ss:$8 sps:$4 sm:$0xff]   ;;  %v12452_v8 = vld [vmem:[#allocation3 + $0xe4] ss:$8 sps:$4 sm:$0xff]  }
  0x5c   : > { %v12524_v4 = vld [vmem:[#allocation3 + $0x1d4] ss:$8 sps:$4 sm:$0xff]   ;;  %v12526_v6 = vld [vmem:[#allocation3 + $0x1d0] ss:$8 sps:$4 sm:$0xff]   ;;  %v12530_v9 = vld [vmem:[#allocation3 + $0x1e4] ss:$8 sps:$4 sm:$0xff]  }
  0x5d   : > { %v12454_v12 = vld [vmem:[#allocation3 + $0xe0] ss:$8 sps:$4 sm:$0xff]   ;;  %v12455_v14 = vld [vmem:[#allocation3 + $0xf4] ss:$8 sps:$4 sm:$0xff]   ;;  %v12457_v16 = vld [vmem:[#allocation3 + $0xf0] ss:$8 sps:$4 sm:$0xff]  }
  0x5e   : > { %10152 = vmatpush3.bf16.msra.mxu0 %v544_v15  ;;  %10264 = vmatpush3.bf16.msra.mxu1 %v544_v15  ;;  %v12532_v13 = vld [vmem:[#allocation3 + $0x1e0] ss:$8 sps:$4 sm:$0xff]   ;;  %v12538_v17 = vld [vmem:[#allocation3 + $0x1f0] ss:$8 sps:$4 sm:$0xff]  }
  0x5f   : > { %10153 = vmatprep.subr.bf16.mxu0 %v553_v19  ;;  %10265 = vmatprep.subr.bf16.mxu1 %v553_v19 }
  0x62   : > { %10154 = vmatpush3.bf16.msra.mxu0 %v545_v0  ;;  %10266 = vmatpush3.bf16.msra.mxu1 %v545_v0 }
  0x63   : > { %10363 = vmatprep.subr.bf16.mxu0 %v13011_v37  ;;  %v12417_v37 = vld [vmem:[#allocation3 + $0x20] ss:$8 sps:$4 sm:$0xff]  }
  0x65   : > { %779 = vmatmul.mubr.bf16.vlgmr.msra.gmra.mrb[0].mxu0 %v12401_v1  ;;  %1149 = vmatmul.mubr.bf16.vlgmr.msra.gmra.mrb[0].mxu1 %v12404_v20  ;;  %v12461_v1 = vld [vmem:[#allocation3 + $0x214] ss:$8 sps:$4 sm:$0xff]   ;;  %v12463_v20 = vld [vmem:[#allocation3 + $0x210] ss:$8 sps:$4 sm:$0xff]  }
  0x66   : > { %10364 = vmatpush3.bf16.msra.mxu0 %v13013_v38  ;;  %786 = vmatprep.mubr.bf16.mxu0 %v12407_v21  ;;  %v12419_v38 = vld [vmem:[#allocation3 + $0x34] ss:$8 sps:$4 sm:$0xff]   ;;  %v12467_v21 = vld [vmem:[#allocation3 + $0x224] ss:$8 sps:$4 sm:$0xff]  }
  0x67   : > { %1156 = vmatprep.mubr.bf16.mxu1 %v12409_v22  ;;  %10365 = vmatprep.subr.bf16.mxu0 %v13016_v42  ;;  %v12421_v42 = vld [vmem:[#allocation3 + $0x30] ss:$8 sps:$4 sm:$0xff]   ;;  %v12469_v22 = vld [vmem:[#allocation3 + $0x220] ss:$8 sps:$4 sm:$0xff]  }
  0x6a   : > { %10366 = vmatpush3.bf16.msra.mxu0 %v13018_v43  ;;  %v12466_v43 = vld [vmem:[#allocation3 + $0x130] ss:$8 sps:$4 sm:$0xff]  }
  0x6b   : > { %10367 = vmatprep.subr.bf16.mxu0 %v13038_v2  ;;  %v12422_v2 = vld [vmem:[#allocation3 + $0x44] ss:$8 sps:$4 sm:$0xff]  }
  0x6d   : > { %787 = vmatmul.mubr.bf16.gmra.mrb[4].mxu0 %v12411_v10  ;;  %1157 = vmatmul.mubr.bf16.gmra.mrb[4].mxu1 %v12412_v11  ;;  %v12473_v10 = vld [vmem:[#allocation3 + $0x234] ss:$8 sps:$4 sm:$0xff]   ;;  %v12475_v11 = vld [vmem:[#allocation3 + $0x230] ss:$8 sps:$4 sm:$0xff]  }
  0x6e   : > { %794 = vmatprep.mubr.bf16.mxu0 %v12413_v24  ;;  %1164 = vmatprep.mubr.bf16.mxu1 %v12415_v25  ;;  %v12479_v24 = vld [vmem:[#allocation3 + $0x244] ss:$8 sps:$4 sm:$0xff]   ;;  %v12481_v25 = vld [vmem:[#allocation3 + $0x240] ss:$8 sps:$4 sm:$0xff]  }
  0x6f   : > { %10368 = vmatpush3.bf16.msra.mxu0 %v13045_v7  ;;  %v12470_v7 = vld [vmem:[#allocation3 + $0x144] ss:$8 sps:$4 sm:$0xff]  }
  0x70   : > { %10369 = vmatprep.subr.bf16.mxu0 %v13055_v18  ;;  %v12424_v18 = vld [vmem:[#allocation3 + $0x40] ss:$8 sps:$4 sm:$0xff]  }
  0x73   : > { %10370 = vmatpush3.bf16.msra.mxu0 %v13059_v23  ;;  %v12472_v23 = vld [vmem:[#allocation3 + $0x140] ss:$8 sps:$4 sm:$0xff]  }
  0x74   : > { %10371 = vmatprep.subr.bf16.mxu0 %v13072_v32  ;;  %v12428_v32 = vld [vmem:[#allocation3 + $0x64] ss:$8 sps:$4 sm:$0xff]  }
  0x75   : > { %795 = vmatmul.mubr.bf16.gmra.mrb[8].mxu0 %v12417_v37  ;;  %1165 = vmatmul.mubr.bf16.gmra.mrb[8].mxu1 %v12418_v26  ;;  %v12485_v37 = vld [vmem:[#allocation3 + $0x254] ss:$8 sps:$4 sm:$0xff]   ;;  %v12487_v26 = vld [vmem:[#allocation3 + $0x250] ss:$8 sps:$4 sm:$0xff]  }
  0x76   : > { %802 = vmatprep.mubr.bf16.mxu0 %v12419_v38  ;;  %1172 = vmatprep.mubr.bf16.mxu1 %v12464_v27  ;;  %v12491_v38 = vld [vmem:[#allocation3 + $0x264] ss:$8 sps:$4 sm:$0xff]   ;;  %v12493_v27 = vld [vmem:[#allocation3 + $0x260] ss:$8 sps:$4 sm:$0xff]  }
  0x77   : > { %10372 = vmatpush3.bf16.msra.mxu0 %v13079_v45  ;;  %v12494_v45 = vld [vmem:[#allocation3 + $0x184] ss:$8 sps:$4 sm:$0xff]  }
  0x78   : > { %10373 = vmatprep.subr.bf16.mxu0 %v13086_v50  ;;  %v12439_v50 = vld [vmem:[#allocation3 + $0x90] ss:$8 sps:$4 sm:$0xff]  }
  0x7b   : > { %10374 = vmatpush3.bf16.msra.mxu0 %v13097_v62  ;;  %v12448_v62 = vld [vmem:[#allocation3 + $0xc0] ss:$8 sps:$4 sm:$0xff]  }
  0x7c   : > { %10375 = vmatprep.subr.bf16.mxu0 %v13103_v5  ;;  %v12451_v5 = vld [vmem:[#allocation3 + $0xd0] ss:$8 sps:$4 sm:$0xff]  }
  0x7d   : > { %803 = vmatmul.mubr.bf16.gmra.mrb[12].mxu0 %v12421_v42  ;;  %1173 = vmatmul.mubr.bf16.gmra.mrb[12].mxu1 %v12466_v43  ;;  %v12497_v42 = vld [vmem:[#allocation3 + $0x274] ss:$8 sps:$4 sm:$0xff]   ;;  %v12499_v43 = vld [vmem:[#allocation3 + $0x270] ss:$8 sps:$4 sm:$0xff]  }
  0x7e   : > { %810 = vmatprep.mubr.bf16.mxu0 %v12422_v2  ;;  %1180 = vmatprep.mubr.bf16.mxu1 %v12470_v7  ;;  %v12503_v2 = vld [vmem:[#allocation3 + $0x284] ss:$8 sps:$4 sm:$0xff]   ;;  %v12505_v7 = vld [vmem:[#allocation3 + $0x280] ss:$8 sps:$4 sm:$0xff]  }
  0x7f   : > { %10376 = vmatpush3.bf16.msra.mxu0 %v544_v15  ;;  %v12536_v15 = vld [vmem:[#allocation3 + $0x1f4] ss:$8 sps:$4 sm:$0xff]  }
  0x80   : > { %10377 = vmatprep.subr.bf16.mxu0 %v553_v19  ;;  %v12460_v19 = vld [vmem:[#allocation3 + $0x204] ss:$8 sps:$4 sm:$0xff]  }
  0x83   : > { %10378 = vmatpush3.bf16.msra.mxu0 %v545_v0  ;;  %v12458_v0 = vld [vmem:[#allocation3 + $0x200] ss:$8 sps:$4 sm:$0xff]  }
  0x85   : > { %811 = vmatmul.mubr.bf16.gmra.mrb[16].mxu0 %v12424_v18  ;;  %1181 = vmatmul.mubr.bf16.gmra.mrb[16].mxu1 %v12472_v23  ;;  %v12509_v18 = vld [vmem:[#allocation3 + $0x294] ss:$8 sps:$4 sm:$0xff]   ;;  %v12511_v23 = vld [vmem:[#allocation3 + $0x290] ss:$8 sps:$4 sm:$0xff]  }
  0x86   : > { %818 = vmatprep.mubr.bf16.mxu0 %v12425_v28  ;;  %1188 = vmatprep.mubr.bf16.mxu1 %v12476_v29  ;;  %v12515_v28 = vld [vmem:[#allocation3 + $0x2a4] ss:$8 sps:$4 sm:$0xff]   ;;  %v12517_v29 = vld [vmem:[#allocation3 + $0x2a0] ss:$8 sps:$4 sm:$0xff]  }
  0x8d   : > { %819 = vmatmul.mubr.bf16.gmra.mrb[20].mxu0 %v12427_v30  ;;  %1189 = vmatmul.mubr.bf16.gmra.mrb[20].mxu1 %v12478_v31  ;;  %v12521_v30 = vld [vmem:[#allocation3 + $0x2b4] ss:$8 sps:$4 sm:$0xff]  }
  0x8e   : > { %826 = vmatprep.mubr.bf16.mxu0 %v12428_v32  ;;  %1196 = vmatprep.mubr.bf16.mxu1 %v12482_v33 }
  0x95   : > { %827 = vmatmul.mubr.bf16.gmra.mrb[24].mxu0 %v12430_v34  ;;  %1197 = vmatmul.mubr.bf16.gmra.mrb[24].mxu1 %v12484_v35  ;;  %v12523_v35 = vld [vmem:[#allocation3 + $0x2b0] ss:$8 sps:$4 sm:$0xff]  }
  0x96   : > { %834 = vmatprep.mubr.bf16.mxu0 %v12431_v36  ;;  %1204 = vmatprep.mubr.bf16.mxu1 %v12488_v39 }
  0x9d   : > { %835 = vmatmul.mubr.bf16.gmra.mrb[28].mxu0 %v12433_v40  ;;  %1205 = vmatmul.mubr.bf16.gmra.mrb[28].mxu1 %v12490_v41 }
  0x9e   : > { %842 = vmatprep.mubr.bf16.mxu0 %v12434_v44  ;;  %1212 = vmatprep.mubr.bf16.mxu1 %v12494_v45  ;;  %v12527_v44 = vld [vmem:[#allocation3 + $0x2c4] ss:$8 sps:$4 sm:$0xff]  }
  0xa5   : > { %843 = vmatmul.mubr.bf16.gmra.mrb[32].mxu0 %v12436_v46  ;;  %1213 = vmatmul.mubr.bf16.gmra.mrb[32].mxu1 %v12496_v47 }
  0xa6   : > { %850 = vmatprep.mubr.bf16.mxu0 %v12437_v48  ;;  %1220 = vmatprep.mubr.bf16.mxu1 %v12500_v49 }
  0xad   : > { %851 = vmatmul.mubr.bf16.gmra.mrb[36].mxu0 %v12439_v50  ;;  %1221 = vmatmul.mubr.bf16.gmra.mrb[36].mxu1 %v12502_v51 }
  0xae   : > { %858 = vmatprep.mubr.bf16.mxu0 %v12440_v52  ;;  %1228 = vmatprep.mubr.bf16.mxu1 %v12506_v53 }
  0xb5   : > { %859 = vmatmul.mubr.bf16.gmra.mrb[40].mxu0 %v12442_v54  ;;  %1229 = vmatmul.mubr.bf16.gmra.mrb[40].mxu1 %v12508_v55  ;;  %v12529_v55 = vld [vmem:[#allocation3 + $0x2c0] ss:$8 sps:$4 sm:$0xff]  }
  0xb6   : > { %866 = vmatprep.mubr.bf16.mxu0 %v12443_v56  ;;  %1236 = vmatprep.mubr.bf16.mxu1 %v12512_v57 }
  0xbd   : > { %867 = vmatmul.mubr.bf16.gmra.mrb[44].mxu0 %v12445_v58  ;;  %1237 = vmatmul.mubr.bf16.gmra.mrb[44].mxu1 %v12514_v59 }
  0xbe   : > { %874 = vmatprep.mubr.bf16.mxu0 %v12446_v60  ;;  %1244 = vmatprep.mubr.bf16.mxu1 %v12518_v61  ;;  %v12533_v60 = vld [vmem:[#allocation3 + $0x2d4] ss:$8 sps:$4 sm:$0xff]  }
  0xc5   : > { %875 = vmatmul.mubr.bf16.gmra.mrb[48].mxu0 %v12448_v62  ;;  %1245 = vmatmul.mubr.bf16.gmra.mrb[48].mxu1 %v12520_v63 }
  0xc6   : > { %882 = vmatprep.mubr.bf16.mxu0 %v12449_v3  ;;  %1252 = vmatprep.mubr.bf16.mxu1 %v12524_v4 }
  0xcd   : > { %883 = vmatmul.mubr.bf16.gmra.mrb[52].mxu0 %v12451_v5  ;;  %1253 = vmatmul.mubr.bf16.gmra.mrb[52].mxu1 %v12526_v6 }
  0xce   : > { %890 = vmatprep.mubr.bf16.mxu0 %v12452_v8  ;;  %1260 = vmatprep.mubr.bf16.mxu1 %v12530_v9 }
  0xd5   : > { %891 = vmatmul.mubr.bf16.gmra.mrb[56].mxu0 %v12454_v12  ;;  %1261 = vmatmul.mubr.bf16.gmra.mrb[56].mxu1 %v12532_v13  ;;  %v12535_v13 = vld [vmem:[#allocation3 + $0x2d0] ss:$8 sps:$4 sm:$0xff]  }
  0xd6   : > { %898 = vmatprep.mubr.bf16.mxu0 %v12455_v14  ;;  %1268 = vmatprep.mubr.bf16.mxu1 %v12536_v15 }
  0xdd   : > { %899 = vmatmul.mubr.bf16.gmra.mrb[60].mxu0 %v12457_v16  ;;  %1269 = vmatmul.mubr.bf16.gmra.mrb[60].mxu1 %v12538_v17 }
  0xde   : > { %1518 = vmatprep.mubr.bf16.mxu0 %v12460_v19  ;;  %v12539_v19 = vld [vmem:[#allocation3 + $0x2e4] ss:$8 sps:$4 sm:$0xff]  }
  0xe5   : > { %1519 = vmatmul.mubr.bf16.vlgmr.msra.gmra.mrb[64].mxu0 %v12458_v0 }
  0xe6   : > { %1526 = vmatprep.mubr.bf16.mxu0 %v12461_v1 }
  0xed   : > { %1527 = vmatmul.mubr.bf16.gmra.mrb[68].mxu0 %v12463_v20 }
  0xee   : > { %1534 = vmatprep.mubr.bf16.mxu0 %v12467_v21 }
  0xf5   : > { %1535 = vmatmul.mubr.bf16.gmra.mrb[72].mxu0 %v12469_v22 }
  0xf6   : > { %1542 = vmatprep.mubr.bf16.mxu0 %v12473_v10 }
  0xfd   : > { %1543 = vmatmul.mubr.bf16.gmra.mrb[76].mxu0 %v12475_v11 }
  0xfe   : > { %1550 = vmatprep.mubr.bf16.mxu0 %v12479_v24 }
 0x105   : > { %1551 = vmatmul.mubr.bf16.gmra.mrb[80].mxu0 %v12481_v25 }
 0x106   : > { %1558 = vmatprep.mubr.bf16.mxu0 %v12485_v37  ;;  %v12541_v37 = vld [vmem:[#allocation3 + $0x2e0] ss:$8 sps:$4 sm:$0xff]  }
 0x10d   : > { %1559 = vmatmul.mubr.bf16.gmra.mrb[84].mxu0 %v12487_v26 }
 0x10e   : > { %1566 = vmatprep.mubr.bf16.mxu0 %v12491_v38 }
 0x115   : > { %1567 = vmatmul.mubr.bf16.gmra.mrb[88].mxu0 %v12493_v27 }
 0x116   : > { %1574 = vmatprep.mubr.bf16.mxu0 %v12497_v42  ;;  %v12542_v42 = vld [vmem:[#allocation3 + $0x2f4] ss:$8 sps:$4 sm:$0xff]  }
 0x11d   : > { %1575 = vmatmul.mubr.bf16.gmra.mrb[92].mxu0 %v12499_v43 }
 0x11e   : > { %1582 = vmatprep.mubr.bf16.mxu0 %v12503_v2 }
 0x125   : > { %1583 = vmatmul.mubr.bf16.gmra.mrb[96].mxu0 %v12505_v7 }
 0x126   : > { %1590 = vmatprep.mubr.bf16.mxu0 %v12509_v18 }
 0x12d   : > { %1591 = vmatmul.mubr.bf16.gmra.mrb[100].mxu0 %v12511_v23 }
 0x12e   : > { %1598 = vmatprep.mubr.bf16.mxu0 %v12515_v28 }
 0x135   : > { %1599 = vmatmul.mubr.bf16.gmra.mrb[104].mxu0 %v12517_v29  ;;  %v13276_v29 = vld [vmem:[%s15247_s1] sm:$0xff] }
 0x136   : > { %1606 = vmatprep.mubr.bf16.mxu0 %v12521_v30 }
 0x138   : > { %v10155_v31 = vpop.f32.mrb[0].mxu0  ;;  %v10267_v32 = vpop.f32.mrb[0].mxu1 }
 0x139   : > { %v10156_v33 = vpop.f32.mrb[1].mxu0  ;;  %v10268_v34 = vpop.f32.mrb[1].mxu1 }
 0x13a   : > { %v13132_v36 = vadd.f32 %v10156_v33, %v10155_v31  ;;  %v10269_v39 = vadd.f32 %v10268_v34, %v10267_v32  ;;  %v10158_v40 = vpop.f32.mrb[2].mxu0  ;;  %v10270_v41 = vpop.f32.mrb[2].mxu1  ;;  %v12544_v34 = vld [vmem:[#allocation3 + $0x2f0] ss:$8 sps:$4 sm:$0xff]  }
 0x13b   : > { %v10159_v45 = vpop.f32.mrb[3].mxu0  ;;  %v10271_v46 = vpop.f32.mrb[3].mxu1 }
 0x13c   : > { %v13134_v47 = vadd.f32 %v10159_v45, %v10158_v40  ;;  %v10272_v48 = vadd.f32 %v10271_v46, %v10270_v41 }
 0x13d   : > { %1607 = vmatmul.mubr.bf16.gmra.mrb[108].mxu0 %v12523_v35 }
 0x13e   : > { %v1277_v50 = vpack.c.bf16 %v10272_v48, %v10269_v39  ;;  %1614 = vmatprep.mubr.bf16.mxu0 %v12527_v44 }
 0x140   : > { %v10273_v51 = vpop.f32.mrb[4].mxu1  ;;  %1679 = vrot.lane.b32.xlu0 %v1277_v50, %s12816_s21  ;;  %v10161_v52 = vpop.f32.mrb[4].mxu0 }
 0x141   : > { %v10162_v53 = vpop.f32.mrb[5].mxu0  ;;  %v10274_v54 = vpop.f32.mrb[5].mxu1 }
 0x142   : > { %v13139_v56 = vadd.f32 %v10162_v53, %v10161_v52  ;;  %v10275_v57 = vadd.f32 %v10274_v54, %v10273_v51  ;;  %v10164_v58 = vpop.f32.mrb[6].mxu0  ;;  %v10276_v59 = vpop.f32.mrb[6].mxu1 }
 0x143   : > { %v10165_v61 = vpop.f32.mrb[7].mxu0  ;;  %v10277_v62 = vpop.f32.mrb[7].mxu1 }
 0x144   : > { %v13141_v63 = vadd.f32 %v10165_v61, %v10164_v58  ;;  %v10278_v3 = vadd.f32 %v10277_v62, %v10276_v59 }
 0x145   : > { %1615 = vmatmul.mubr.bf16.gmra.mrb[112].mxu0 %v12529_v55 }
 0x146   : > { %v1278_v5 = vpack.c.bf16 %v10278_v3, %v10275_v57  ;;  %1622 = vmatprep.mubr.bf16.mxu0 %v12533_v60 }
 0x148   : > { %v10279_v6 = vpop.f32.mrb[8].mxu1  ;;  %1681 = vrot.lane.b32.xlu0 %v1278_v5, %s12816_s21  ;;  %v10167_v8 = vpop.f32.mrb[8].mxu0 }
 0x149   : > { %v10168_v9 = vpop.f32.mrb[9].mxu0  ;;  %v10280_v12 = vpop.f32.mrb[9].mxu1 }
 0x14a   : > { %v13146_v14 = vadd.f32 %v10168_v9, %v10167_v8  ;;  %v10281_v15 = vadd.f32 %v10280_v12, %v10279_v6  ;;  %v10170_v16 = vpop.f32.mrb[10].mxu0  ;;  %v10282_v17 = vpop.f32.mrb[10].mxu1  ;;  %v10132_v9 = vld [vmem:[%s12965_s26 + $0xc8] sm:$0xff]  }
 0x14b   : > { %v10171_v0 = vpop.f32.mrb[11].mxu0  ;;  %v10283_v1 = vpop.f32.mrb[11].mxu1 }
 0x14c   : > { %v13148_v20 = vadd.f32 %v10171_v0, %v10170_v16  ;;  %v10284_v21 = vadd.f32 %v10283_v1, %v10282_v17 }
 0x14d   : > { %1623 = vmatmul.mubr.bf16.gmra.mrb[116].mxu0 %v12535_v13 }
 0x14e   : > { %v1279_v10 = vpack.c.bf16 %v10284_v21, %v10281_v15  ;;  %1630 = vmatprep.mubr.bf16.mxu0 %v12539_v19 }
 0x150   : > { %1683 = vrot.lane.b32.xlu0 %v1279_v10, %s12816_s21  ;;  %v10173_v11 = vpop.f32.mrb[12].mxu0  ;;  %v10285_v24 = vpop.f32.mrb[12].mxu1 }
 0x151   : > { %v10174_v25 = vpop.f32.mrb[13].mxu0  ;;  %v10286_v26 = vpop.f32.mrb[13].mxu1 }
 0x152   : > { %v13153_v38 = vadd.f32 %v10174_v25, %v10173_v11  ;;  %v10176_v27 = vpop.f32.mrb[14].mxu0  ;;  %v13155_v43 = vadd.f32 %v10286_v26, %v10285_v24  ;;  %v10288_v2 = vpop.f32.mrb[14].mxu1 }
 0x153   : > { %v10177_v7 = vpop.f32.mrb[15].mxu0  ;;  %v10289_v18 = vpop.f32.mrb[15].mxu1 }
 0x154   : > { %15317 = vst [vmem:[#allocation9_spill] sm:$0xff] %v13153_v38  ;;  %v13157_v23 = vadd.f32 %v10177_v7, %v10176_v27  ;;  %v13159_v28 = vadd.f32 %v10289_v18, %v10288_v2 }
 0x155   : > { %1631 = vmatmul.mubr.bf16.gmra.mrb[120].mxu0 %v12541_v37 }
 0x156   : > { %15318 = vst [vmem:[#allocation10_spill] sm:$0xff] %v13157_v23  ;;  %1638 = vmatprep.mubr.bf16.mxu0 %v12542_v42 }
 0x158   : > { %v10179_v31 = vpop.f32.mrb[16].mxu0  ;;  %v10291_v32 = vpop.f32.mrb[16].mxu1 }
 0x159   : > { %v10180_v33 = vpop.f32.mrb[17].mxu0  ;;  %v10292_v35 = vpop.f32.mrb[17].mxu1 }
 0x15a   : > { %v13165_v39 = vadd.f32 %v10180_v33, %v10179_v31  ;;  %v10182_v40 = vpop.f32.mrb[18].mxu0  ;;  %v13167_v41 = vadd.f32 %v10292_v35, %v10291_v32  ;;  %v10294_v44 = vpop.f32.mrb[18].mxu1 }
 0x15b   : > { %v10183_v45 = vpop.f32.mrb[19].mxu0  ;;  %v10295_v46 = vpop.f32.mrb[19].mxu1 }
 0x15c   : > { %15319 = vst [vmem:[#allocation11_spill] sm:$0xff] %v13165_v39  ;;  %v13169_v48 = vadd.f32 %v10183_v45, %v10182_v40  ;;  %v13171_v50 = vadd.f32 %v10295_v46, %v10294_v44  ;;  %v12545_v46 = vld [vmem:[%s15250_s4] sm:$0x1f]  }
 0x15d   : > { %1639 = vmatmul.mubr.bf16.gmra.mrb[124].mxu0 %v12544_v34 }
 0x15e   : > { %15320 = vst [vmem:[#allocation12_spill] sm:$0xff] %v13169_v48 }
 0x160   : > { %v10185_v53 = vpop.f32.mrb[20].mxu0  ;;  %v10297_v54 = vpop.f32.mrb[20].mxu1 }
 0x161   : > { %v10186_v55 = vpop.f32.mrb[21].mxu0  ;;  %v10298_v57 = vpop.f32.mrb[21].mxu1 }
 0x162   : > { %v13177_v58 = vadd.f32 %v10186_v55, %v10185_v53  ;;  %v10188_v59 = vpop.f32.mrb[22].mxu0  ;;  %v13179_v60 = vadd.f32 %v10298_v57, %v10297_v54  ;;  %v10300_v61 = vpop.f32.mrb[22].mxu1  ;;  %v12817_v55 = vmov 65535  }
 0x163   : > { %v10189_v62 = vpop.f32.mrb[23].mxu0  ;;  %v10301_v3 = vpop.f32.mrb[23].mxu1  ;;  %v1883_v57 = vsel %vm1881_vm0, 4294967295, %v12817_v55 }
 0x164   : > { %15321 = vst [vmem:[#allocation13_spill] sm:$0xff] %v13177_v58  ;;  %v13181_v5 = vadd.f32 %v10189_v62, %v10188_v59  ;;  %v13183_v6 = vadd.f32 %v10301_v3, %v10300_v61  ;;  %v13216_v62 = vsel %vm1882_vm1, %v1883_v57, 0 }
 0x165   : > { %15327 = vst [vmem:[#allocation19_spill] sm:$0xff] %v13216_v62 }
 0x166   : > { %15322 = vst [vmem:[#allocation14_spill] sm:$0xff] %v13181_v5 }
 0x168   : > { %v10191_v12 = vpop.f32.mrb[24].mxu0  ;;  %v10303_v13 = vpop.f32.mrb[24].mxu1 }
 0x169   : > { %v10192_v15 = vpop.f32.mrb[25].mxu0  ;;  %v10304_v16 = vpop.f32.mrb[25].mxu1 }
 0x16a   : > { %v13189_v17 = vadd.f32 %v10192_v15, %v10191_v12  ;;  %v10194_v19 = vpop.f32.mrb[26].mxu0  ;;  %v13191_v0 = vadd.f32 %v10304_v16, %v10303_v13  ;;  %v10306_v1 = vpop.f32.mrb[26].mxu1  ;;  %v1886_v16 = vand.u32 %v12545_v46, %v13216_v62 }
 0x16b   : > { %v10195_v21 = vpop.f32.mrb[27].mxu0  ;;  %v10307_v10 = vpop.f32.mrb[27].mxu1 }
 0x16c   : > { %15323 = vst [vmem:[#allocation15_spill] sm:$0xff] %v13189_v17  ;;  %v13193_v11 = vadd.f32 %v10195_v21, %v10194_v19  ;;  %v13195_v24 = vadd.f32 %v10307_v10, %v10306_v1  ;;  %11151 = vmatprep.subr.bf16.mxu1 %v1886_v16 }
 0x16d   : > { %11152 = vmatpush3.bf16.msra.mxu1 %v1886_v16 }
 0x16e   : > { %15324 = vst [vmem:[#allocation16_spill] sm:$0xff] %v13193_v11 }
 0x170   : > { %v10197_v26 = vpop.f32.mrb[28].mxu0  ;;  %v10309_v27 = vpop.f32.mrb[28].mxu1 }
 0x171   : > { %v10198_v42 = vpop.f32.mrb[29].mxu0  ;;  %v10310_v2 = vpop.f32.mrb[29].mxu1 }
 0x172   : > { %v13201_v7 = vadd.f32 %v10198_v42, %v10197_v26  ;;  %v10200_v18 = vpop.f32.mrb[30].mxu0  ;;  %v13203_v31 = vadd.f32 %v10310_v2, %v10309_v27  ;;  %v10312_v32 = vpop.f32.mrb[30].mxu1  ;;  %v10123_v26 = vld [vmem:[%s12965_s26 + $0x40] sm:$0xff]  }
 0x173   : > { %v10201_v33 = vpop.f32.mrb[31].mxu0  ;;  %v10313_v34 = vpop.f32.mrb[31].mxu1  ;;  %v10047_v51 = vunpack.c.h.bf16 %v10123_v26 }
 0x174   : > { %15325 = vst [vmem:[#allocation17_spill] sm:$0xff] %v13201_v7  ;;  %v13205_v35 = vadd.f32 %v10201_v33, %v10200_v18  ;;  %v13207_v40 = vadd.f32 %v10313_v34, %v10312_v32 }
 0x176   : > { %15326 = vst [vmem:[#allocation18_spill] sm:$0xff] %v13205_v35 }
 0x178   : > { %v10203_v53 = vpop.f32.mrb[32].mxu0  ;;  %v10315_v54 = vpop.f32.mrb[32].mxu1 }
 0x179   : > { %v10204_v59 = vpop.f32.mrb[33].mxu0  ;;  %v10316_v61 = vpop.f32.mrb[33].mxu1 }
 0x17a   : > { %v13218_v3 = vadd.f32 %v10204_v59, %v10203_v53  ;;  %v10206_v12 = vpop.f32.mrb[34].mxu0  ;;  %v13220_v13 = vadd.f32 %v10316_v61, %v10315_v54  ;;  %v10318_v15 = vpop.f32.mrb[34].mxu1 }
 0x17b   : > { %v10207_v19 = vpop.f32.mrb[35].mxu0  ;;  %v10319_v1 = vpop.f32.mrb[35].mxu1 }
 0x17c   : > { %15328 = vst [vmem:[#allocation20_spill] sm:$0xff] %v13218_v3  ;;  %v13223_v21 = vadd.f32 %v10207_v19, %v10206_v12  ;;  %v13225_v10 = vadd.f32 %v10319_v1, %v10318_v15 }
 0x17e   : > { %15329 = vst [vmem:[#allocation21_spill] sm:$0xff] %v13223_v21 }
 0x180   : > { %v10209_v42 = vpop.f32.mrb[36].mxu0  ;;  %v10321_v2 = vpop.f32.mrb[36].mxu1 }
 0x181   : > { %v10210_v18 = vpop.f32.mrb[37].mxu0  ;;  %v10322_v32 = vpop.f32.mrb[37].mxu1 }
 0x182   : > { %v13231_v33 = vadd.f32 %v10210_v18, %v10209_v42  ;;  %v10212_v34 = vpop.f32.mrb[38].mxu0  ;;  %v13233_v46 = vadd.f32 %v10322_v32, %v10321_v2  ;;  %v10324_v53 = vpop.f32.mrb[38].mxu1 }
 0x183   : > { %v10213_v54 = vpop.f32.mrb[39].mxu0  ;;  %v10325_v55 = vpop.f32.mrb[39].mxu1 }
 0x184   : > { %15330 = vst [vmem:[#allocation22_spill] sm:$0xff] %v13231_v33  ;;  %v13235_v57 = vadd.f32 %v10213_v54, %v10212_v34  ;;  %v13237_v59 = vadd.f32 %v10325_v55, %v10324_v53 }
 0x186   : > { %15331 = vst [vmem:[#allocation23_spill] sm:$0xff] %v13235_v57 }
 0x188   : > { %v10215_v15 = vpop.f32.mrb[40].mxu0  ;;  %v10327_v16 = vpop.f32.mrb[40].mxu1 }
 0x189   : > { %v10216_v19 = vpop.f32.mrb[41].mxu0  ;;  %v10328_v1 = vpop.f32.mrb[41].mxu1 }
 0x18a   : > { %v13243_v42 = vadd.f32 %v10216_v19, %v10215_v15  ;;  %v10218_v2 = vpop.f32.mrb[42].mxu0  ;;  %v13245_v18 = vadd.f32 %v10328_v1, %v10327_v16  ;;  %v10330_v32 = vpop.f32.mrb[42].mxu1 }
 0x18b   : > { %v10219_v34 = vpop.f32.mrb[43].mxu0  ;;  %v10331_v54 = vpop.f32.mrb[43].mxu1 }
 0x18c   : > { %15332 = vst [vmem:[#allocation24_spill] sm:$0xff] %v13243_v42  ;;  %v13247_v53 = vadd.f32 %v10219_v34, %v10218_v2  ;;  %v13249_v55 = vadd.f32 %v10331_v54, %v10330_v32 }
 0x18e   : > { %15333 = vst [vmem:[#allocation25_spill] sm:$0xff] %v13247_v53 }
 0x190   : > { %v10221_v44 = vpop.f32.mrb[44].mxu0  ;;  %v10333_v15 = vpop.f32.mrb[44].mxu1 }
 0x191   : > { %v10222_v19 = vpop.f32.mrb[45].mxu0  ;;  %v10334_v25 = vpop.f32.mrb[45].mxu1 }
 0x192   : > { %v13255_v16 = vadd.f32 %v10222_v19, %v10221_v44  ;;  %v10224_v1 = vpop.f32.mrb[46].mxu0  ;;  %v13257_v8 = vadd.f32 %v10334_v25, %v10333_v15  ;;  %v10336_v2 = vpop.f32.mrb[46].mxu1  ;;  %v10131_v19 = vld [vmem:[%s12965_s26 + $0xc0] sm:$0xff]  }
 0x193   : > { %v10225_v32 = vpop.f32.mrb[47].mxu0  ;;  %v10337_v34 = vpop.f32.mrb[47].mxu1  ;;  %v10078_v25 = vunpack.c.l.bf16 %v10131_v19  ;;  %v10079_v15 = vunpack.c.h.bf16 %v10131_v19 }
 0x194   : > { %15334 = vst [vmem:[#allocation26_spill] sm:$0xff] %v13255_v16  ;;  %v13259_v54 = vadd.f32 %v10225_v32, %v10224_v1  ;;  %v13261_v61 = vadd.f32 %v10337_v34, %v10336_v2  ;;  %v10046_v34 = vunpack.c.l.bf16 %v10123_v26 }
 0x195   : > { %v2259_v19 = vmul.f32 %v13276_v29, %v10078_v25  ;;  %v13295_v25 = vld [vmem:[%s15248_s2] sm:$0xff] }
 0x196   : > { %15335 = vst [vmem:[#allocation27_spill] sm:$0xff] %v13259_v54 }
 0x197   : > { %v2291_v52 = vadd.f32 %v13295_v25, %v2259_v19 }
 0x198   : > { %v10227_v22 = vpop.f32.mrb[48].mxu0  ;;  %v10339_v44 = vpop.f32.mrb[48].mxu1 }
 0x199   : > { %v10228_v4 = vpop.f32.mrb[49].mxu0  ;;  %v10340_v49 = vpop.f32.mrb[49].mxu1 }
 0x19a   : > { %v13269_v12 = vadd.f32 %v10228_v4, %v10227_v22  ;;  %v10230_v1 = vpop.f32.mrb[50].mxu0  ;;  %v13271_v2 = vadd.f32 %v10340_v49, %v10339_v44  ;;  %v10342_v32 = vpop.f32.mrb[50].mxu1  ;;  %v13282_v4 = vld [vmem:[%s15247_s1 + $0x8] sm:$0xff]  ;;  %v2243_v44 = vmul.f32 %v13276_v29, %v10046_v34 }
 0x19b   : > { %v10231_v27 = vpop.f32.mrb[51].mxu0  ;;  %v10343_v45 = vpop.f32.mrb[51].mxu1  ;;  %v2260_v49 = vmul.f32 %v13282_v4, %v10079_v15  ;;  %v2244_v37 = vmul.f32 %v13282_v4, %v10047_v51  ;;  %v13301_v15 = vld [vmem:[%s15248_s2 + $0x8] sm:$0xff] }
 0x19c   : > { %15336 = vst [vmem:[#allocation28_spill] sm:$0xff] %v13269_v12  ;;  %v13285_v22 = vadd.f32 %v10231_v27, %v10230_v1  ;;  %v13287_v26 = vadd.f32 %v10343_v45, %v10342_v32  ;;  %v10082_v27 = vunpack.c.l.bf16 %v10132_v9  ;;  %v10083_v1 = vunpack.c.h.bf16 %v10132_v9  ;;  %v10124_v32 = vld [vmem:[%s12965_s26 + $0x48] sm:$0xff]   ;;  %v10133_v12 = vld [vmem:[%s12965_s26 + $0xd0] sm:$0xff]  }
 0x19d   : > { %v2292_v45 = vadd.f32 %v13301_v15, %v2260_v49  ;;  %v2275_v30 = vadd.f32 %v13295_v25, %v2243_v44  ;;  %v2276_v19 = vadd.f32 %v13301_v15, %v2244_v37  ;;  %v10050_v54 = vunpack.c.l.bf16 %v10124_v32 }
 0x19e   : > { %15337 = vst [vmem:[#allocation29_spill] sm:$0xff] %v13285_v22  ;;  %v2261_v16 = vmul.f32 %v13276_v29, %v10082_v27  ;;  %v2262_v49 = vmul.f32 %v13282_v4, %v10083_v1  ;;  %v10051_v51 = vunpack.c.h.bf16 %v10124_v32  ;;  %v10125_v27 = vld [vmem:[%s12965_s26 + $0x50] sm:$0xff]  }
 0x19f   : > { %v13311_v62 = vpack.c.bf16 %v2292_v45, %v2291_v52  ;;  %v13315_v53 = vpack.c.bf16 %v2276_v19, %v2275_v30  ;;  %v2245_v44 = vmul.f32 %v13276_v29, %v10050_v54  ;;  %v10086_v45 = vunpack.c.l.bf16 %v10133_v12 }
 0x1a0   : > { %v10233_v9 = vpop.f32.mrb[52].mxu0  ;;  %v10345_v42 = vpop.f32.mrb[52].mxu1  ;;  %v2293_v37 = vadd.f32 %v13295_v25, %v2261_v16  ;;  %v2294_v52 = vadd.f32 %v13301_v15, %v2262_v49  ;;  %v2246_v33 = vmul.f32 %v13282_v4, %v10051_v51  ;;  %v10087_v16 = vunpack.c.h.bf16 %v10133_v12  ;;  %v10134_v51 = vld [vmem:[%s12965_s26 + $0xd8] sm:$0xff]  }
 0x1a1   : > { %15338 = vst [vmem:[#allocation30_spill] sm:$0xff] %v13311_v62  ;;  %v10234_v22 = vpop.f32.mrb[53].mxu0  ;;  %v10346_v34 = vpop.f32.mrb[53].mxu1  ;;  %10604 = vmatprep.subr.bf16.mxu0 %v13311_v62  ;;  %10492 = vmatprep.subr.bf16.mxu1 %v13311_v62  ;;  %v2277_v3 = vadd.f32 %v13295_v25, %v2245_v44  ;;  %v10090_v44 = vunpack.c.l.bf16 %v10134_v51  ;;  %v10127_v62 = vld [vmem:[%s12965_s26 + $0x60] sm:$0xff]  }
 0x1a2   : > { %v13324_v1 = vadd.f32 %v10234_v22, %v10233_v9  ;;  %v10236_v30 = vpop.f32.mrb[54].mxu0  ;;  %v13326_v32 = vadd.f32 %v10346_v34, %v10345_v42  ;;  %v10348_v19 = vpop.f32.mrb[54].mxu1  ;;  %10605 = vmatpush3.bf16.msra.mxu0 %v13315_v53  ;;  %v13330_v54 = vpack.c.bf16 %v2294_v52, %v2293_v37  ;;  %v2263_v22 = vmul.f32 %v13276_v29, %v10086_v45  ;;  %v10126_v45 = vld [vmem:[%s12965_s26 + $0x58] sm:$0xff]  }
 0x1a3   : > { %v10237_v57 = vpop.f32.mrb[55].mxu0  ;;  %v10349_v49 = vpop.f32.mrb[55].mxu1  ;;  %v10054_v9 = vunpack.c.l.bf16 %v10125_v27  ;;  %v2278_v34 = vadd.f32 %v13301_v15, %v2246_v33  ;;  %v2264_v7 = vmul.f32 %v13282_v4, %v10087_v16  ;;  %v10055_v37 = vunpack.c.h.bf16 %v10125_v27 }
 0x1a4   : > { %15339 = vst [vmem:[#allocation31_spill] sm:$0xff] %v13324_v1  ;;  %v13334_v21 = vadd.f32 %v10237_v57, %v10236_v30  ;;  %v13336_v42 = vadd.f32 %v10349_v49, %v10348_v19  ;;  %10606 = vmatprep.subr.bf16.mxu0 %v13330_v54  ;;  %v2295_v12 = vadd.f32 %v13295_v25, %v2263_v22  ;;  %v10091_v27 = vunpack.c.h.bf16 %v10134_v51 }
 0x1a5   : > { %v2247_v52 = vmul.f32 %v13276_v29, %v10054_v9  ;;  %v13349_v33 = vpack.c.bf16 %v2278_v34, %v2277_v3  ;;  %v2296_v19 = vadd.f32 %v13301_v15, %v2264_v7  ;;  %v2248_v16 = vmul.f32 %v13282_v4, %v10055_v37  ;;  %v10135_v3 = vld [vmem:[%s12965_s26 + $0xe0] sm:$0xff]  }
 0x1a6   : > { %15340 = vst [vmem:[#allocation32_spill] sm:$0xff] %v13334_v21  ;;  %v2265_v22 = vmul.f32 %v13276_v29, %v10090_v44  ;;  %v10058_v57 = vunpack.c.l.bf16 %v10126_v45  ;;  %v10059_v30 = vunpack.c.h.bf16 %v10126_v45  ;;  %v2266_v37 = vmul.f32 %v13282_v4, %v10091_v27 }
 0x1a7   : > { %v2279_v49 = vadd.f32 %v13295_v25, %v2247_v52  ;;  %10607 = vmatpush3.bf16.msra.mxu0 %v13349_v33  ;;  %v13356_v17 = vpack.c.bf16 %v2296_v19, %v2295_v12  ;;  %v2280_v7 = vadd.f32 %v13301_v15, %v2248_v16  ;;  %v10094_v52 = vunpack.c.l.bf16 %v10135_v3 }
 0x1a8   : > { %v10239_v9 = vpop.f32.mrb[56].mxu0  ;;  %v10351_v35 = vpop.f32.mrb[56].mxu1  ;;  %v2297_v51 = vadd.f32 %v13295_v25, %v2265_v22  ;;  %v2249_v45 = vmul.f32 %v13276_v29, %v10058_v57  ;;  %v2250_v19 = vmul.f32 %v13282_v4, %v10059_v30  ;;  %v2298_v22 = vadd.f32 %v13301_v15, %v2266_v37  ;;  %v10136_v30 = vld [vmem:[%s12965_s26 + $0xe8] sm:$0xff]  }
 0x1a9   : > { %v10240_v34 = vpop.f32.mrb[57].mxu0  ;;  %v10352_v1 = vpop.f32.mrb[57].mxu1  ;;  %10608 = vmatprep.subr.bf16.mxu0 %v13356_v17  ;;  %v13370_v58 = vpack.c.bf16 %v2280_v7, %v2279_v49  ;;  %v10128_v37 = vld [vmem:[%s12965_s26 + $0x68] sm:$0xff]  }
 0x1aa   : > { %v13362_v44 = vadd.f32 %v10240_v34, %v10239_v9  ;;  %v10242_v21 = vpop.f32.mrb[58].mxu0  ;;  %v13364_v11 = vadd.f32 %v10352_v1, %v10351_v35  ;;  %v10354_v12 = vpop.f32.mrb[58].mxu1  ;;  %v10095_v9 = vunpack.c.h.bf16 %v10135_v3  ;;  %v2267_v35 = vmul.f32 %v13276_v29, %v10094_v52 }
 0x1ab   : > { %v10243_v16 = vpop.f32.mrb[59].mxu0  ;;  %v10355_v27 = vpop.f32.mrb[59].mxu1  ;;  %v2281_v5 = vadd.f32 %v13295_v25, %v2249_v45  ;;  %v2282_v57 = vadd.f32 %v13301_v15, %v2250_v19  ;;  %10609 = vmatpush3.bf16.msra.mxu0 %v13370_v58  ;;  %v13382_v39 = vpack.c.bf16 %v2298_v22, %v2297_v51  ;;  %v10062_v3 = vunpack.c.l.bf16 %v10127_v62 }
 0x1ac   : > { %15341 = vst [vmem:[#allocation33_spill] sm:$0xff] %v13362_v44  ;;  %v13374_v1 = vadd.f32 %v10243_v16, %v10242_v21  ;;  %v13376_v34 = vadd.f32 %v10355_v27, %v10354_v12  ;;  %v2268_v49 = vmul.f32 %v13282_v4, %v10095_v9  ;;  %v2299_v7 = vadd.f32 %v13295_v25, %v2267_v35 }
 0x1ad   : > { %v13391_v12 = vpack.c.bf16 %v2282_v57, %v2281_v5  ;;  %v10063_v45 = vunpack.c.h.bf16 %v10127_v62  ;;  %10610 = vmatprep.subr.bf16.mxu0 %v13382_v39  ;;  %v2251_v19 = vmul.f32 %v13276_v29, %v10062_v3  ;;  %v10098_v16 = vunpack.c.l.bf16 %v10136_v30 }
 0x1ae   : > { %15342 = vst [vmem:[#allocation34_spill] sm:$0xff] %v13374_v1  ;;  %v2300_v51 = vadd.f32 %v13301_v15, %v2268_v49  ;;  %v10099_v27 = vunpack.c.h.bf16 %v10136_v30  ;;  %v10066_v21 = vunpack.c.l.bf16 %v10128_v37  ;;  %v10067_v44 = vunpack.c.h.bf16 %v10128_v37 }
 0x1af   : > { %15343 = vst [vmem:[#allocation35_spill] sm:$0xff] %v13391_v12  ;;  %v2252_v35 = vmul.f32 %v13282_v4, %v10063_v45  ;;  %10611 = vmatpush3.bf16.msra.mxu0 %v13391_v12  ;;  %v2283_v62 = vadd.f32 %v13295_v25, %v2251_v19  ;;  %v2269_v57 = vmul.f32 %v13276_v29, %v10098_v16  ;;  %v10137_v45 = vld [vmem:[%s12965_s26 + $0xf0] sm:$0xff]  }
 0x1b0   : > { %v10245_v22 = vpop.f32.mrb[60].mxu0  ;;  %v10357_v9 = vpop.f32.mrb[60].mxu1  ;;  %v13398_v5 = vpack.c.bf16 %v2300_v51, %v2299_v7  ;;  %v2270_v30 = vmul.f32 %v13282_v4, %v10099_v27  ;;  %v10129_v19 = vld [vmem:[%s12965_s26 + $0x70] sm:$0xff]   ;;  %v10103_v12 = vunpack.c.h.bf16 %v10137_v45 }
 0x1b1   : > { %v10246_v1 = vpop.f32.mrb[61].mxu0  ;;  %v10358_v52 = vpop.f32.mrb[61].mxu1  ;;  %v2284_v37 = vadd.f32 %v13301_v15, %v2252_v35  ;;  %v2301_v7 = vadd.f32 %v13295_v25, %v2269_v57  ;;  %v10138_v57 = vld [vmem:[%s12965_s26 + $0xf8] sm:$0xff]  }
 0x1b2   : > { %15344 = vst [vmem:[#allocation36_spill] sm:$0xff] %v13398_v5  ;;  %v13403_v49 = vadd.f32 %v10246_v1, %v10245_v22  ;;  %v10248_v3 = vpop.f32.mrb[62].mxu0  ;;  %v13405_v48 = vadd.f32 %v10358_v52, %v10357_v9  ;;  %v10360_v23 = vpop.f32.mrb[62].mxu1  ;;  %10612 = vmatprep.subr.bf16.mxu0 %v13398_v5  ;;  %v2302_v51 = vadd.f32 %v13301_v15, %v2270_v30  ;;  %v10102_v5 = vunpack.c.l.bf16 %v10137_v45 }
 0x1b3   : > { %v10249_v38 = vpop.f32.mrb[63].mxu0  ;;  %v10361_v1 = vpop.f32.mrb[63].mxu1  ;;  %v13415_v27 = vpack.c.bf16 %v2284_v37, %v2283_v62  ;;  %v2253_v52 = vmul.f32 %v13276_v29, %v10066_v21  ;;  %v2254_v22 = vmul.f32 %v13282_v4, %v10067_v44  ;;  %v10130_v21 = vld [vmem:[%s12965_s26 + $0x78] sm:$0xff]   ;;  %v2272_v37 = vmul.f32 %v13282_v4, %v10103_v12  ;;  %s12818_s26 = smov 6  }
 0x1b4   : > { %15345 = vst [vmem:[#allocation37_spill] sm:$0xff] %v13403_v49  ;;  %v13413_v16 = vadd.f32 %v10249_v38, %v10248_v3  ;;  %v13419_v9 = vadd.f32 %v10361_v1, %v10360_v23  ;;  %v13421_v35 = vpack.c.bf16 %v2302_v51, %v2301_v7  ;;  %v10070_v3 = vunpack.c.l.bf16 %v10129_v19 }
 0x1b5   : > { %15347 = vst [vmem:[#allocation39_spill] sm:$0xff] %v13415_v27  ;;  %10613 = vmatpush3.bf16.msra.mxu0 %v13415_v27  ;;  %v2285_v38 = vadd.f32 %v13295_v25, %v2253_v52  ;;  %v2286_v62 = vadd.f32 %v13301_v15, %v2254_v22  ;;  %v2271_v44 = vmul.f32 %v13276_v29, %v10102_v5  ;;  %v10071_v45 = vunpack.c.h.bf16 %v10129_v19 }
 0x1b6   : > { %15346 = vst [vmem:[#allocation38_spill] sm:$0xff] %v13413_v16  ;;  %15348 = vst [vmem:[#allocation40_spill] sm:$0xff] %v13421_v35  ;;  %10614 = vmatprep.subr.bf16.mxu0 %v13421_v35  ;;  %v2255_v1 = vmul.f32 %v13276_v29, %v10070_v3  ;;  %v10106_v52 = vunpack.c.l.bf16 %v10138_v57  ;;  %v10107_v30 = vunpack.c.h.bf16 %v10138_v57  ;;  %v2304_v16 = vadd.f32 %v13301_v15, %v2272_v37 }
 0x1b7   : > { %v13435_v51 = vpack.c.bf16 %v2286_v62, %v2285_v38  ;;  %v2303_v49 = vadd.f32 %v13295_v25, %v2271_v44  ;;  %v2256_v23 = vmul.f32 %v13282_v4, %v10071_v45  ;;  %v10074_v35 = vunpack.c.l.bf16 %v10130_v21 }
 0x1b8   : > { %v10379_v7 = vpop.f32.mrb[64].mxu0  ;;  %v2287_v12 = vadd.f32 %v13295_v25, %v2255_v1  ;;  %v2273_v19 = vmul.f32 %v13276_v29, %v10106_v52  ;;  %v2274_v38 = vmul.f32 %v13282_v4, %v10107_v30  ;;  %v10075_v44 = vunpack.c.h.bf16 %v10130_v21 }
 0x1b9   : > { %15349 = vst [vmem:[#allocation41_spill] sm:$0xff] %v13435_v51  ;;  %v10380_v22 = vpop.f32.mrb[65].mxu0  ;;  %10615 = vmatpush3.bf16.msra.mxu0 %v13435_v51  ;;  %v13445_v57 = vpack.c.bf16 %v2304_v16, %v2303_v49  ;;  %v2288_v3 = vadd.f32 %v13301_v15, %v2256_v23  ;;  %v12548_v16 = vld [vmem:[#allocation3 + $0x104] ss:$8 sps:$4 sm:$0xff]  }
 0x1ba   : > { %v10381_v27 = vadd.f32 %v10380_v22, %v10379_v7  ;;  %v10382_v5 = vpop.f32.mrb[66].mxu0  ;;  %v2305_v45 = vadd.f32 %v13295_v25, %v2273_v19  ;;  %v2306_v7 = vadd.f32 %v13301_v15, %v2274_v38  ;;  %v2257_v22 = vmul.f32 %v13276_v29, %v10074_v35  ;;  %2916 = vmatprep.mubr.bf16.mxu0 %v12548_v16 }
 0x1bb   : > { %v10383_v62 = vpop.f32.mrb[67].mxu0  ;;  %10616 = vmatprep.subr.bf16.mxu0 %v13445_v57  ;;  %v13452_v1 = vpack.c.bf16 %v2288_v3, %v2287_v12  ;;  %v2258_v52 = vmul.f32 %v13282_v4, %v10075_v44 }
 0x1bc   : > { %v10384_v37 = vadd.f32 %v10383_v62, %v10382_v5  ;;  %v13455_v51 = vpack.c.bf16 %v2306_v7, %v2305_v45  ;;  %v2289_v49 = vadd.f32 %v13295_v25, %v2257_v22  ;;  %v12546_v5 = vld [vmem:[#allocation3 + $0x100] ss:$8 sps:$4 sm:$0xff]   ;;  %v15350_v22 = vpack.c.bf16 %v13159_v28, %v13155_v43 }
 0x1bd   : > { %10617 = vmatpush3.bf16.msra.mxu0 %v13452_v1  ;;  %v2290_v21 = vadd.f32 %v13301_v15, %v2258_v52  ;;  %v12549_v15 = vld [vmem:[#allocation3 + $0x114] ss:$8 sps:$4 sm:$0xff]  }
 0x1be   : > { %v1647_v30 = vpack.c.bf16 %v10384_v37, %v10381_v27  ;;  %10618 = vmatprep.subr.bf16.mxu0 %v13455_v51  ;;  %v12551_v37 = vld [vmem:[#allocation3 + $0x110] ss:$8 sps:$4 sm:$0xff]  }
 0x1bf   : > { %v13462_v35 = vpack.c.bf16 %v2290_v21, %v2289_v49 }
 0x1c0   : > { %v10385_v23 = vpop.f32.mrb[68].mxu0  ;;  %1727 = vrot.lane.b32.xlu1 %v1647_v30, %s12818_s26 }
 0x1c1   : > { %v10386_v29 = vpop.f32.mrb[69].mxu0  ;;  %10619 = vmatpush3.bf16.msra.mxu0 %v13462_v35 }
 0x1c2   : > { %v10387_v4 = vadd.f32 %v10386_v29, %v10385_v23  ;;  %v10388_v27 = vpop.f32.mrb[70].mxu0 }
 0x1c3   : > { %v10389_v12 = vpop.f32.mrb[71].mxu0 }
 0x1c4   : > { %v10390_v25 = vadd.f32 %v10389_v12, %v10388_v27  ;;  %2917 = vmatmul.mubr.bf16.vlgmr.msra.gmra.mrb[128].mxu0 %v12546_v5 }
 0x1c5   : > { %2924 = vmatprep.mubr.bf16.mxu0 %v12549_v15  ;;  %v15352_v15 = vpack.c.bf16 %v13183_v6, %v13179_v60 }
 0x1c6   : > { %v1648_v19 = vpack.c.bf16 %v10390_v25, %v10387_v4  ;;  %v15351_v4 = vpack.c.bf16 %v13171_v50, %v13167_v41 }
 0x1c8   : > { %v10391_v38 = vpop.f32.mrb[72].mxu0  ;;  %1729 = vrot.lane.b32.xlu1 %v1648_v19, %s12818_s26 }
 0x1c9   : > { %v10392_v62 = vpop.f32.mrb[73].mxu0 }
 0x1ca   : > { %v10393_v3 = vadd.f32 %v10392_v62, %v10391_v38  ;;  %v10394_v44 = vpop.f32.mrb[74].mxu0 }
 0x1cb   : > { %v10395_v45 = vpop.f32.mrb[75].mxu0 }
 0x1cc   : > { %v10396_v7 = vadd.f32 %v10395_v45, %v10394_v44  ;;  %1685 = vrot.lane.b32.xlu1 %v15350_v22, %s12816_s21  ;;  %2925 = vmatmul.mubr.bf16.gmra.mrb[132].mxu0 %v12551_v37  ;;  %v15353_v45 = vpack.c.bf16 %v13195_v24, %v13191_v0 }
 0x1ce   : > { %v1649_v52 = vpack.c.bf16 %v10396_v7, %v10393_v3 }
 0x1d0   : > { %v10397_v30 = vpop.f32.mrb[76].mxu0  ;;  %1731 = vrot.lane.b32.xlu0 %v1649_v52, %s12818_s26 }
 0x1d1   : > { %v10398_v49 = vpop.f32.mrb[77].mxu0 }
 0x1d2   : > { %v10399_v16 = vadd.f32 %v10398_v49, %v10397_v30  ;;  %v10400_v21 = vpop.f32.mrb[78].mxu0 }
 0x1d3   : > { %v10401_v23 = vpop.f32.mrb[79].mxu0 }
 0x1d4   : > { %v10402_v29 = vadd.f32 %v10401_v23, %v10400_v21  ;;  %1687 = vrot.lane.b32.xlu0 %v15351_v4, %s12816_s21 }
 0x1d6   : > { %v1650_v27 = vpack.c.bf16 %v10402_v29, %v10399_v16  ;;  %v15354_v16 = vpack.c.bf16 %v13207_v40, %v13203_v31 }
 0x1d8   : > { %v10403_v5 = vpop.f32.mrb[80].mxu0  ;;  %1733 = vrot.lane.b32.xlu1 %v1650_v27, %s12818_s26 }
 0x1d9   : > { %v10404_v43 = vpop.f32.mrb[81].mxu0 }
 0x1da   : > { %v10405_v28 = vadd.f32 %v10404_v43, %v10403_v5  ;;  %v10406_v12 = vpop.f32.mrb[82].mxu0  ;;  %v15355_v5 = vpack.c.bf16 %v13225_v10, %v13220_v13 }
 0x1db   : > { %v10407_v25 = vpop.f32.mrb[83].mxu0 }
 0x1dc   : > { %v10408_v19 = vadd.f32 %v10407_v25, %v10406_v12  ;;  %1689 = vrot.lane.b32.xlu1 %v15352_v15, %s12816_s21  ;;  %v15356_v15 = vpack.c.bf16 %v13237_v59, %v13233_v46 }
 0x1de   : > { %v1651_v38 = vpack.c.bf16 %v10408_v19, %v10405_v28 }
 0x1e0   : > { %v10409_v62 = vpop.f32.mrb[84].mxu0  ;;  %1735 = vrot.lane.b32.xlu0 %v1651_v38, %s12818_s26 }
 0x1e1   : > { %v10410_v41 = vpop.f32.mrb[85].mxu0 }
 0x1e2   : > { %v10411_v50 = vadd.f32 %v10410_v41, %v10409_v62  ;;  %v10412_v3 = vpop.f32.mrb[86].mxu0 }
 0x1e3   : > { %v10413_v44 = vpop.f32.mrb[87].mxu0 }
 0x1e4   : > { %v10414_v37 = vadd.f32 %v10413_v44, %v10412_v3  ;;  %1691 = vrot.lane.b32.xlu0 %v15353_v45, %s12816_s21  ;;  %v15357_v44 = vpack.c.bf16 %v13249_v55, %v13245_v18 }
 0x1e6   : > { %v1652_v7 = vpack.c.bf16 %v10414_v37, %v10411_v50 }
 0x1e8   : > { %v10415_v22 = vpop.f32.mrb[88].mxu0  ;;  %1737 = vrot.lane.b32.xlu1 %v1652_v7, %s12818_s26 }
 0x1e9   : > { %v10416_v60 = vpop.f32.mrb[89].mxu0 }
 0x1ea   : > { %v10417_v6 = vadd.f32 %v10416_v60, %v10415_v22  ;;  %v10418_v52 = vpop.f32.mrb[90].mxu0 }
 0x1eb   : > { %v10419_v30 = vpop.f32.mrb[91].mxu0 }
 0x1ec   : > { %v10420_v49 = vadd.f32 %v10419_v30, %v10418_v52  ;;  %1693 = vrot.lane.b32.xlu1 %v15354_v16, %s12816_s21 }
 0x1ee   : > { %v1653_v21 = vpack.c.bf16 %v10420_v49, %v10417_v6  ;;  %v15358_v6 = vpack.c.bf16 %v13261_v61, %v13257_v8 }
 0x1f0   : > { %v10421_v23 = vpop.f32.mrb[92].mxu0  ;;  %1739 = vrot.lane.b32.xlu0 %v1653_v21, %s12818_s26 }
 0x1f1   : > { %v10422_v0 = vpop.f32.mrb[93].mxu0 }
 0x1f2   : > { %v10423_v24 = vadd.f32 %v10422_v0, %v10421_v23  ;;  %v10424_v29 = vpop.f32.mrb[94].mxu0  ;;  %v15359_v23 = vpack.c.bf16 %v13287_v26, %v13271_v2 }
 0x1f3   : > { %v10425_v4 = vpop.f32.mrb[95].mxu0 }
 0x1f4   : > { %v10426_v27 = vadd.f32 %v10425_v4, %v10424_v29  ;;  %1695 = vrot.lane.b32.xlu0 %v15355_v5, %s12816_s21  ;;  %v15360_v5 = vpack.c.bf16 %v13336_v42, %v13326_v32 }
 0x1f6   : > { %v1654_v43 = vpack.c.bf16 %v10426_v27, %v10423_v24 }
 0x1f8   : > { %v10427_v28 = vpop.f32.mrb[96].mxu0  ;;  %1741 = vrot.lane.b32.xlu1 %v1654_v43, %s12818_s26 }
 0x1f9   : > { %v10428_v31 = vpop.f32.mrb[97].mxu0 }
 0x1fa   : > { %v10429_v40 = vadd.f32 %v10428_v31, %v10427_v28  ;;  %v10430_v12 = vpop.f32.mrb[98].mxu0 }
 0x1fb   : > { %v10431_v25 = vpop.f32.mrb[99].mxu0 }
 0x1fc   : > { %v10432_v19 = vadd.f32 %v10431_v25, %v10430_v12  ;;  %1697 = vrot.lane.b32.xlu1 %v15356_v15, %s12816_s21  ;;  %v15361_v25 = vpack.c.bf16 %v13376_v34, %v13364_v11  ;;  %v15363_v34 = vpack.c.bf16 %v13134_v47, %v13132_v36 }
 0x1fe   : > { %v1655_v38 = vpack.c.bf16 %v10432_v19, %v10429_v40 }
 0x200   : > { %v10433_v62 = vpop.f32.mrb[100].mxu0  ;;  %1743 = vrot.lane.b32.xlu0 %v1655_v38, %s12818_s26 }
 0x201   : > { %v10434_v13 = vpop.f32.mrb[101].mxu0 }
 0x202   : > { %v10435_v10 = vadd.f32 %v10434_v13, %v10433_v62  ;;  %v10436_v41 = vpop.f32.mrb[102].mxu0 }
 0x203   : > { %v10437_v50 = vpop.f32.mrb[103].mxu0 }
 0x204   : > { %v10438_v3 = vadd.f32 %v10437_v50, %v10436_v41  ;;  %1699 = vrot.lane.b32.xlu0 %v15357_v44, %s12816_s21  ;;  %v1680_v50 = vpop.permute.xlu0 %1679 }
 0x205   : > { %v1762_v44 = vsel %vm1759_vm2, %v15363_v34, %v1680_v50  ;;  %v15384_v34 = vld [vmem:[#allocation18_spill] sm:$0xff] }
 0x206   : > { %v1656_v37 = vpack.c.bf16 %v10438_v3, %v10435_v10  ;;  %v15362_v10 = vpack.c.bf16 %v13419_v9, %v13405_v48 }
 0x208   : > { %v10439_v45 = vpop.f32.mrb[104].mxu0  ;;  %1745 = vrot.lane.b32.xlu1 %v1656_v37, %s12818_s26 }
 0x209   : > { %v10440_v46 = vpop.f32.mrb[105].mxu0 }
 0x20a   : > { %v10441_v59 = vadd.f32 %v10440_v46, %v10439_v45  ;;  %v10442_v7 = vpop.f32.mrb[106].mxu0 }
 0x20b   : > { %v10443_v22 = vpop.f32.mrb[107].mxu0 }
 0x20c   : > { %v10444_v60 = vadd.f32 %v10443_v22, %v10442_v7  ;;  %1701 = vrot.lane.b32.xlu1 %v15358_v6, %s12816_s21  ;;  %v1682_v22 = vpop.permute.xlu0 %1681 }
 0x20e   : > { %v1657_v52 = vpack.c.bf16 %v10444_v60, %v10441_v59  ;;  %v15364_v60 = vpack.c.bf16 %v13141_v63, %v13139_v56 }
 0x210   : > { %v10445_v30 = vpop.f32.mrb[108].mxu0  ;;  %1747 = vrot.lane.b32.xlu0 %v1657_v52, %s12818_s26  ;;  %v1765_v36 = vsel %vm1759_vm2, %v15364_v60, %v1682_v22  ;;  %v1684_v52 = vpop.permute.xlu0 %1683 }
 0x211   : > { %v10446_v18 = vpop.f32.mrb[109].mxu0 }
 0x212   : > { %v10447_v55 = vadd.f32 %v10446_v18, %v10445_v30  ;;  %v10448_v49 = vpop.f32.mrb[110].mxu0  ;;  %v15365_v30 = vpack.c.bf16 %v13148_v20, %v13146_v14 }
 0x213   : > { %v10449_v16 = vpop.f32.mrb[111].mxu0 }
 0x214   : > { %v10450_v21 = vadd.f32 %v10449_v16, %v10448_v49  ;;  %1703 = vrot.lane.b32.xlu0 %v15359_v23, %s12816_s21  ;;  %v1768_v18 = vsel %vm1759_vm2, %v15365_v30, %v1684_v52  ;;  %v15366_v49 = vld [vmem:[#allocation35_spill] sm:$0xff]  ;;  %v15367_v16 = vld [vmem:[#allocation10_spill] sm:$0xff] }
 0x215   : > { %v15390_v52 = vld [vmem:[#allocation23_spill] sm:$0xff]  ;;  %v15391_v30 = vld [vmem:[#allocation22_spill] sm:$0xff] }
 0x216   : > { %v1658_v0 = vpack.c.bf16 %v10450_v21, %v10447_v55  ;;  %v15368_v21 = vld [vmem:[#allocation9_spill] sm:$0xff] }
 0x217   : > { %v15369_v23 = vpack.c.bf16 %v15367_v16, %v15368_v21  ;;  %v15393_v21 = vld [vmem:[#allocation25_spill] sm:$0xff] }
 0x218   : > { %v10451_v24 = vpop.f32.mrb[112].mxu0  ;;  %1749 = vrot.lane.b32.xlu1 %v1658_v0, %s12818_s26  ;;  %v15370_v0 = vld [vmem:[#allocation36_spill] sm:$0xff] }
 0x219   : > { %v10452_v8 = vpop.f32.mrb[113].mxu0 }
 0x21a   : > { %v10453_v61 = vadd.f32 %v10452_v8, %v10451_v24  ;;  %v10454_v29 = vpop.f32.mrb[114].mxu0  ;;  %v15371_v8 = vld [vmem:[#allocation39_spill] sm:$0xff] }
 0x21b   : > { %v10455_v4 = vpop.f32.mrb[115].mxu0 }
 0x21c   : > { %v10456_v27 = vadd.f32 %v10455_v4, %v10454_v29  ;;  %1705 = vrot.lane.b32.xlu1 %v15360_v5, %s12816_s21  ;;  %v15372_v29 = vld [vmem:[#allocation40_spill] sm:$0xff]  ;;  %v15373_v4 = vld [vmem:[#allocation41_spill] sm:$0xff]  ;;  %v15375_v5 = vld [vmem:[#allocation11_spill] sm:$0xff] }
 0x21e   : > { %v1659_v43 = vpack.c.bf16 %v10456_v27, %v10453_v61  ;;  %v15374_v27 = vld [vmem:[#allocation12_spill] sm:$0xff] }
 0x220   : > { %v10457_v28 = vpop.f32.mrb[116].mxu0  ;;  %1751 = vrot.lane.b32.xlu0 %v1659_v43, %s12818_s26  ;;  %v15376_v43 = vpack.c.bf16 %v15374_v27, %v15375_v5  ;;  %v15396_v5 = vld [vmem:[#allocation27_spill] sm:$0xff] }
 0x221   : > { %v10458_v2 = vpop.f32.mrb[117].mxu0 }
 0x222   : > { %v10459_v26 = vadd.f32 %v10458_v2, %v10457_v28  ;;  %v10460_v31 = vpop.f32.mrb[118].mxu0 }
 0x223   : > { %v10461_v40 = vpop.f32.mrb[119].mxu0 }
 0x224   : > { %v10462_v12 = vadd.f32 %v10461_v40, %v10460_v31  ;;  %1707 = vrot.lane.b32.xlu0 %v15361_v25, %s12816_s21  ;;  %v15377_v40 = vld [vmem:[#allocation14_spill] sm:$0xff] }
 0x226   : > { %v1660_v19 = vpack.c.bf16 %v10462_v12, %v10459_v26  ;;  %v15378_v12 = vld [vmem:[#allocation13_spill] sm:$0xff] }
 0x227   : > { %v15379_v25 = vpack.c.bf16 %v15377_v40, %v15378_v12  ;;  %v15399_v12 = vld [vmem:[#allocation29_spill] sm:$0xff] }
 0x228   : > { %v10463_v15 = vpop.f32.mrb[120].mxu0  ;;  %1753 = vrot.lane.b32.xlu1 %v1660_v19, %s12818_s26 }
 0x229   : > { %v10464_v32 = vpop.f32.mrb[121].mxu0 }
 0x22a   : > { %v10465_v42 = vadd.f32 %v10464_v32, %v10463_v15  ;;  %v10466_v38 = vpop.f32.mrb[122].mxu0  ;;  %v15380_v32 = vld [vmem:[#allocation30_spill] sm:$0xff] }
 0x22b   : > { %v10467_v62 = vpop.f32.mrb[123].mxu0 }
 0x22c   : > { %v10468_v13 = vadd.f32 %v10467_v62, %v10466_v38  ;;  %1709 = vrot.lane.b32.xlu1 %v15362_v10, %s12816_s21  ;;  %v15381_v62 = vld [vmem:[#allocation16_spill] sm:$0xff] }
 0x22e   : > { %v1661_v41 = vpack.c.bf16 %v10468_v13, %v10465_v42  ;;  %v15382_v13 = vld [vmem:[#allocation15_spill] sm:$0xff] }
 0x22f   : > { %v15383_v10 = vpack.c.bf16 %v15381_v62, %v15382_v13  ;;  %v15402_v13 = vld [vmem:[#allocation32_spill] sm:$0xff] }
 0x230   : > { %v10469_v3 = vpop.f32.mrb[124].mxu0  ;;  %1755 = vrot.lane.b32.xlu0 %v1661_v41, %s12818_s26 }
 0x231   : > { %v10470_v11 = vpop.f32.mrb[125].mxu0 }
 0x232   : > { %v10471_v37 = vadd.f32 %v10470_v11, %v10469_v3  ;;  %v10472_v45 = vpop.f32.mrb[126].mxu0  ;;  %v1728_v46 = vpop.permute.xlu1 %1727 }
 0x233   : > { %v1810_v48 = vsel %vm1808_vm3, %v1762_v44, %v1728_v46  ;;  %v10473_v9 = vpop.f32.mrb[127].mxu0  ;;  %v15385_v44 = vld [vmem:[#allocation17_spill] sm:$0xff] }
 0x234   : > { %v10474_v59 = vadd.f32 %v10473_v9, %v10472_v45  ;;  %11153 = vmatprep.mubr.msk.bf16.mxu1 %vm1848_vm4, %v1810_v48 }
 0x236   : > { %v1662_v7 = vpack.c.bf16 %v10474_v59, %v10471_v37  ;;  %v15386_v37 = vpack.c.bf16 %v15384_v34, %v15385_v44  ;;  %v15387_v59 = vld [vmem:[#allocation21_spill] sm:$0xff] }
 0x238   : > { %1757 = vrot.lane.b32.xlu1 %v1662_v7, %s12818_s26  ;;  %v15388_v7 = vld [vmem:[#allocation20_spill] sm:$0xff] }
 0x239   : > { %v15389_v22 = vpack.c.bf16 %v15387_v59, %v15388_v7  ;;  %v15405_v7 = vld [vmem:[#allocation34_spill] sm:$0xff] }
 0x23a   : > { %v1730_v47 = vpop.permute.xlu1 %1729 }
 0x23b   : > { %v1812_v6 = vsel %vm1808_vm3, %v1765_v36, %v1730_v47 }
 0x23c   : > { %11154 = vmatmul.mubr.msk.bf16.vlgmr.msra.gmra.mrb[64].mxu1 %vm1848_vm4, %v1812_v6 }
 0x23d   : > { %10493 = vmatpush3.bf16.msra.mxu1 %v13315_v53 }
 0x23e   : > { %10494 = vmatprep.subr.bf16.mxu1 %v13330_v54  ;;  %v1686_v55 = vpop.permute.xlu1 %1685 }
 0x23f   : > { %v1771_v14 = vsel %vm1759_vm2, %v15369_v23, %v1686_v55  ;;  %v15394_v23 = vld [vmem:[#allocation24_spill] sm:$0xff] }
 0x241   : > { %10495 = vmatpush3.bf16.msra.mxu1 %v13349_v33 }
 0x242   : > { %v1732_v56 = vpop.permute.xlu0 %1731  ;;  %10496 = vmatprep.subr.bf16.mxu1 %v13356_v17 }
 0x243   : > { %v1814_v63 = vsel %vm1808_vm3, %v1768_v18, %v1732_v56  ;;  %v15392_v18 = vpack.c.bf16 %v15390_v52, %v15391_v30 }
 0x244   : > { %11157 = vmatprep.mubr.msk.bf16.mxu1 %vm1848_vm4, %v1814_v63 }
 0x245   : > { %10497 = vmatpush3.bf16.msra.mxu1 %v13370_v58 }
 0x246   : > { %10498 = vmatprep.subr.bf16.mxu1 %v13382_v39  ;;  %v1688_v61 = vpop.permute.xlu0 %1687 }
 0x247   : > { %v1774_v28 = vsel %vm1759_vm2, %v15376_v43, %v1688_v61  ;;  %v15397_v43 = vld [vmem:[#allocation26_spill] sm:$0xff] }
 0x249   : > { %10499 = vmatpush3.bf16.msra.mxu1 %v15366_v49 }
 0x24a   : > { %v1734_v20 = vpop.permute.xlu1 %1733  ;;  %10500 = vmatprep.subr.bf16.mxu1 %v15370_v0 }
 0x24b   : > { %v1816_v24 = vsel %vm1808_vm3, %v1771_v14, %v1734_v20  ;;  %v15395_v14 = vpack.c.bf16 %v15393_v21, %v15394_v23  ;;  %v12554_v21 = vld [vmem:[#allocation3 + $0x4] ss:$8 sps:$4 sm:$0xff]  }
 0x24c   : > { %11158 = vmatmul.mubr.msk.bf16.gmra.mrb[68].mxu1 %vm1848_vm4, %v1816_v24  ;;  %v15408_v23 = vld [vmem:[#allocation38_spill] sm:$0xff] }
 0x24d   : > { %10501 = vmatpush3.bf16.msra.mxu1 %v15371_v8 }
 0x24e   : > { %10502 = vmatprep.subr.bf16.mxu1 %v15372_v29  ;;  %v1690_v31 = vpop.permute.xlu1 %1689 }
 0x24f   : > { %v1777_v19 = vsel %vm1759_vm2, %v15379_v25, %v1690_v31  ;;  %v15400_v25 = vld [vmem:[#allocation28_spill] sm:$0xff] }
 0x251   : > { %10503 = vmatpush3.bf16.msra.mxu1 %v15373_v4 }
 0x252   : > { %v1736_v2 = vpop.permute.xlu0 %1735  ;;  %10504 = vmatprep.subr.bf16.mxu1 %v13445_v57 }
 0x253   : > { %v1818_v26 = vsel %vm1808_vm3, %v1774_v28, %v1736_v2  ;;  %v15398_v28 = vpack.c.bf16 %v15396_v5, %v15397_v43  ;;  %v12552_v5 = vld [vmem:[#allocation3] ss:$8 sps:$4 sm:$0xff]   ;;  %v12555_v43 = vld [vmem:[#allocation3 + $0x14] ss:$8 sps:$4 sm:$0xff]  }
 0x254   : > { %11161 = vmatprep.mubr.msk.bf16.mxu1 %vm1848_vm4, %v1818_v26 }
 0x255   : > { %10505 = vmatpush3.bf16.msra.mxu1 %v13452_v1 }
 0x256   : > { %10506 = vmatprep.subr.bf16.mxu1 %v13455_v51  ;;  %v1692_v38 = vpop.permute.xlu0 %1691 }
 0x257   : > { %v1780_v41 = vsel %vm1759_vm2, %v15383_v10, %v1692_v38  ;;  %v15403_v10 = vld [vmem:[#allocation31_spill] sm:$0xff] }
 0x259   : > { %10507 = vmatpush3.bf16.msra.mxu1 %v13462_v35 }
 0x25a   : > { %v1738_v15 = vpop.permute.xlu1 %1737  ;;  %10716 = vmatprep.subr.bf16.mxu1 %v15380_v32 }
 0x25b   : > { %v1820_v42 = vsel %vm1808_vm3, %v1777_v19, %v1738_v15  ;;  %v15401_v19 = vpack.c.bf16 %v15399_v12, %v15400_v25  ;;  %v12560_v12 = vld [vmem:[#allocation3 + $0x20] ss:$8 sps:$4 sm:$0xff]   ;;  %v12627_v25 = vld [vmem:[#allocation3 + $0x164] ss:$8 sps:$4 sm:$0xff]  }
 0x25c   : > { %11162 = vmatmul.mubr.msk.bf16.gmra.mrb[72].mxu1 %vm1848_vm4, %v1820_v42 }
 0x25e   : > { %v1694_v11 = vpop.permute.xlu1 %1693 }
 0x25f   : > { %v1783_v45 = vsel %vm1759_vm2, %v15386_v37, %v1694_v11 }
 0x262   : > { %v1740_v50 = vpop.permute.xlu0 %1739 }
 0x263   : > { %v1822_v3 = vsel %vm1808_vm3, %v1780_v41, %v1740_v50  ;;  %v15404_v41 = vpack.c.bf16 %v15402_v13, %v15403_v10  ;;  %v12645_v13 = vld [vmem:[#allocation3 + $0x194] ss:$8 sps:$4 sm:$0xff]   ;;  %v12647_v10 = vld [vmem:[#allocation3 + $0x190] ss:$8 sps:$4 sm:$0xff]  }
 0x264   : > { %11165 = vmatprep.mubr.msk.bf16.mxu1 %vm1848_vm4, %v1822_v3 }
 0x266   : > { %v1696_v9 = vpop.permute.xlu0 %1695 }
 0x267   : > { %v1786_v60 = vsel %vm1759_vm2, %v15389_v22, %v1696_v9  ;;  %v15406_v22 = vld [vmem:[#allocation33_spill] sm:$0xff] }
 0x26a   : > { %v1742_v46 = vpop.permute.xlu1 %1741 }
 0x26b   : > { %v1824_v48 = vsel %vm1808_vm3, %v1783_v45, %v1742_v46 }
 0x26c   : > { %11166 = vmatmul.mubr.msk.bf16.gmra.mrb[76].mxu1 %vm1848_vm4, %v1824_v48 }
 0x26e   : > { %v1698_v6 = vpop.permute.xlu1 %1697 }
 0x26f   : > { %v1789_v56 = vsel %vm1759_vm2, %v15392_v18, %v1698_v6 }
 0x272   : > { %v1744_v36 = vpop.permute.xlu0 %1743 }
 0x273   : > { %v1826_v47 = vsel %vm1808_vm3, %v1786_v60, %v1744_v36  ;;  %v15407_v60 = vpack.c.bf16 %v15405_v7, %v15406_v22  ;;  %v12587_v7 = vld [vmem:[#allocation3 + $0xb0] ss:$8 sps:$4 sm:$0xff]   ;;  %v12588_v22 = vld [vmem:[#allocation3 + $0xc4] ss:$8 sps:$4 sm:$0xff]  }
 0x274   : > { %11169 = vmatprep.mubr.msk.bf16.mxu1 %vm1848_vm4, %v1826_v47 }
 0x276   : > { %v1700_v16 = vpop.permute.xlu0 %1699 }
 0x277   : > { %v1792_v20 = vsel %vm1759_vm2, %v15395_v14, %v1700_v16  ;;  %v15409_v14 = vld [vmem:[#allocation37_spill] sm:$0xff] }
 0x27a   : > { %v1746_v63 = vpop.permute.xlu1 %1745 }
 0x27b   : > { %v1828_v55 = vsel %vm1808_vm3, %v1789_v56, %v1746_v63 }
 0x27c   : > { %11170 = vmatmul.mubr.msk.bf16.gmra.mrb[80].mxu1 %vm1848_vm4, %v1828_v55 }
 0x27e   : > { %v1702_v27 = vpop.permute.xlu1 %1701 }
 0x27f   : > { %v1795_v2 = vsel %vm1759_vm2, %v15398_v28, %v1702_v27  ;;  %v12603_v28 = vld [vmem:[#allocation3 + $0x124] ss:$8 sps:$4 sm:$0xff]  }
 0x280   : > { %2932 = vmatprep.mubr.bf16.mxu0 %v12603_v28  ;;  %v12675_v28 = vld [vmem:[#allocation3 + $0x1e4] ss:$8 sps:$4 sm:$0xff]  }
 0x282   : > { %v1748_v24 = vpop.permute.xlu0 %1747 }
 0x283   : > { %v1830_v61 = vsel %vm1808_vm3, %v1792_v20, %v1748_v24  ;;  %v15410_v20 = vpack.c.bf16 %v15408_v23, %v15409_v14  ;;  %v12591_v23 = vld [vmem:[#allocation3 + $0xd4] ss:$8 sps:$4 sm:$0xff]  }
 0x284   : > { %11173 = vmatprep.mubr.msk.bf16.mxu1 %vm1848_vm4, %v1830_v61 }
 0x286   : > { %v1704_v40 = vpop.permute.xlu0 %1703 }
 0x287   : > { %v1798_v15 = vsel %vm1759_vm2, %v15401_v19, %v1704_v40  ;;  %v12609_v40 = vld [vmem:[#allocation3 + $0x134] ss:$8 sps:$4 sm:$0xff]   ;;  %v12570_v19 = vld [vmem:[#allocation3 + $0x64] ss:$8 sps:$4 sm:$0xff]  }
 0x28a   : > { %v1750_v26 = vpop.permute.xlu1 %1749 }
 0x28b   : > { %v1832_v31 = vsel %vm1808_vm3, %v1795_v2, %v1750_v26  ;;  %v12605_v2 = vld [vmem:[#allocation3 + $0x120] ss:$8 sps:$4 sm:$0xff]   ;;  %v12557_v26 = vld [vmem:[#allocation3 + $0x10] ss:$8 sps:$4 sm:$0xff]  }
 0x28c   : > { %11174 = vmatmul.mubr.msk.bf16.gmra.mrb[84].mxu1 %vm1848_vm4, %v1832_v31  ;;  %2933 = vmatmul.mubr.bf16.gmra.mrb[136].mxu0 %v12605_v2  ;;  %v12558_v31 = vld [vmem:[#allocation3 + $0x24] ss:$8 sps:$4 sm:$0xff]  }
 0x28d   : > { %2940 = vmatprep.mubr.bf16.mxu0 %v12609_v40 }
 0x28e   : > { %v1706_v38 = vpop.permute.xlu1 %1705 }
 0x28f   : > { %v1801_v50 = vsel %vm1759_vm2, %v15404_v41, %v1706_v38  ;;  %v12575_v38 = vld [vmem:[#allocation3 + $0x70] ss:$8 sps:$4 sm:$0xff]   ;;  %v12578_v41 = vld [vmem:[#allocation3 + $0x80] ss:$8 sps:$4 sm:$0xff]  }
 0x292   : > { %v1752_v32 = vpop.permute.xlu0 %1751 }
 0x293   : > { %v1834_v42 = vsel %vm1808_vm3, %v1798_v15, %v1752_v32  ;;  %v12635_v15 = vld [vmem:[#allocation3 + $0x170] ss:$8 sps:$4 sm:$0xff]   ;;  %v12573_v32 = vld [vmem:[#allocation3 + $0x74] ss:$8 sps:$4 sm:$0xff]  }
 0x294   : > { %11177 = vmatprep.mubr.msk.bf16.mxu1 %vm1848_vm4, %v1834_v42  ;;  %v12639_v42 = vld [vmem:[#allocation3 + $0x184] ss:$8 sps:$4 sm:$0xff]  }
 0x296   : > { %v1708_v48 = vpop.permute.xlu0 %1707 }
 0x297   : > { %v10620_v62 = vpop.f32.mrb[128].mxu0  ;;  %v1804_v36 = vsel %vm1759_vm2, %v15407_v60, %v1708_v48  ;;  %v12585_v48 = vld [vmem:[#allocation3 + $0xb4] ss:$8 sps:$4 sm:$0xff]   ;;  %v13664_v60 = vld [vmem:[%s15251_s5] sm:$0xff] }
 0x298   : > { %v10621_v11 = vpop.f32.mrb[129].mxu0 }
 0x299   : > { %v10622_v44 = vadd.f32 %v10621_v11, %v10620_v62  ;;  %v10623_v37 = vpop.f32.mrb[130].mxu0  ;;  %v12576_v62 = vld [vmem:[#allocation3 + $0x84] ss:$8 sps:$4 sm:$0xff]   ;;  %v12653_v11 = vld [vmem:[#allocation3 + $0x1a0] ss:$8 sps:$4 sm:$0xff]  }
 0x29a   : > { %v1754_v3 = vpop.permute.xlu1 %1753  ;;  %v10624_v45 = vpop.f32.mrb[131].mxu0 }
 0x29b   : > { %v1836_v34 = vsel %vm1808_vm3, %v1801_v50, %v1754_v3  ;;  %v10625_v46 = vadd.f32 %v10624_v45, %v10623_v37  ;;  %v12579_v50 = vld [vmem:[#allocation3 + $0x94] ss:$8 sps:$4 sm:$0xff]   ;;  %v12651_v3 = vld [vmem:[#allocation3 + $0x1a4] ss:$8 sps:$4 sm:$0xff]   ;;  %v12659_v45 = vld [vmem:[#allocation3 + $0x1b0] ss:$8 sps:$4 sm:$0xff]  }
 0x29c   : > { %11178 = vmatmul.mubr.msk.bf16.gmra.mrb[88].mxu1 %vm1848_vm4, %v1836_v34  ;;  %v12581_v34 = vld [vmem:[#allocation3 + $0x90] ss:$8 sps:$4 sm:$0xff]   ;;  %v12657_v37 = vld [vmem:[#allocation3 + $0x1b4] ss:$8 sps:$4 sm:$0xff]  }
 0x29d   : > { %v3045_v9 = vpack.c.bf16 %v10625_v46, %v10622_v44  ;;  %v12582_v44 = vld [vmem:[#allocation3 + $0xa4] ss:$8 sps:$4 sm:$0xff]   ;;  %v12584_v46 = vld [vmem:[#allocation3 + $0xa0] ss:$8 sps:$4 sm:$0xff]  }
 0x29e   : > { %v1710_v55 = vpop.permute.xlu1 %1709 }
 0x29f   : > { %v10626_v59 = vpop.f32.mrb[132].mxu0  ;;  %3446 = vrot.lane.b32.xlu0 %v3045_v9, %s12816_s21  ;;  %v1807_v24 = vsel %vm1759_vm2, %v15410_v20, %v1710_v55  ;;  %v12663_v9 = vld [vmem:[#allocation3 + $0x1c4] ss:$8 sps:$4 sm:$0xff]  }
 0x2a0   : > { %v10627_v6 = vpop.f32.mrb[133].mxu0 }
 0x2a1   : > { %v10628_v30 = vadd.f32 %v10627_v6, %v10626_v59  ;;  %v10629_v18 = vpop.f32.mrb[134].mxu0  ;;  %v12665_v59 = vld [vmem:[#allocation3 + $0x1c0] ss:$8 sps:$4 sm:$0xff]  }
 0x2a2   : > { %v1756_v47 = vpop.permute.xlu0 %1755  ;;  %v10630_v56 = vpop.f32.mrb[135].mxu0  ;;  %v13669_v6 = vld [vmem:[%s15252_s6] sm:$0xff] }
 0x2a3   : > { %v1838_v52 = vsel %vm1808_vm3, %v1804_v36, %v1756_v47  ;;  %v10631_v63 = vadd.f32 %v10630_v56, %v10629_v18  ;;  %v12669_v36 = vld [vmem:[#allocation3 + $0x1d4] ss:$8 sps:$4 sm:$0xff]   ;;  %v12671_v47 = vld [vmem:[#allocation3 + $0x1d0] ss:$8 sps:$4 sm:$0xff]  }
 0x2a4   : > { %11181 = vmatprep.mubr.msk.bf16.mxu1 %vm1848_vm4, %v1838_v52 }
 0x2a5   : > { %v3046_v16 = vpack.c.bf16 %v10631_v63, %v10628_v30  ;;  %v13674_v30 = vld [vmem:[%s15251_s5 + $0x8] sm:$0xff] }
 0x2a6   : > { %v12590_v63 = vld [vmem:[#allocation3 + $0xc0] ss:$8 sps:$4 sm:$0xff]  }
 0x2a7   : > { %3448 = vrot.lane.b32.xlu1 %v3046_v16, %s12816_s21  ;;  %v13681_v16 = vld [vmem:[%s15252_s6 + $0x8] sm:$0xff] }
 0x2aa   : > { %v1758_v61 = vpop.permute.xlu1 %1757 }
 0x2ab   : > { %v1840_v27 = vsel %vm1808_vm3, %v1807_v24, %v1758_v61 }
 0x2ac   : > { %11182 = vmatmul.mubr.msk.bf16.gmra.mrb[92].mxu1 %vm1848_vm4, %v1840_v27 }
 0x2ad   : > { %2547 = vmatprep.mubr.bf16.mxu1 %v12554_v21 }
 0x2b4   : > { %2548 = vmatmul.mubr.bf16.vlgmr.msra.gmra.mrb[96].mxu1 %v12552_v5 }
 0x2b5   : > { %10717 = vmatpush3.bf16.msra.mxu1 %v13315_v53  ;;  %2555 = vmatprep.mubr.bf16.mxu1 %v12555_v43  ;;  %v12611_v53 = vld [vmem:[#allocation3 + $0x130] ss:$8 sps:$4 sm:$0xff]  }
 0x2b6   : > { %10718 = vmatprep.subr.bf16.mxu1 %v13330_v54  ;;  %2941 = vmatmul.mubr.bf16.gmra.mrb[140].mxu0 %v12611_v53  ;;  %v12561_v54 = vld [vmem:[#allocation3 + $0x34] ss:$8 sps:$4 sm:$0xff]  }
 0x2b9   : > { %10719 = vmatpush3.bf16.msra.mxu1 %v13349_v33  ;;  %v12563_v33 = vld [vmem:[#allocation3 + $0x30] ss:$8 sps:$4 sm:$0xff]  }
 0x2ba   : > { %10720 = vmatprep.subr.bf16.mxu1 %v13356_v17  ;;  %v12615_v17 = vld [vmem:[#allocation3 + $0x144] ss:$8 sps:$4 sm:$0xff]  }
 0x2bb   : > { %2948 = vmatprep.mubr.bf16.mxu0 %v12615_v17 }
 0x2bc   : > { %2556 = vmatmul.mubr.bf16.gmra.mrb[100].mxu1 %v12557_v26 }
 0x2bd   : > { %2563 = vmatprep.mubr.bf16.mxu1 %v12558_v31  ;;  %10721 = vmatpush3.bf16.msra.mxu1 %v13370_v58  ;;  %v12617_v58 = vld [vmem:[#allocation3 + $0x140] ss:$8 sps:$4 sm:$0xff]  }
 0x2be   : > { %10722 = vmatprep.subr.bf16.mxu1 %v13382_v39  ;;  %2949 = vmatmul.mubr.bf16.gmra.mrb[144].mxu0 %v12617_v58  ;;  %v12564_v39 = vld [vmem:[#allocation3 + $0x44] ss:$8 sps:$4 sm:$0xff]   ;;  %v12677_v31 = vld [vmem:[#allocation3 + $0x1e0] ss:$8 sps:$4 sm:$0xff]  }
 0x2bf   : > { %v12594_v58 = vld [vmem:[#allocation3 + $0xe4] ss:$8 sps:$4 sm:$0xff]  }
 0x2c1   : > { %10723 = vmatpush3.bf16.msra.mxu1 %v15366_v49  ;;  %v12621_v49 = vld [vmem:[#allocation3 + $0x154] ss:$8 sps:$4 sm:$0xff]  }
 0x2c2   : > { %10724 = vmatprep.subr.bf16.mxu1 %v15370_v0  ;;  %v12623_v0 = vld [vmem:[#allocation3 + $0x150] ss:$8 sps:$4 sm:$0xff]   ;;  %2956 = vmatprep.mubr.bf16.mxu0 %v12621_v49 }
 0x2c4   : > { %2564 = vmatmul.mubr.bf16.gmra.mrb[104].mxu1 %v12560_v12 }
 0x2c5   : > { %2571 = vmatprep.mubr.bf16.mxu1 %v12561_v54  ;;  %10725 = vmatpush3.bf16.msra.mxu1 %v15371_v8  ;;  %v12566_v8 = vld [vmem:[#allocation3 + $0x40] ss:$8 sps:$4 sm:$0xff]   ;;  %v12593_v54 = vld [vmem:[#allocation3 + $0xd0] ss:$8 sps:$4 sm:$0xff]  }
 0x2c6   : > { %10726 = vmatprep.subr.bf16.mxu1 %v15372_v29  ;;  %2957 = vmatmul.mubr.bf16.gmra.mrb[148].mxu0 %v12623_v0  ;;  %v12567_v29 = vld [vmem:[#allocation3 + $0x54] ss:$8 sps:$4 sm:$0xff]  }
 0x2c7   : > { %2964 = vmatprep.mubr.bf16.mxu0 %v12627_v25 }
 0x2c9   : > { %10727 = vmatpush3.bf16.msra.mxu1 %v15373_v4  ;;  %v12629_v4 = vld [vmem:[#allocation3 + $0x160] ss:$8 sps:$4 sm:$0xff]  }
 0x2ca   : > { %10728 = vmatprep.subr.bf16.mxu1 %v13445_v57  ;;  %v12569_v57 = vld [vmem:[#allocation3 + $0x50] ss:$8 sps:$4 sm:$0xff]  }
 0x2cc   : > { %2572 = vmatmul.mubr.bf16.gmra.mrb[108].mxu1 %v12563_v33  ;;  %v12681_v33 = vld [vmem:[#allocation3 + $0x1f4] ss:$8 sps:$4 sm:$0xff]  }
 0x2cd   : > { %2579 = vmatprep.mubr.bf16.mxu1 %v12564_v39  ;;  %10729 = vmatpush3.bf16.msra.mxu1 %v13452_v1  ;;  %v12633_v1 = vld [vmem:[#allocation3 + $0x174] ss:$8 sps:$4 sm:$0xff]   ;;  %v12683_v39 = vld [vmem:[#allocation3 + $0x1f0] ss:$8 sps:$4 sm:$0xff]  }
 0x2ce   : > { %10730 = vmatprep.subr.bf16.mxu1 %v13455_v51  ;;  %2965 = vmatmul.mubr.bf16.gmra.mrb[152].mxu0 %v12629_v4  ;;  %v12572_v51 = vld [vmem:[#allocation3 + $0x60] ss:$8 sps:$4 sm:$0xff]  }
 0x2cf   : > { %2972 = vmatprep.mubr.bf16.mxu0 %v12633_v1 }
 0x2d1   : > { %10731 = vmatpush3.bf16.msra.mxu1 %v13462_v35  ;;  %v12641_v35 = vld [vmem:[#allocation3 + $0x180] ss:$8 sps:$4 sm:$0xff]  }
 0x2d4   : > { %2580 = vmatmul.mubr.bf16.gmra.mrb[112].mxu1 %v12566_v8 }
 0x2d5   : > { %2587 = vmatprep.mubr.bf16.mxu1 %v12567_v29  ;;  %v12596_v29 = vld [vmem:[#allocation3 + $0xe0] ss:$8 sps:$4 sm:$0xff]  }
 0x2d6   : > { %2973 = vmatmul.mubr.bf16.gmra.mrb[156].mxu0 %v12635_v15 }
 0x2d7   : > { %2980 = vmatprep.mubr.bf16.mxu0 %v12639_v42 }
 0x2dc   : > { %2588 = vmatmul.mubr.bf16.gmra.mrb[116].mxu1 %v12569_v57  ;;  %v12597_v57 = vld [vmem:[#allocation3 + $0xf4] ss:$8 sps:$4 sm:$0xff]  }
 0x2dd   : > { %2595 = vmatprep.mubr.bf16.mxu1 %v12570_v19 }
 0x2de   : > { %2981 = vmatmul.mubr.bf16.gmra.mrb[160].mxu0 %v12641_v35 }
 0x2df   : > { %2988 = vmatprep.mubr.bf16.mxu0 %v12645_v13 }
 0x2e4   : > { %2596 = vmatmul.mubr.bf16.gmra.mrb[120].mxu1 %v12572_v51 }
 0x2e5   : > { %2603 = vmatprep.mubr.bf16.mxu1 %v12573_v32 }
 0x2e6   : > { %2989 = vmatmul.mubr.bf16.gmra.mrb[164].mxu0 %v12647_v10 }
 0x2e7   : > { %2996 = vmatprep.mubr.bf16.mxu0 %v12651_v3 }
 0x2ec   : > { %2604 = vmatmul.mubr.bf16.gmra.mrb[124].mxu1 %v12575_v38 }
 0x2ed   : > { %2611 = vmatprep.mubr.bf16.mxu1 %v12576_v62 }
 0x2ee   : > { %2997 = vmatmul.mubr.bf16.gmra.mrb[168].mxu0 %v12653_v11  ;;  %v12602_v11 = vld [vmem:[#allocation3 + $0x204] ss:$8 sps:$4 sm:$0xff]  }
 0x2ef   : > { %3004 = vmatprep.mubr.bf16.mxu0 %v12657_v37 }
 0x2f4   : > { %2612 = vmatmul.mubr.bf16.gmra.mrb[128].mxu1 %v12578_v41 }
 0x2f5   : > { %2619 = vmatprep.mubr.bf16.mxu1 %v12579_v50  ;;  %v12599_v50 = vld [vmem:[#allocation3 + $0xf0] ss:$8 sps:$4 sm:$0xff]  }
 0x2f6   : > { %3005 = vmatmul.mubr.bf16.gmra.mrb[172].mxu0 %v12659_v45 }
 0x2f7   : > { %3012 = vmatprep.mubr.bf16.mxu0 %v12663_v9 }
 0x2fc   : > { %2620 = vmatmul.mubr.bf16.gmra.mrb[132].mxu1 %v12581_v34  ;;  %v12690_v34 = vld [vmem:[%s15253_s7 + $0x8] sm:$0xff]  }
 0x2fd   : > { %2627 = vmatprep.mubr.bf16.mxu1 %v12582_v44  ;;  %11525 = vmatprep.subr.bf16.mxu1 %v12690_v34 }
 0x2fe   : > { %3013 = vmatmul.mubr.bf16.gmra.mrb[176].mxu0 %v12665_v59  ;;  %v12606_v59 = vld [vmem:[#allocation3 + $0x214] ss:$8 sps:$4 sm:$0xff]  }
 0x2ff   : > { %3020 = vmatprep.mubr.bf16.mxu0 %v12669_v36 }
 0x304   : > { %2628 = vmatmul.mubr.bf16.gmra.mrb[136].mxu1 %v12584_v46  ;;  %v12600_v46 = vld [vmem:[#allocation3 + $0x200] ss:$8 sps:$4 sm:$0xff]  }
 0x305   : > { %2635 = vmatprep.mubr.bf16.mxu1 %v12585_v48 }
 0x306   : > { %3021 = vmatmul.mubr.bf16.gmra.mrb[180].mxu0 %v12671_v47 }
 0x307   : > { %3028 = vmatprep.mubr.bf16.mxu0 %v12675_v28  ;;  %v12614_v28 = vld [vmem:[#allocation3 + $0x220] ss:$8 sps:$4 sm:$0xff]  }
 0x30c   : > { %2636 = vmatmul.mubr.bf16.gmra.mrb[140].mxu1 %v12587_v7 }
 0x30d   : > { %2643 = vmatprep.mubr.bf16.mxu1 %v12588_v22 }
 0x30e   : > { %3029 = vmatmul.mubr.bf16.gmra.mrb[184].mxu0 %v12677_v31  ;;  %v12618_v31 = vld [vmem:[#allocation3 + $0x234] ss:$8 sps:$4 sm:$0xff]  }
 0x30f   : > { %v11155_v52 = vpop.f32.mrb[64].mxu1  ;;  %3036 = vmatprep.mubr.bf16.mxu0 %v12681_v33 }
 0x310   : > { %v2051_v18 = vmul.f32 %v11155_v52, %v13664_v60  ;;  %v1922_v56 = vpop.f32.mrb[65].mxu1 }
 0x311   : > { %v2049_v55 = vmul.f32 %v1922_v56, %v13664_v60  ;;  %v11156_v21 = vpop.f32.mrb[66].mxu1 }
 0x312   : > { %v2083_v14 = vadd.f32 %v2051_v18, %v13669_v6  ;;  %v2052_v20 = vmul.f32 %v11156_v21, %v13674_v30  ;;  %v1925_v24 = vpop.f32.mrb[67].mxu1 }
 0x313   : > { %v2081_v61 = vadd.f32 %v2049_v55, %v13669_v6  ;;  %v2050_v27 = vmul.f32 %v1925_v24, %v13674_v30 }
 0x314   : > { %v2084_v5 = vadd.f32 %v2052_v20, %v13681_v16  ;;  %2644 = vmatmul.mubr.bf16.gmra.mrb[144].mxu1 %v12590_v63  ;;  %v2115_v2 = vmax.f32 %v2083_v14, 0.0  ;;  %v12608_v20 = vld [vmem:[#allocation3 + $0x210] ss:$8 sps:$4 sm:$0xff]  }
 0x315   : > { %v2082_v43 = vadd.f32 %v2050_v27, %v13681_v16  ;;  %2651 = vmatprep.mubr.bf16.mxu1 %v12591_v23  ;;  %v2113_v40 = vmax.f32 %v2081_v61, 0.0  ;;  %v12612_v61 = vld [vmem:[#allocation3 + $0x224] ss:$8 sps:$4 sm:$0xff]  }
 0x316   : > { %v2116_v26 = vmax.f32 %v2084_v5, 0.0  ;;  %3037 = vmatmul.mubr.bf16.gmra.mrb[188].mxu0 %v12683_v39 }
 0x317   : > { %v2114_v53 = vmax.f32 %v2082_v43, 0.0 }
 0x318   : > { %v2146_v12 = vpack.c.bf16 %v2116_v26, %v2115_v2 }
 0x319   : > { %v2145_v17 = vpack.c.bf16 %v2114_v53, %v2113_v40 }
 0x31a   : > { %2163 = vst.msk [vmem:[#allocation2 + $0x28] sm:$0xff] %vm392_vm5, %v2146_v12 }
 0x31b   : > { %2162 = vst.msk [vmem:[#allocation2 + $0x20] sm:$0xff] %vm392_vm5, %v2145_v17 }
 0x31c   : > { %2652 = vmatmul.mubr.bf16.gmra.mrb[148].mxu1 %v12593_v54 }
 0x31d   : > { %2659 = vmatprep.mubr.bf16.mxu1 %v12594_v58 }
 0x31f   : > { %v11159_v49 = vpop.f32.mrb[68].mxu1 }
 0x320   : > { %v2055_v0 = vmul.f32 %v11159_v49, %v13664_v60  ;;  %v1938_v8 = vpop.f32.mrb[69].mxu1 }
 0x321   : > { %v2053_v25 = vmul.f32 %v1938_v8, %v13664_v60  ;;  %v11160_v4 = vpop.f32.mrb[70].mxu1 }
 0x322   : > { %v2087_v19 = vadd.f32 %v2055_v0, %v13669_v6  ;;  %v2056_v1 = vmul.f32 %v11160_v4, %v13674_v30  ;;  %v1941_v15 = vpop.f32.mrb[71].mxu1 }
 0x323   : > { %v2085_v51 = vadd.f32 %v2053_v25, %v13669_v6  ;;  %v2054_v32 = vmul.f32 %v1941_v15, %v13674_v30  ;;  %v12620_v25 = vld [vmem:[#allocation3 + $0x230] ss:$8 sps:$4 sm:$0xff]  }
 0x324   : > { %v2088_v42 = vadd.f32 %v2056_v1, %v13681_v16  ;;  %2660 = vmatmul.mubr.bf16.gmra.mrb[152].mxu1 %v12596_v29  ;;  %v2119_v38 = vmax.f32 %v2087_v19, 0.0 }
 0x325   : > { %v2086_v35 = vadd.f32 %v2054_v32, %v13681_v16  ;;  %2667 = vmatprep.mubr.bf16.mxu1 %v12597_v57  ;;  %v2117_v13 = vmax.f32 %v2085_v51, 0.0  ;;  %v12624_v57 = vld [vmem:[#allocation3 + $0x244] ss:$8 sps:$4 sm:$0xff]   ;;  %v12626_v51 = vld [vmem:[#allocation3 + $0x240] ss:$8 sps:$4 sm:$0xff]  }
 0x326   : > { %v2120_v62 = vmax.f32 %v2088_v42, 0.0 }
 0x327   : > { %v2118_v10 = vmax.f32 %v2086_v35, 0.0  ;;  %v12630_v35 = vld [vmem:[#allocation3 + $0x254] ss:$8 sps:$4 sm:$0xff]  }
 0x328   : > { %v2148_v41 = vpack.c.bf16 %v2120_v62, %v2119_v38 }
 0x329   : > { %v2147_v3 = vpack.c.bf16 %v2118_v10, %v2117_v13 }
 0x32a   : > { %2165 = vst.msk [vmem:[#allocation2 + $0x38] sm:$0xff] %vm392_vm5, %v2148_v41 }
 0x32b   : > { %2164 = vst.msk [vmem:[#allocation2 + $0x30] sm:$0xff] %vm392_vm5, %v2147_v3 }
 0x32c   : > { %2668 = vmatmul.mubr.bf16.gmra.mrb[156].mxu1 %v12599_v50 }
 0x32d   : > { %3285 = vmatprep.mubr.bf16.mxu1 %v12602_v11 }
 0x32f   : > { %v11163_v44 = vpop.f32.mrb[72].mxu1 }
 0x330   : > { %v2059_v37 = vmul.f32 %v11163_v44, %v13664_v60  ;;  %v1954_v45 = vpop.f32.mrb[73].mxu1 }
 0x331   : > { %v2057_v48 = vmul.f32 %v1954_v45, %v13664_v60  ;;  %v11164_v9 = vpop.f32.mrb[74].mxu1 }
 0x332   : > { %v2091_v7 = vadd.f32 %v2059_v37, %v13669_v6  ;;  %v2060_v22 = vmul.f32 %v11164_v9, %v13674_v30  ;;  %v1957_v36 = vpop.f32.mrb[75].mxu1  ;;  %v12636_v9 = vld [vmem:[#allocation3 + $0x264] ss:$8 sps:$4 sm:$0xff]  }
 0x333   : > { %v2089_v47 = vadd.f32 %v2057_v48, %v13669_v6  ;;  %v2058_v52 = vmul.f32 %v1957_v36, %v13674_v30  ;;  %v12638_v36 = vld [vmem:[#allocation3 + $0x260] ss:$8 sps:$4 sm:$0xff]  }
 0x334   : > { %v2092_v18 = vadd.f32 %v2060_v22, %v13681_v16  ;;  %3286 = vmatmul.mubr.bf16.vlgmr.msra.gmra.mrb[160].mxu1 %v12600_v46  ;;  %v2123_v63 = vmax.f32 %v2091_v7, 0.0  ;;  %v12632_v46 = vld [vmem:[#allocation3 + $0x250] ss:$8 sps:$4 sm:$0xff]  }
 0x335   : > { %v2090_v56 = vadd.f32 %v2058_v52, %v13681_v16  ;;  %3293 = vmatprep.mubr.bf16.mxu1 %v12606_v59  ;;  %11526 = vmatpush3.bf16.msra.mxu1 %v12690_v34  ;;  %v2121_v21 = vmax.f32 %v2089_v47, 0.0 }
 0x336   : > { %v2124_v55 = vmax.f32 %v2092_v18, 0.0  ;;  %v12642_v18 = vld [vmem:[#allocation3 + $0x274] ss:$8 sps:$4 sm:$0xff]  }
 0x337   : > { %v2122_v23 = vmax.f32 %v2090_v56, 0.0 }
 0x338   : > { %v2150_v14 = vpack.c.bf16 %v2124_v55, %v2123_v63 }
 0x339   : > { %v2149_v24 = vpack.c.bf16 %v2122_v23, %v2121_v21 }
 0x33a   : > { %2167 = vst.msk [vmem:[#allocation2 + $0x48] sm:$0xff] %vm392_vm5, %v2150_v14 }
 0x33b   : > { %2166 = vst.msk [vmem:[#allocation2 + $0x40] sm:$0xff] %vm392_vm5, %v2149_v24 }
 0x33c   : > { %3294 = vmatmul.mubr.bf16.gmra.mrb[164].mxu1 %v12608_v20 }
 0x33d   : > { %3301 = vmatprep.mubr.bf16.mxu1 %v12612_v61 }
 0x33f   : > { %v11167_v27 = vpop.f32.mrb[76].mxu1 }
 0x340   : > { %v2063_v5 = vmul.f32 %v11167_v27, %v13664_v60  ;;  %v1970_v43 = vpop.f32.mrb[77].mxu1 }
 0x341   : > { %v2061_v2 = vmul.f32 %v1970_v43, %v13664_v60  ;;  %v11168_v26 = vpop.f32.mrb[78].mxu1 }
 0x342   : > { %v2095_v40 = vadd.f32 %v2063_v5, %v13669_v6  ;;  %v2064_v53 = vmul.f32 %v11168_v26, %v13674_v30  ;;  %v1973_v12 = vpop.f32.mrb[79].mxu1  ;;  %v12648_v26 = vld [vmem:[#allocation3 + $0x284] ss:$8 sps:$4 sm:$0xff]  }
 0x343   : > { %v2093_v54 = vadd.f32 %v2061_v2, %v13669_v6  ;;  %v2062_v17 = vmul.f32 %v1973_v12, %v13674_v30  ;;  %v12650_v12 = vld [vmem:[#allocation3 + $0x280] ss:$8 sps:$4 sm:$0xff]  }
 0x344   : > { %v2096_v58 = vadd.f32 %v2064_v53, %v13681_v16  ;;  %3302 = vmatmul.mubr.bf16.gmra.mrb[168].mxu1 %v12614_v28  ;;  %v2127_v39 = vmax.f32 %v2095_v40, 0.0  ;;  %v12644_v28 = vld [vmem:[#allocation3 + $0x270] ss:$8 sps:$4 sm:$0xff]  }
 0x345   : > { %v2094_v33 = vadd.f32 %v2062_v17, %v13681_v16  ;;  %3309 = vmatprep.mubr.bf16.mxu1 %v12618_v31  ;;  %v2125_v0 = vmax.f32 %v2093_v54, 0.0 }
 0x346   : > { %v2128_v49 = vmax.f32 %v2096_v58, 0.0  ;;  %v12654_v58 = vld [vmem:[#allocation3 + $0x294] ss:$8 sps:$4 sm:$0xff]  }
 0x347   : > { %v2126_v8 = vmax.f32 %v2094_v33, 0.0 }
 0x348   : > { %v2152_v29 = vpack.c.bf16 %v2128_v49, %v2127_v39 }
 0x349   : > { %v2151_v4 = vpack.c.bf16 %v2126_v8, %v2125_v0 }
 0x34a   : > { %2169 = vst.msk [vmem:[#allocation2 + $0x58] sm:$0xff] %vm392_vm5, %v2152_v29 }
 0x34b   : > { %2168 = vst.msk [vmem:[#allocation2 + $0x50] sm:$0xff] %vm392_vm5, %v2151_v4 }
 0x34c   : > { %3310 = vmatmul.mubr.bf16.gmra.mrb[172].mxu1 %v12620_v25 }
 0x34d   : > { %3317 = vmatprep.mubr.bf16.mxu1 %v12624_v57 }
 0x34f   : > { %v11171_v19 = vpop.f32.mrb[80].mxu1 }
 0x350   : > { %v2067_v1 = vmul.f32 %v11171_v19, %v13664_v60  ;;  %v1986_v15 = vpop.f32.mrb[81].mxu1 }
 0x351   : > { %v2065_v32 = vmul.f32 %v1986_v15, %v13664_v60  ;;  %v11172_v42 = vpop.f32.mrb[82].mxu1 }
 0x352   : > { %v2099_v38 = vadd.f32 %v2067_v1, %v13669_v6  ;;  %v2068_v62 = vmul.f32 %v11172_v42, %v13674_v30  ;;  %v1989_v13 = vpop.f32.mrb[83].mxu1  ;;  %v12660_v42 = vld [vmem:[#allocation3 + $0x2a4] ss:$8 sps:$4 sm:$0xff]  }
 0x353   : > { %v2097_v10 = vadd.f32 %v2065_v32, %v13669_v6  ;;  %v2066_v41 = vmul.f32 %v1989_v13, %v13674_v30  ;;  %v12662_v13 = vld [vmem:[#allocation3 + $0x2a0] ss:$8 sps:$4 sm:$0xff]  }
 0x354   : > { %v2100_v50 = vadd.f32 %v2068_v62, %v13681_v16  ;;  %3318 = vmatmul.mubr.bf16.gmra.mrb[176].mxu1 %v12626_v51  ;;  %v2131_v11 = vmax.f32 %v2099_v38, 0.0  ;;  %v12656_v51 = vld [vmem:[#allocation3 + $0x290] ss:$8 sps:$4 sm:$0xff]  }
 0x355   : > { %v2098_v3 = vadd.f32 %v2066_v41, %v13681_v16  ;;  %3325 = vmatprep.mubr.bf16.mxu1 %v12630_v35  ;;  %v2129_v44 = vmax.f32 %v2097_v10, 0.0 }
 0x356   : > { %v2132_v34 = vmax.f32 %v2100_v50, 0.0  ;;  %v12666_v50 = vld [vmem:[#allocation3 + $0x2b4] ss:$8 sps:$4 sm:$0xff]  }
 0x357   : > { %v2130_v37 = vmax.f32 %v2098_v3, 0.0 }
 0x358   : > { %v2154_v45 = vpack.c.bf16 %v2132_v34, %v2131_v11 }
 0x359   : > { %v2153_v48 = vpack.c.bf16 %v2130_v37, %v2129_v44 }
 0x35a   : > { %2171 = vst.msk [vmem:[#allocation2 + $0xe8] sm:$0xff] %vm392_vm5, %v2154_v45 }
 0x35b   : > { %2170 = vst.msk [vmem:[#allocation2 + $0xe0] sm:$0xff] %vm392_vm5, %v2153_v48 }
 0x35c   : > { %3326 = vmatmul.mubr.bf16.gmra.mrb[180].mxu1 %v12632_v46 }
 0x35d   : > { %3333 = vmatprep.mubr.bf16.mxu1 %v12636_v9 }
 0x35f   : > { %v11175_v59 = vpop.f32.mrb[84].mxu1 }
 0x360   : > { %v2071_v7 = vmul.f32 %v11175_v59, %v13664_v60  ;;  %v2002_v22 = vpop.f32.mrb[85].mxu1 }
 0x361   : > { %v2069_v47 = vmul.f32 %v2002_v22, %v13664_v60  ;;  %v11176_v52 = vpop.f32.mrb[86].mxu1 }
 0x362   : > { %v2103_v56 = vadd.f32 %v2071_v7, %v13669_v6  ;;  %v2072_v63 = vmul.f32 %v11176_v52, %v13674_v30  ;;  %v2005_v55 = vpop.f32.mrb[87].mxu1 }
 0x363   : > { %v2101_v21 = vadd.f32 %v2069_v47, %v13669_v6  ;;  %v2070_v23 = vmul.f32 %v2005_v55, %v13674_v30  ;;  %v12668_v47 = vld [vmem:[#allocation3 + $0x2b0] ss:$8 sps:$4 sm:$0xff]  }
 0x364   : > { %v2104_v14 = vadd.f32 %v2072_v63, %v13681_v16  ;;  %3334 = vmatmul.mubr.bf16.gmra.mrb[184].mxu1 %v12638_v36  ;;  %v2135_v24 = vmax.f32 %v2103_v56, 0.0  ;;  %v12672_v56 = vld [vmem:[#allocation3 + $0x2c4] ss:$8 sps:$4 sm:$0xff]   ;;  %v10632_v63 = vpop.f32.mrb[136].mxu0 }
 0x365   : > { %v2102_v20 = vadd.f32 %v2070_v23, %v13681_v16  ;;  %3341 = vmatprep.mubr.bf16.mxu1 %v12642_v18  ;;  %v2133_v27 = vmax.f32 %v2101_v21, 0.0  ;;  %v10633_v55 = vpop.f32.mrb[137].mxu0 }
 0x366   : > { %v2136_v61 = vmax.f32 %v2104_v14, 0.0  ;;  %v13770_v23 = vadd.f32 %v10633_v55, %v10632_v63  ;;  %v10635_v14 = vpop.f32.mrb[138].mxu0 }
 0x367   : > { %v2134_v5 = vmax.f32 %v2102_v20, 0.0  ;;  %v10636_v20 = vpop.f32.mrb[139].mxu0 }
 0x368   : > { %v2156_v43 = vpack.c.bf16 %v2136_v61, %v2135_v24  ;;  %v13772_v61 = vadd.f32 %v10636_v20, %v10635_v14  ;;  %v6550_v14 = vld [vmem:[#allocation2 + $0x48] sm:$0xff] }
 0x369   : > { %v2155_v2 = vpack.c.bf16 %v2134_v5, %v2133_v27  ;;  %v12674_v5 = vld [vmem:[#allocation3 + $0x2c0] ss:$8 sps:$4 sm:$0xff]  }
 0x36a   : > { %2173 = vst.msk [vmem:[#allocation2 + $0xf8] sm:$0xff] %vm392_vm5, %v2156_v43 }
 0x36b   : > { %2172 = vst.msk [vmem:[#allocation2 + $0xf0] sm:$0xff] %vm392_vm5, %v2155_v2  ;;  %v12678_v2 = vld [vmem:[#allocation3 + $0x2d4] ss:$8 sps:$4 sm:$0xff]  }
 0x36c   : > { %3342 = vmatmul.mubr.bf16.gmra.mrb[188].mxu1 %v12644_v28 }
 0x36d   : > { %3349 = vmatprep.mubr.bf16.mxu1 %v12648_v26 }
 0x36f   : > { %v11179_v31 = vpop.f32.mrb[88].mxu1 }
 0x370   : > { %v2075_v40 = vmul.f32 %v11179_v31, %v13664_v60  ;;  %v2018_v53 = vpop.f32.mrb[89].mxu1 }
 0x371   : > { %v2073_v54 = vmul.f32 %v2018_v53, %v13664_v60  ;;  %v11180_v17 = vpop.f32.mrb[90].mxu1 }
 0x372   : > { %v2107_v33 = vadd.f32 %v2075_v40, %v13669_v6  ;;  %v2076_v39 = vmul.f32 %v11180_v17, %v13674_v30  ;;  %v2021_v49 = vpop.f32.mrb[91].mxu1 }
 0x373   : > { %v2105_v0 = vadd.f32 %v2073_v54, %v13669_v6  ;;  %v2074_v8 = vmul.f32 %v2021_v49, %v13674_v30 }
 0x374   : > { %v2108_v29 = vadd.f32 %v2076_v39, %v13681_v16  ;;  %3350 = vmatmul.mubr.bf16.gmra.mrb[192].mxu1 %v12650_v12  ;;  %v2139_v4 = vmax.f32 %v2107_v33, 0.0 }
 0x375   : > { %v2106_v25 = vadd.f32 %v2074_v8, %v13681_v16  ;;  %3357 = vmatprep.mubr.bf16.mxu1 %v12654_v58  ;;  %v2137_v19 = vmax.f32 %v2105_v0, 0.0  ;;  %v12680_v8 = vld [vmem:[#allocation3 + $0x2d0] ss:$8 sps:$4 sm:$0xff]  }
 0x376   : > { %v2140_v57 = vmax.f32 %v2108_v29, 0.0 }
 0x377   : > { %v2138_v1 = vmax.f32 %v2106_v25, 0.0 }
 0x378   : > { %v2158_v15 = vpack.c.bf16 %v2140_v57, %v2139_v4  ;;  %v12684_v4 = vld [vmem:[#allocation3 + $0x2e4] ss:$8 sps:$4 sm:$0xff]  }
 0x379   : > { %v2157_v32 = vpack.c.bf16 %v2138_v1, %v2137_v19 }
 0x37a   : > { %2175 = vst.msk [vmem:[#allocation2 + $0x108] sm:$0xff] %vm392_vm5, %v2158_v15 }
 0x37b   : > { %2174 = vst.msk [vmem:[#allocation2 + $0x100] sm:$0xff] %vm392_vm5, %v2157_v32 }
 0x37c   : > { %3358 = vmatmul.mubr.bf16.gmra.mrb[196].mxu1 %v12656_v51 }
 0x37d   : > { %3365 = vmatprep.mubr.bf16.mxu1 %v12660_v42 }
 0x37f   : > { %v11183_v35 = vpop.f32.mrb[92].mxu1 }
 0x380   : > { %v2079_v38 = vmul.f32 %v11183_v35, %v13664_v60  ;;  %v2034_v62 = vpop.f32.mrb[93].mxu1 }
 0x381   : > { %v2077_v10 = vmul.f32 %v2034_v62, %v13664_v60  ;;  %v11184_v41 = vpop.f32.mrb[94].mxu1 }
 0x382   : > { %v2111_v3 = vadd.f32 %v2079_v38, %v13669_v6  ;;  %v2080_v11 = vmul.f32 %v11184_v41, %v13674_v30  ;;  %v2037_v34 = vpop.f32.mrb[95].mxu1  ;;  %v12686_v41 = vld [vmem:[#allocation3 + $0x2e0] ss:$8 sps:$4 sm:$0xff]  }
 0x383   : > { %v2109_v44 = vadd.f32 %v2077_v10, %v13669_v6  ;;  %v2078_v37 = vmul.f32 %v2037_v34, %v13674_v30 }
 0x384   : > { %v2112_v45 = vadd.f32 %v2080_v11, %v13681_v16  ;;  %3366 = vmatmul.mubr.bf16.gmra.mrb[200].mxu1 %v12662_v13  ;;  %v2143_v48 = vmax.f32 %v2111_v3, 0.0  ;;  %v12687_v11 = vld [vmem:[#allocation3 + $0x2f4] ss:$8 sps:$4 sm:$0xff]  }
 0x385   : > { %v2110_v46 = vadd.f32 %v2078_v37, %v13681_v16  ;;  %3373 = vmatprep.mubr.bf16.mxu1 %v12666_v50  ;;  %v2141_v60 = vmax.f32 %v2109_v44, 0.0 }
 0x386   : > { %v2144_v9 = vmax.f32 %v2112_v45, 0.0 }
 0x387   : > { %v2142_v59 = vmax.f32 %v2110_v46, 0.0  ;;  %v10508_v7 = vpop.f32.mrb[96].mxu1 }
 0x388   : > { %v2160_v22 = vpack.c.bf16 %v2144_v9, %v2143_v48  ;;  %v10509_v36 = vpop.f32.mrb[97].mxu1 }
 0x389   : > { %v2159_v52 = vpack.c.bf16 %v2142_v59, %v2141_v60  ;;  %v13762_v18 = vadd.f32 %v10509_v36, %v10508_v7  ;;  %v10511_v6 = vpop.f32.mrb[98].mxu1  ;;  %v10638_v53 = vpop.f32.mrb[140].mxu0 }
 0x38a   : > { %2177 = vst.msk [vmem:[#allocation2 + $0x118] sm:$0xff] %vm392_vm5, %v2160_v22  ;;  %v10512_v30 = vpop.f32.mrb[99].mxu1  ;;  %v10639_v12 = vpop.f32.mrb[141].mxu0 }
 0x38b   : > { %2176 = vst.msk [vmem:[#allocation2 + $0x110] sm:$0xff] %vm392_vm5, %v2159_v52  ;;  %v13766_v16 = vadd.f32 %v10512_v30, %v10511_v6  ;;  %v13782_v17 = vadd.f32 %v10639_v12, %v10638_v53  ;;  %v10641_v58 = vpop.f32.mrb[142].mxu0 }
 0x38c   : > { %3374 = vmatmul.mubr.bf16.gmra.mrb[204].mxu1 %v12668_v47  ;;  %v10642_v33 = vpop.f32.mrb[143].mxu0  ;;  %v12689_v47 = vld [vmem:[#allocation3 + $0x2f0] ss:$8 sps:$4 sm:$0xff]  }
 0x38d   : > { %3381 = vmatprep.mubr.bf16.mxu1 %v12672_v56  ;;  %v13784_v49 = vadd.f32 %v10642_v33, %v10641_v58 }
 0x38f   : > { %v10514_v24 = vpop.f32.mrb[100].mxu1 }
 0x390   : > { %v10515_v27 = vpop.f32.mrb[101].mxu1 }
 0x391   : > { %v13774_v43 = vadd.f32 %v10515_v27, %v10514_v24  ;;  %v10517_v28 = vpop.f32.mrb[102].mxu1  ;;  %v10644_v15 = vpop.f32.mrb[144].mxu0 }
 0x392   : > { %v10518_v31 = vpop.f32.mrb[103].mxu1  ;;  %v10645_v51 = vpop.f32.mrb[145].mxu0 }
 0x393   : > { %v13778_v40 = vadd.f32 %v10518_v31, %v10517_v28  ;;  %v13794_v42 = vadd.f32 %v10645_v51, %v10644_v15  ;;  %v10647_v35 = vpop.f32.mrb[146].mxu0 }
 0x394   : > { %3382 = vmatmul.mubr.bf16.gmra.mrb[208].mxu1 %v12674_v5  ;;  %v10648_v38 = vpop.f32.mrb[147].mxu0 }
 0x395   : > { %3389 = vmatprep.mubr.bf16.mxu1 %v12678_v2  ;;  %v13796_v13 = vadd.f32 %v10648_v38, %v10647_v35 }
 0x397   : > { %v10520_v39 = vpop.f32.mrb[104].mxu1 }
 0x398   : > { %v10521_v0 = vpop.f32.mrb[105].mxu1 }
 0x399   : > { %v13786_v29 = vadd.f32 %v10521_v0, %v10520_v39  ;;  %v10523_v25 = vpop.f32.mrb[106].mxu1  ;;  %v10650_v45 = vpop.f32.mrb[148].mxu0 }
 0x39a   : > { %v10524_v19 = vpop.f32.mrb[107].mxu1  ;;  %v10651_v46 = vpop.f32.mrb[149].mxu0 }
 0x39b   : > { %v13790_v1 = vadd.f32 %v10524_v19, %v10523_v25  ;;  %v13806_v9 = vadd.f32 %v10651_v46, %v10650_v45  ;;  %v10653_v60 = vpop.f32.mrb[150].mxu0 }
 0x39c   : > { %3390 = vmatmul.mubr.bf16.gmra.mrb[212].mxu1 %v12680_v8  ;;  %v10654_v59 = vpop.f32.mrb[151].mxu0  ;;  %v6551_v8 = vld [vmem:[#allocation2 + $0x50] sm:$0xff] }
 0x39d   : > { %3397 = vmatprep.mubr.bf16.mxu1 %v12684_v4  ;;  %v13808_v22 = vadd.f32 %v10654_v59, %v10653_v60  ;;  %v6552_v4 = vld [vmem:[#allocation2 + $0x58] sm:$0xff] }
 0x39f   : > { %v10526_v62 = vpop.f32.mrb[108].mxu1 }
 0x3a0   : > { %v10527_v10 = vpop.f32.mrb[109].mxu1 }
 0x3a1   : > { %v13798_v50 = vadd.f32 %v10527_v10, %v10526_v62  ;;  %v10529_v3 = vpop.f32.mrb[110].mxu1  ;;  %v10656_v55 = vpop.f32.mrb[152].mxu0 }
 0x3a2   : > { %v10530_v44 = vpop.f32.mrb[111].mxu1  ;;  %v10657_v20 = vpop.f32.mrb[153].mxu0 }
 0x3a3   : > { %v13802_v37 = vadd.f32 %v10530_v44, %v10529_v3  ;;  %v13819_v27 = vadd.f32 %v10657_v20, %v10656_v55  ;;  %v10659_v5 = vpop.f32.mrb[154].mxu0 }
 0x3a4   : > { %3398 = vmatmul.mubr.bf16.gmra.mrb[216].mxu1 %v12686_v41  ;;  %v10660_v28 = vpop.f32.mrb[155].mxu0 }
 0x3a5   : > { %3405 = vmatprep.mubr.bf16.mxu1 %v12687_v11  ;;  %v13821_v31 = vadd.f32 %v10660_v28, %v10659_v5 }
 0x3a7   : > { %v10532_v7 = vpop.f32.mrb[112].mxu1 }
 0x3a8   : > { %v10533_v36 = vpop.f32.mrb[113].mxu1 }
 0x3a9   : > { %v13810_v52 = vadd.f32 %v10533_v36, %v10532_v7  ;;  %v10535_v6 = vpop.f32.mrb[114].mxu1  ;;  %v10662_v25 = vpop.f32.mrb[156].mxu0  ;;  %v12691_v36 = vld [vmem:[%s15250_s4] sm:$0x1f]  }
 0x3aa   : > { %v10536_v30 = vpop.f32.mrb[115].mxu1  ;;  %v10663_v19 = vpop.f32.mrb[157].mxu0 }
 0x3ab   : > { %v13814_v63 = vadd.f32 %v10536_v30, %v10535_v6  ;;  %v13833_v51 = vadd.f32 %v10663_v19, %v10662_v25  ;;  %v10665_v35 = vpop.f32.mrb[158].mxu0 }
 0x3ac   : > { %3406 = vmatmul.mubr.bf16.gmra.mrb[220].mxu1 %v12689_v47  ;;  %v10666_v38 = vpop.f32.mrb[159].mxu0 }
 0x3ad   : > { %11527 = vmatprep.mubr.msk.bf16.mxu1 %vm392_vm5, %v6550_v14  ;;  %v13835_v10 = vadd.f32 %v10666_v38, %v10665_v35  ;;  %v15411_v14 = vld [vmem:[#allocation19_spill] sm:$0xff] }
 0x3ae   : > { %v3646_v20 = vand.u32 %v12691_v36, %v15411_v14 }
 0x3af   : > { %v10538_v2 = vpop.f32.mrb[116].mxu1 }
 0x3b0   : > { %v10539_v53 = vpop.f32.mrb[117].mxu1  ;;  %11185 = vmatprep.subr.bf16.mxu0 %v3646_v20 }
 0x3b1   : > { %v13823_v12 = vadd.f32 %v10539_v53, %v10538_v2  ;;  %v10541_v58 = vpop.f32.mrb[118].mxu1  ;;  %v10668_v60 = vpop.f32.mrb[160].mxu0  ;;  %11186 = vmatpush3.bf16.msra.mxu0 %v3646_v20 }
 0x3b2   : > { %v10542_v39 = vpop.f32.mrb[119].mxu1  ;;  %v10669_v59 = vpop.f32.mrb[161].mxu0 }
 0x3b3   : > { %v13827_v0 = vadd.f32 %v10542_v39, %v10541_v58  ;;  %v13848_v47 = vadd.f32 %v10669_v59, %v10668_v60  ;;  %v10671_v6 = vpop.f32.mrb[162].mxu0 }
 0x3b4   : > { %11528 = vmatmul.mubr.msk.bf16.vlgmr.msra.gmra.mrb[224].mxu1 %vm392_vm5, %v6551_v8  ;;  %v10672_v30 = vpop.f32.mrb[163].mxu0 }
 0x3b5   : > { %11531 = vmatprep.mubr.msk.bf16.mxu1 %vm392_vm5, %v6552_v4  ;;  %v13851_v5 = vadd.f32 %v10672_v30, %v10671_v6 }
 0x3b7   : > { %v10544_v62 = vpop.f32.mrb[120].mxu1 }
 0x3b8   : > { %v10545_v41 = vpop.f32.mrb[121].mxu1 }
 0x3b9   : > { %v13837_v3 = vadd.f32 %v10545_v41, %v10544_v62  ;;  %v10547_v11 = vpop.f32.mrb[122].mxu1  ;;  %v10674_v25 = vpop.f32.mrb[164].mxu0 }
 0x3ba   : > { %v10548_v45 = vpop.f32.mrb[123].mxu1  ;;  %v10675_v4 = vpop.f32.mrb[165].mxu0 }
 0x3bb   : > { %v13841_v46 = vadd.f32 %v10548_v45, %v10547_v11  ;;  %v13861_v35 = vadd.f32 %v10675_v4, %v10674_v25  ;;  %v10677_v38 = vpop.f32.mrb[166].mxu0 }
 0x3bc   : > { %v10678_v62 = vpop.f32.mrb[167].mxu0 }
 0x3bd   : > { %v13863_v11 = vadd.f32 %v10678_v62, %v10677_v38 }
 0x3bf   : > { %v10550_v55 = vpop.f32.mrb[124].mxu1 }
 0x3c0   : > { %v10551_v28 = vpop.f32.mrb[125].mxu1 }
 0x3c1   : > { %v13853_v2 = vadd.f32 %v10551_v28, %v10550_v55  ;;  %v10553_v53 = vpop.f32.mrb[126].mxu1  ;;  %v10680_v55 = vpop.f32.mrb[168].mxu0 }
 0x3c2   : > { %v10554_v39 = vpop.f32.mrb[127].mxu1  ;;  %v10681_v14 = vpop.f32.mrb[169].mxu0 }
 0x3c3   : > { %v13857_v8 = vadd.f32 %v10554_v39, %v10553_v53  ;;  %v13873_v28 = vadd.f32 %v10681_v14, %v10680_v55  ;;  %v10683_v53 = vpop.f32.mrb[170].mxu0 }
 0x3c4   : > { %v10684_v39 = vpop.f32.mrb[171].mxu0 }
 0x3c5   : > { %v13875_v4 = vadd.f32 %v10684_v39, %v10683_v53 }
 0x3c7   : > { %v10556_v41 = vpop.f32.mrb[128].mxu1 }
 0x3c8   : > { %v10557_v45 = vpop.f32.mrb[129].mxu1 }
 0x3c9   : > { %v13865_v60 = vadd.f32 %v10557_v45, %v10556_v41  ;;  %v10559_v59 = vpop.f32.mrb[130].mxu1  ;;  %v10686_v19 = vpop.f32.mrb[172].mxu0 }
 0x3ca   : > { %v10560_v6 = vpop.f32.mrb[131].mxu1  ;;  %v10687_v7 = vpop.f32.mrb[173].mxu0 }
 0x3cb   : > { %v13869_v30 = vadd.f32 %v10560_v6, %v10559_v59  ;;  %v13885_v14 = vadd.f32 %v10687_v7, %v10686_v19  ;;  %v10689_v20 = vpop.f32.mrb[174].mxu0 }
 0x3cc   : > { %v10690_v53 = vpop.f32.mrb[175].mxu0 }
 0x3cd   : > { %v13887_v15 = vadd.f32 %v10690_v53, %v10689_v20 }
 0x3cf   : > { %v10562_v25 = vpop.f32.mrb[132].mxu1 }
 0x3d0   : > { %v10563_v38 = vpop.f32.mrb[133].mxu1 }
 0x3d1   : > { %v13877_v62 = vadd.f32 %v10563_v38, %v10562_v25  ;;  %v10565_v41 = vpop.f32.mrb[134].mxu1  ;;  %v10692_v32 = vpop.f32.mrb[176].mxu0 }
 0x3d2   : > { %v10566_v59 = vpop.f32.mrb[135].mxu1  ;;  %v10693_v54 = vpop.f32.mrb[177].mxu0 }
 0x3d3   : > { %15412 = vst [vmem:[#allocation35_spill] sm:$0xff] %v13877_v62  ;;  %v13881_v6 = vadd.f32 %v10566_v59, %v10565_v41  ;;  %v13897_v19 = vadd.f32 %v10693_v54, %v10692_v32  ;;  %v10695_v55 = vpop.f32.mrb[178].mxu0 }
 0x3d4   : > { %v10696_v20 = vpop.f32.mrb[179].mxu0 }
 0x3d5   : > { %15413 = vst [vmem:[#allocation10_spill] sm:$0xff] %v13881_v6  ;;  %v13899_v21 = vadd.f32 %v10696_v20, %v10695_v55 }
 0x3d7   : > { %v10568_v39 = vpop.f32.mrb[136].mxu1 }
 0x3d8   : > { %v10569_v25 = vpop.f32.mrb[137].mxu1 }
 0x3d9   : > { %v13889_v38 = vadd.f32 %v10569_v25, %v10568_v39  ;;  %v10571_v24 = vpop.f32.mrb[138].mxu1  ;;  %v10698_v36 = vpop.f32.mrb[180].mxu0 }
 0x3da   : > { %v10572_v59 = vpop.f32.mrb[139].mxu1  ;;  %v10699_v58 = vpop.f32.mrb[181].mxu0 }
 0x3db   : > { %15414 = vst [vmem:[#allocation9_spill] sm:$0xff] %v13889_v38  ;;  %v13893_v48 = vadd.f32 %v10572_v59, %v10571_v24  ;;  %v13909_v32 = vadd.f32 %v10699_v58, %v10698_v36  ;;  %v10701_v7 = vpop.f32.mrb[182].mxu0 }
 0x3dc   : > { %v10702_v55 = vpop.f32.mrb[183].mxu0 }
 0x3dd   : > { %15415 = vst [vmem:[#allocation36_spill] sm:$0xff] %v13893_v48  ;;  %v13911_v44 = vadd.f32 %v10702_v55, %v10701_v7 }
 0x3df   : > { %v10574_v53 = vpop.f32.mrb[140].mxu1 }
 0x3e0   : > { %v10575_v39 = vpop.f32.mrb[141].mxu1 }
 0x3e1   : > { %v13901_v25 = vadd.f32 %v10575_v39, %v10574_v53  ;;  %v10577_v45 = vpop.f32.mrb[142].mxu1  ;;  %v10704_v56 = vpop.f32.mrb[184].mxu0 }
 0x3e2   : > { %v10578_v59 = vpop.f32.mrb[143].mxu1  ;;  %v10705_v34 = vpop.f32.mrb[185].mxu0 }
 0x3e3   : > { %15416 = vst [vmem:[#allocation39_spill] sm:$0xff] %v13901_v25  ;;  %v13905_v41 = vadd.f32 %v10578_v59, %v10577_v45  ;;  %v13921_v36 = vadd.f32 %v10705_v34, %v10704_v56  ;;  %v10707_v54 = vpop.f32.mrb[186].mxu0 }
 0x3e4   : > { %v10708_v7 = vpop.f32.mrb[187].mxu0 }
 0x3e5   : > { %15417 = vst [vmem:[#allocation40_spill] sm:$0xff] %v13905_v41  ;;  %v13923_v57 = vadd.f32 %v10708_v7, %v10707_v54 }
 0x3e7   : > { %v10580_v20 = vpop.f32.mrb[144].mxu1 }
 0x3e8   : > { %v10581_v53 = vpop.f32.mrb[145].mxu1 }
 0x3e9   : > { %v13913_v39 = vadd.f32 %v10581_v53, %v10580_v20  ;;  %v10583_v33 = vpop.f32.mrb[146].mxu1  ;;  %v10710_v25 = vpop.f32.mrb[188].mxu0 }
 0x3ea   : > { %v10584_v59 = vpop.f32.mrb[147].mxu1  ;;  %v10711_v41 = vpop.f32.mrb[189].mxu0 }
 0x3eb   : > { %15418 = vst [vmem:[#allocation41_spill] sm:$0xff] %v13913_v39  ;;  %v13917_v24 = vadd.f32 %v10584_v59, %v10583_v33  ;;  %v13933_v56 = vadd.f32 %v10711_v41, %v10710_v25  ;;  %v10713_v58 = vpop.f32.mrb[190].mxu0 }
 0x3ec   : > { %v10714_v54 = vpop.f32.mrb[191].mxu0 }
 0x3ed   : > { %15419 = vst [vmem:[#allocation12_spill] sm:$0xff] %v13917_v24  ;;  %v13935_v39 = vadd.f32 %v10714_v54, %v10713_v58 }
 0x3ef   : > { %v10586_v55 = vpop.f32.mrb[148].mxu1 }
 0x3f0   : > { %v10587_v20 = vpop.f32.mrb[149].mxu1 }
 0x3f1   : > { %v13925_v53 = vadd.f32 %v10587_v20, %v10586_v55  ;;  %v10589_v26 = vpop.f32.mrb[150].mxu1 }
 0x3f2   : > { %v10590_v59 = vpop.f32.mrb[151].mxu1 }
 0x3f3   : > { %15420 = vst [vmem:[#allocation11_spill] sm:$0xff] %v13925_v53  ;;  %v13929_v45 = vadd.f32 %v10590_v59, %v10589_v26 }
 0x3f5   : > { %15421 = vst [vmem:[#allocation14_spill] sm:$0xff] %v13929_v45 }
 0x3f7   : > { %v10592_v7 = vpop.f32.mrb[152].mxu1 }
 0x3f8   : > { %v10593_v55 = vpop.f32.mrb[153].mxu1 }
 0x3f9   : > { %v13937_v20 = vadd.f32 %v10593_v55, %v10592_v7  ;;  %v10595_v24 = vpop.f32.mrb[154].mxu1 }
 0x3fa   : > { %v10596_v59 = vpop.f32.mrb[155].mxu1 }
 0x3fb   : > { %15422 = vst [vmem:[#allocation13_spill] sm:$0xff] %v13937_v20  ;;  %v13941_v33 = vadd.f32 %v10596_v59, %v10595_v24 }
 0x3fd   : > { %15423 = vst [vmem:[#allocation30_spill] sm:$0xff] %v13941_v33 }
 0x3ff   : > { %v10598_v41 = vpop.f32.mrb[156].mxu1 }
 0x400   : > { %v10599_v25 = vpop.f32.mrb[157].mxu1 }
 0x401   : > { %v13945_v53 = vadd.f32 %v10599_v25, %v10598_v41  ;;  %v10601_v45 = vpop.f32.mrb[158].mxu1 }
 0x402   : > { %v10602_v58 = vpop.f32.mrb[159].mxu1 }
 0x403   : > { %v13947_v54 = vadd.f32 %v10602_v58, %v10601_v45  ;;  %v15424_v45 = vpack.c.bf16 %v13772_v61, %v13770_v23 }
 0x407   : > { %v10732_v55 = vpop.f32.mrb[160].mxu1 }
 0x408   : > { %v10733_v38 = vpop.f32.mrb[161].mxu1 }
 0x409   : > { %v10734_v26 = vadd.f32 %v10733_v38, %v10732_v55  ;;  %v10735_v48 = vpop.f32.mrb[162].mxu1 }
 0x40a   : > { %v10736_v24 = vpop.f32.mrb[163].mxu1 }
 0x40b   : > { %v10737_v59 = vadd.f32 %v10736_v24, %v10735_v48 }
 0x40d   : > { %v3414_v62 = vpack.c.bf16 %v10737_v59, %v10734_v26 }
 0x40f   : > { %v10738_v6 = vpop.f32.mrb[164].mxu1  ;;  %3494 = vrot.lane.b32.xlu0 %v3414_v62, %s12818_s26  ;;  %v15425_v62 = vpack.c.bf16 %v13784_v49, %v13782_v17 }
 0x410   : > { %v10739_v34 = vpop.f32.mrb[165].mxu1 }
 0x411   : > { %v10740_v41 = vadd.f32 %v10739_v34, %v10738_v6  ;;  %v10741_v25 = vpop.f32.mrb[166].mxu1 }
 0x412   : > { %v10742_v20 = vpop.f32.mrb[167].mxu1 }
 0x413   : > { %v10743_v33 = vadd.f32 %v10742_v20, %v10741_v25  ;;  %3450 = vrot.lane.b32.xlu0 %v15424_v45, %s12816_s21 }
 0x415   : > { %v3415_v58 = vpack.c.bf16 %v10743_v33, %v10740_v41 }
 0x417   : > { %v10744_v7 = vpop.f32.mrb[168].mxu1  ;;  %3496 = vrot.lane.b32.xlu1 %v3415_v58, %s12818_s26 }
 0x418   : > { %v10745_v38 = vpop.f32.mrb[169].mxu1 }
 0x419   : > { %v10746_v48 = vadd.f32 %v10745_v38, %v10744_v7  ;;  %v10747_v26 = vpop.f32.mrb[170].mxu1  ;;  %v15426_v7 = vpack.c.bf16 %v13796_v13, %v13794_v42 }
 0x41a   : > { %v10748_v55 = vpop.f32.mrb[171].mxu1 }
 0x41b   : > { %v10749_v24 = vadd.f32 %v10748_v55, %v10747_v26  ;;  %3452 = vrot.lane.b32.xlu1 %v15425_v62, %s12816_s21 }
 0x41d   : > { %v3416_v6 = vpack.c.bf16 %v10749_v24, %v10746_v48  ;;  %v15427_v48 = vpack.c.bf16 %v13808_v22, %v13806_v9 }
 0x41f   : > { %v10750_v34 = vpop.f32.mrb[172].mxu1  ;;  %3498 = vrot.lane.b32.xlu0 %v3416_v6, %s12818_s26 }
 0x420   : > { %v10751_v23 = vpop.f32.mrb[173].mxu1 }
 0x421   : > { %v10752_v61 = vadd.f32 %v10751_v23, %v10750_v34  ;;  %v10753_v33 = vpop.f32.mrb[174].mxu1  ;;  %v15428_v34 = vpack.c.bf16 %v13821_v31, %v13819_v27 }
 0x422   : > { %v10754_v20 = vpop.f32.mrb[175].mxu1 }
 0x423   : > { %v10755_v59 = vadd.f32 %v10754_v20, %v10753_v33  ;;  %3454 = vrot.lane.b32.xlu0 %v15426_v7, %s12816_s21  ;;  %v15429_v7 = vpack.c.bf16 %v13835_v10, %v13833_v51 }
 0x425   : > { %v3417_v41 = vpack.c.bf16 %v10755_v59, %v10752_v61 }
 0x427   : > { %v10756_v25 = vpop.f32.mrb[176].mxu1  ;;  %3500 = vrot.lane.b32.xlu1 %v3417_v41, %s12818_s26 }
 0x428   : > { %v10757_v17 = vpop.f32.mrb[177].mxu1 }
 0x429   : > { %v10758_v49 = vadd.f32 %v10757_v17, %v10756_v25  ;;  %v10759_v45 = vpop.f32.mrb[178].mxu1 }
 0x42a   : > { %v10760_v58 = vpop.f32.mrb[179].mxu1 }
 0x42b   : > { %v10761_v38 = vadd.f32 %v10760_v58, %v10759_v45  ;;  %3456 = vrot.lane.b32.xlu1 %v15427_v48, %s12816_s21  ;;  %v15430_v58 = vpack.c.bf16 %v13851_v5, %v13848_v47 }
 0x42d   : > { %v3418_v26 = vpack.c.bf16 %v10761_v38, %v10758_v49 }
 0x42f   : > { %v10762_v55 = vpop.f32.mrb[180].mxu1  ;;  %3502 = vrot.lane.b32.xlu0 %v3418_v26, %s12818_s26 }
 0x430   : > { %v10763_v42 = vpop.f32.mrb[181].mxu1 }
 0x431   : > { %v10764_v13 = vadd.f32 %v10763_v42, %v10762_v55  ;;  %v10765_v24 = vpop.f32.mrb[182].mxu1 }
 0x432   : > { %v10766_v62 = vpop.f32.mrb[183].mxu1 }
 0x433   : > { %v10767_v6 = vadd.f32 %v10766_v62, %v10765_v24  ;;  %3458 = vrot.lane.b32.xlu0 %v15428_v34, %s12816_s21 }
 0x435   : > { %v3419_v23 = vpack.c.bf16 %v10767_v6, %v10764_v13  ;;  %v15431_v13 = vpack.c.bf16 %v13863_v11, %v13861_v35 }
 0x437   : > { %v10768_v61 = vpop.f32.mrb[184].mxu1  ;;  %3504 = vrot.lane.b32.xlu1 %v3419_v23, %s12818_s26 }
 0x438   : > { %v10769_v9 = vpop.f32.mrb[185].mxu1 }
 0x439   : > { %v10770_v22 = vadd.f32 %v10769_v9, %v10768_v61  ;;  %v10771_v33 = vpop.f32.mrb[186].mxu1  ;;  %v15432_v61 = vpack.c.bf16 %v13875_v4, %v13873_v28 }
 0x43a   : > { %v10772_v20 = vpop.f32.mrb[187].mxu1 }
 0x43b   : > { %v10773_v59 = vadd.f32 %v10772_v20, %v10771_v33  ;;  %3460 = vrot.lane.b32.xlu1 %v15429_v7, %s12816_s21  ;;  %v15433_v7 = vpack.c.bf16 %v13887_v15, %v13885_v14 }
 0x43d   : > { %v3420_v41 = vpack.c.bf16 %v10773_v59, %v10770_v22 }
 0x43f   : > { %v10774_v25 = vpop.f32.mrb[188].mxu1  ;;  %3506 = vrot.lane.b32.xlu0 %v3420_v41, %s12818_s26 }
 0x440   : > { %v10775_v27 = vpop.f32.mrb[189].mxu1 }
 0x441   : > { %v10776_v31 = vadd.f32 %v10775_v27, %v10774_v25  ;;  %v10777_v17 = vpop.f32.mrb[190].mxu1 }
 0x442   : > { %v10778_v49 = vpop.f32.mrb[191].mxu1 }
 0x443   : > { %v10779_v45 = vadd.f32 %v10778_v49, %v10777_v17  ;;  %3462 = vrot.lane.b32.xlu0 %v15430_v58, %s12816_s21  ;;  %v15434_v49 = vpack.c.bf16 %v13899_v21, %v13897_v19 }
 0x445   : > { %v3421_v38 = vpack.c.bf16 %v10779_v45, %v10776_v31 }
 0x447   : > { %v10780_v48 = vpop.f32.mrb[192].mxu1  ;;  %3508 = vrot.lane.b32.xlu1 %v3421_v38, %s12818_s26 }
 0x448   : > { %v10781_v51 = vpop.f32.mrb[193].mxu1 }
 0x449   : > { %v10782_v10 = vadd.f32 %v10781_v51, %v10780_v48  ;;  %v10783_v26 = vpop.f32.mrb[194].mxu1 }
 0x44a   : > { %v10784_v55 = vpop.f32.mrb[195].mxu1 }
 0x44b   : > { %v10785_v42 = vadd.f32 %v10784_v55, %v10783_v26  ;;  %3464 = vrot.lane.b32.xlu1 %v15431_v13, %s12816_s21 }
 0x44d   : > { %v3422_v24 = vpack.c.bf16 %v10785_v42, %v10782_v10  ;;  %v15435_v10 = vpack.c.bf16 %v13911_v44, %v13909_v32 }
 0x44f   : > { %v10786_v62 = vpop.f32.mrb[196].mxu1  ;;  %3510 = vrot.lane.b32.xlu0 %v3422_v24, %s12818_s26 }
 0x450   : > { %v10787_v47 = vpop.f32.mrb[197].mxu1 }
 0x451   : > { %v10788_v5 = vadd.f32 %v10787_v47, %v10786_v62  ;;  %v10789_v6 = vpop.f32.mrb[198].mxu1  ;;  %v15436_v62 = vpack.c.bf16 %v13923_v57, %v13921_v36  ;;  %v15437_v36 = vpack.c.bf16 %v13935_v39, %v13933_v56 }
 0x452   : > { %v10790_v34 = vpop.f32.mrb[199].mxu1 }
 0x453   : > { %v10791_v23 = vadd.f32 %v10790_v34, %v10789_v6  ;;  %3466 = vrot.lane.b32.xlu0 %v15432_v61, %s12816_s21  ;;  %v12692_v61 = vld [vmem:[%s15253_s7 + $0x8] sm:$0xff]  }
 0x454   : > { %11219 = vmatprep.subr.bf16.mxu0 %v12692_v61 }
 0x455   : > { %v3423_v9 = vpack.c.bf16 %v10791_v23, %v10788_v5  ;;  %v12819_v23 = vmov 0  }
 0x456   : > { %394 = vst.msk [vmem:[#allocation2 + $0x8] sm:$0xff] %vm392_vm5, %v12819_v23  ;;  %393 = vst.msk [vmem:[#allocation2] sm:$0xff] %vm392_vm5, %v12819_v23 }
 0x457   : > { %v10792_v22 = vpop.f32.mrb[200].mxu1  ;;  %3512 = vrot.lane.b32.xlu1 %v3423_v9, %s12818_s26  ;;  %395 = vst.msk [vmem:[#allocation2 + $0x10] sm:$0xff] %vm392_vm5, %v12819_v23  ;;  %396 = vst.msk [vmem:[#allocation2 + $0x18] sm:$0xff] %vm392_vm5, %v12819_v23  ;;  %v3447_v9 = vpop.permute.xlu0 %3446 }
 0x458   : > { %v10793_v35 = vpop.f32.mrb[201].mxu1  ;;  %397 = vst.msk [vmem:[#allocation2 + $0xc0] sm:$0xff] %vm392_vm5, %v12819_v23  ;;  %398 = vst.msk [vmem:[#allocation2 + $0xc8] sm:$0xff] %vm392_vm5, %v12819_v23 }
 0x459   : > { %v10794_v11 = vadd.f32 %v10793_v35, %v10792_v22  ;;  %v10795_v33 = vpop.f32.mrb[202].mxu1  ;;  %399 = vst.msk [vmem:[#allocation2 + $0xd0] sm:$0xff] %vm392_vm5, %v12819_v23  ;;  %400 = vst.msk [vmem:[#allocation2 + $0xd8] sm:$0xff] %vm392_vm5, %v12819_v23 }
 0x45a   : > { %v10796_v20 = vpop.f32.mrb[203].mxu1  ;;  %402 = vst.msk [vmem:[#allocation2 + $0xa0] sm:$0xff] %vm392_vm5, %v12819_v23  ;;  %403 = vst.msk [vmem:[#allocation2 + $0xa8] sm:$0xff] %vm392_vm5, %v12819_v23 }
 0x45b   : > { %v10797_v59 = vadd.f32 %v10796_v20, %v10795_v33  ;;  %3468 = vrot.lane.b32.xlu1 %v15433_v7, %s12816_s21  ;;  %404 = vst.msk [vmem:[#allocation2 + $0xb0] sm:$0xff] %vm392_vm5, %v12819_v23  ;;  %405 = vst.msk [vmem:[#allocation2 + $0xb8] sm:$0xff] %vm392_vm5, %v12819_v23  ;;  %v15438_v33 = vpack.c.bf16 %v13766_v16, %v13762_v18 }
 0x45c   : > { %406 = vst.msk [vmem:[#allocation2 + $0x160] sm:$0xff] %vm392_vm5, %v12819_v23  ;;  %407 = vst.msk [vmem:[#allocation2 + $0x168] sm:$0xff] %vm392_vm5, %v12819_v23 }
 0x45d   : > { %v3424_v41 = vpack.c.bf16 %v10797_v59, %v10794_v11  ;;  %408 = vst.msk [vmem:[#allocation2 + $0x170] sm:$0xff] %vm392_vm5, %v12819_v23  ;;  %409 = vst.msk [vmem:[#allocation2 + $0x178] sm:$0xff] %vm392_vm5, %v12819_v23  ;;  %v3528_v20 = vsel %vm1759_vm2, %v15438_v33, %v3447_v9  ;;  %v15448_v23 = vld [vmem:[#allocation35_spill] sm:$0xff] }
 0x45f   : > { %v10798_v25 = vpop.f32.mrb[204].mxu1  ;;  %3514 = vrot.lane.b32.xlu0 %v3424_v41, %s12818_s26 }
 0x460   : > { %v10799_v28 = vpop.f32.mrb[205].mxu1 }
 0x461   : > { %v10800_v4 = vadd.f32 %v10799_v28, %v10798_v25  ;;  %v10801_v27 = vpop.f32.mrb[206].mxu1  ;;  %v3449_v28 = vpop.permute.xlu1 %3448 }
 0x462   : > { %v10802_v31 = vpop.f32.mrb[207].mxu1 }
 0x463   : > { %v10803_v17 = vadd.f32 %v10802_v31, %v10801_v27  ;;  %3470 = vrot.lane.b32.xlu0 %v15434_v49, %s12816_s21  ;;  %v15439_v27 = vpack.c.bf16 %v13778_v40, %v13774_v43  ;;  %v15440_v49 = vpack.c.bf16 %v13790_v1, %v13786_v29  ;;  %v15441_v40 = vpack.c.bf16 %v13802_v37, %v13798_v50 }
 0x464   : > { %v15442_v29 = vpack.c.bf16 %v13814_v63, %v13810_v52  ;;  %v15443_v50 = vpack.c.bf16 %v13827_v0, %v13823_v12  ;;  %v15444_v52 = vpack.c.bf16 %v13841_v46, %v13837_v3  ;;  %v15445_v12 = vpack.c.bf16 %v13857_v8, %v13853_v2  ;;  %v12693_v3 = vld [vmem:[%s15253_s7] sm:$0xff]  }
 0x465   : > { %v3425_v45 = vpack.c.bf16 %v10803_v17, %v10800_v4  ;;  %v3531_v18 = vsel %vm1759_vm2, %v15439_v27, %v3449_v28  ;;  %v15456_v27 = vld [vmem:[#allocation12_spill] sm:$0xff] }
 0x467   : > { %v10804_v58 = vpop.f32.mrb[208].mxu1  ;;  %3516 = vrot.lane.b32.xlu1 %v3425_v45, %s12818_s26 }
 0x468   : > { %v10805_v15 = vpop.f32.mrb[209].mxu1 }
 0x469   : > { %v10806_v14 = vadd.f32 %v10805_v15, %v10804_v58  ;;  %v10807_v38 = vpop.f32.mrb[210].mxu1 }
 0x46a   : > { %v10808_v48 = vpop.f32.mrb[211].mxu1 }
 0x46b   : > { %v10809_v51 = vadd.f32 %v10808_v48, %v10807_v38  ;;  %3472 = vrot.lane.b32.xlu1 %v15435_v10, %s12816_s21 }
 0x46d   : > { %v3426_v26 = vpack.c.bf16 %v10809_v51, %v10806_v14 }
 0x46f   : > { %v10810_v55 = vpop.f32.mrb[212].mxu1  ;;  %3518 = vrot.lane.b32.xlu0 %v3426_v26, %s12818_s26 }
 0x470   : > { %v10811_v21 = vpop.f32.mrb[213].mxu1 }
 0x471   : > { %v10812_v19 = vadd.f32 %v10811_v21, %v10810_v55  ;;  %v10813_v42 = vpop.f32.mrb[214].mxu1 }
 0x472   : > { %v10814_v13 = vpop.f32.mrb[215].mxu1 }
 0x473   : > { %v10815_v24 = vadd.f32 %v10814_v13, %v10813_v42  ;;  %3474 = vrot.lane.b32.xlu0 %v15436_v62, %s12816_s21 }
 0x475   : > { %v3427_v47 = vpack.c.bf16 %v10815_v24, %v10812_v19 }
 0x477   : > { %v10816_v5 = vpop.f32.mrb[216].mxu1  ;;  %3520 = vrot.lane.b32.xlu1 %v3427_v47, %s12818_s26 }
 0x478   : > { %v10817_v44 = vpop.f32.mrb[217].mxu1 }
 0x479   : > { %v10818_v32 = vadd.f32 %v10817_v44, %v10816_v5  ;;  %v10819_v6 = vpop.f32.mrb[218].mxu1  ;;  %v15446_v44 = vpack.c.bf16 %v13869_v30, %v13865_v60  ;;  %v15450_v60 = vld [vmem:[#allocation36_spill] sm:$0xff]  ;;  %v15451_v30 = vld [vmem:[#allocation9_spill] sm:$0xff] }
 0x47a   : > { %v10820_v34 = vpop.f32.mrb[219].mxu1 }
 0x47b   : > { %v10821_v57 = vadd.f32 %v10820_v34, %v10819_v6  ;;  %3476 = vrot.lane.b32.xlu1 %v15437_v36, %s12816_s21  ;;  %v15447_v34 = vld [vmem:[#allocation10_spill] sm:$0xff] }
 0x47d   : > { %v3428_v22 = vpack.c.bf16 %v10821_v57, %v10818_v32  ;;  %v15449_v57 = vpack.c.bf16 %v15447_v34, %v15448_v23  ;;  %v14201_v34 = vld [vmem:[#allocation2 + $0x100] sm:$0xff]  ;;  %v14209_v23 = vld [vmem:[%s15253_s7 + $0x18] sm:$0xff]  }
 0x47f   : > { %v10822_v35 = vpop.f32.mrb[220].mxu1  ;;  %3522 = vrot.lane.b32.xlu0 %v3428_v22, %s12818_s26 }
 0x480   : > { %v10823_v11 = vpop.f32.mrb[221].mxu1 }
 0x481   : > { %v10824_v59 = vadd.f32 %v10823_v11, %v10822_v35  ;;  %v10825_v7 = vpop.f32.mrb[222].mxu1  ;;  %v3495_v39 = vpop.permute.xlu0 %3494  ;;  %v15452_v35 = vpack.c.bf16 %v15450_v60, %v15451_v30 }
 0x482   : > { %v3575_v56 = vsel %vm1808_vm3, %v3528_v20, %v3495_v39  ;;  %v10826_v41 = vpop.f32.mrb[223].mxu1  ;;  %v15454_v39 = vld [vmem:[#allocation39_spill] sm:$0xff] }
 0x483   : > { %v10827_v25 = vadd.f32 %v10826_v41, %v10825_v7  ;;  %11187 = vmatprep.mubr.msk.bf16.mxu0 %vm1848_vm4, %v3575_v56  ;;  %v15453_v7 = vld [vmem:[#allocation40_spill] sm:$0xff] }
 0x484   : > { %v15455_v56 = vpack.c.bf16 %v15453_v7, %v15454_v39 }
 0x485   : > { %v3429_v4 = vpack.c.bf16 %v10827_v25, %v10824_v59  ;;  %v3451_v17 = vpop.permute.xlu0 %3450 }
 0x486   : > { %v3534_v45 = vsel %vm1759_vm2, %v15440_v49, %v3451_v17 }
 0x487   : > { %3524 = vrot.lane.b32.xlu1 %v3429_v4, %s12818_s26  ;;  %s15193_s26 = scalar_lea.hbm %s15256_s10, %s9979_s29 }
 0x489   : > { %v3497_v16 = vpop.permute.xlu1 %3496 }
 0x48a   : > { %v3577_v31 = vsel %vm1808_vm3, %v3531_v18, %v3497_v16  ;;  %v15457_v18 = vld [vmem:[#allocation41_spill] sm:$0xff] }
 0x48b   : > { %11188 = vmatmul.mubr.msk.bf16.vlgmr.msra.gmra.mrb[192].mxu0 %vm1848_vm4, %v3577_v31  ;;  %v15458_v16 = vpack.c.bf16 %v15456_v27, %v15457_v18 }
 0x48c   : > { %11220 = vmatpush3.bf16.msra.mxu0 %v12692_v61 }
 0x48d   : > { %v3453_v43 = vpop.permute.xlu1 %3452  ;;  %11253 = vmatprep.subr.bf16.mxu0 %v12693_v3 }
 0x48e   : > { %v3537_v14 = vsel %vm1759_vm2, %v15441_v40, %v3453_v43 }
 0x491   : > { %v3499_v58 = vpop.permute.xlu0 %3498 }
 0x492   : > { %v3579_v15 = vsel %vm1808_vm3, %v3534_v45, %v3499_v58  ;;  %v15459_v58 = vld [vmem:[#allocation14_spill] sm:$0xff] }
 0x493   : > { %11191 = vmatprep.mubr.msk.bf16.mxu0 %vm1848_vm4, %v3579_v15  ;;  %v15460_v15 = vld [vmem:[#allocation11_spill] sm:$0xff] }
 0x494   : > { %v15461_v43 = vpack.c.bf16 %v15459_v58, %v15460_v15 }
 0x495   : > { %v3455_v51 = vpop.permute.xlu0 %3454 }
 0x496   : > { %v3540_v1 = vsel %vm1759_vm2, %v15442_v29, %v3455_v51  ;;  %v15462_v51 = vld [vmem:[#allocation30_spill] sm:$0xff]  ;;  %v15463_v29 = vld [vmem:[#allocation13_spill] sm:$0xff] }
 0x499   : > { %v3501_v38 = vpop.permute.xlu1 %3500 }
 0x49a   : > { %v3581_v48 = vsel %vm1808_vm3, %v3537_v14, %v3501_v38 }
 0x49b   : > { %11192 = vmatmul.mubr.msk.bf16.gmra.mrb[196].mxu0 %vm1848_vm4, %v3581_v48 }
 0x49d   : > { %v3457_v55 = vpop.permute.xlu1 %3456 }
 0x49e   : > { %v3543_v37 = vsel %vm1759_vm2, %v15443_v50, %v3457_v55 }
 0x4a1   : > { %v3503_v10 = vpop.permute.xlu0 %3502 }
 0x4a2   : > { %v3583_v26 = vsel %vm1808_vm3, %v3540_v1, %v3503_v10  ;;  %v15464_v1 = vpack.c.bf16 %v15462_v51, %v15463_v29 }
 0x4a3   : > { %11195 = vmatprep.mubr.msk.bf16.mxu0 %vm1848_vm4, %v3583_v26 }
 0x4a5   : > { %v3459_v42 = vpop.permute.xlu0 %3458 }
 0x4a6   : > { %v3546_v63 = vsel %vm1759_vm2, %v15444_v52, %v3459_v42  ;;  %v3957_v42 = vld [vmem:[#allocation2 + $0x8] sm:$0xff] }
 0x4a9   : > { %v3505_v21 = vpop.permute.xlu1 %3504 }
 0x4aa   : > { %v3585_v19 = vsel %vm1808_vm3, %v3543_v37, %v3505_v21  ;;  %v15465_v37 = vpack.c.bf16 %v13947_v54, %v13945_v53  ;;  %v14153_v53 = vld [vmem:[#allocation2 + $0x20] sm:$0xff]  ;;  %v14157_v54 = vld [vmem:[#allocation2 + $0x28] sm:$0xff] }
 0x4ab   : > { %11196 = vmatmul.mubr.msk.bf16.gmra.mrb[200].mxu0 %vm1848_vm4, %v3585_v19 }
 0x4ad   : > { %v3461_v62 = vpop.permute.xlu1 %3460 }
 0x4ae   : > { %v3549_v0 = vsel %vm1759_vm2, %v15445_v12, %v3461_v62  ;;  %v14161_v62 = vld [vmem:[#allocation2 + $0x30] sm:$0xff]  ;;  %v14165_v12 = vld [vmem:[#allocation2 + $0x38] sm:$0xff] }
 0x4b1   : > { %v3507_v13 = vpop.permute.xlu0 %3506 }
 0x4b2   : > { %v3587_v24 = vsel %vm1808_vm3, %v3546_v63, %v3507_v13  ;;  %v14142_v63 = vld [vmem:[#allocation2 + $0x10] sm:$0xff]  ;;  %v14144_v13 = vld [vmem:[#allocation2 + $0x18] sm:$0xff] }
 0x4b3   : > { %11199 = vmatprep.mubr.msk.bf16.mxu0 %vm1848_vm4, %v3587_v24  ;;  %v12694_v24 = vld [vmem:[%s15253_s7 + $0x10] sm:$0xff]  }
 0x4b5   : > { %v3463_v46 = vpop.permute.xlu0 %3462 }
 0x4b6   : > { %v3552_v32 = vsel %vm1759_vm2, %v15446_v44, %v3463_v46  ;;  %v14179_v46 = vld [vmem:[#allocation2 + $0xd8] sm:$0xff]  ;;  %v14185_v44 = vld [vmem:[#allocation2 + $0xe0] sm:$0xff] }
 0x4b9   : > { %v3509_v47 = vpop.permute.xlu1 %3508 }
 0x4ba   : > { %v3589_v5 = vsel %vm1808_vm3, %v3549_v0, %v3509_v47  ;;  %v3965_v0 = vld [vmem:[#allocation2 + $0xc8] sm:$0xff]  ;;  %v14169_v47 = vld [vmem:[#allocation2 + $0x40] sm:$0xff] }
 0x4bb   : > { %11200 = vmatmul.mubr.msk.bf16.gmra.mrb[204].mxu0 %vm1848_vm4, %v3589_v5  ;;  %v12695_v5 = vld [vmem:[%s15253_s7] sm:$0xff]  }
 0x4bc   : > { %11559 = vmatprep.subr.bf16.mxu1 %v12695_v5 }
 0x4bd   : > { %v3465_v8 = vpop.permute.xlu1 %3464  ;;  %11560 = vmatpush3.bf16.msra.mxu1 %v12695_v5 }
 0x4be   : > { %v3555_v36 = vsel %vm1759_vm2, %v15449_v57, %v3465_v8  ;;  %v3938_v8 = vld [vmem:[#allocation2] sm:$0xff] }
 0x4bf   : > { %v3946_v57 = vld [vmem:[#allocation2 + $0xc0] sm:$0xff] }
 0x4c1   : > { %v3511_v6 = vpop.permute.xlu0 %3510 }
 0x4c2   : > { %v3591_v2 = vsel %vm1808_vm3, %v3552_v32, %v3511_v6  ;;  %v14189_v32 = vld [vmem:[#allocation2 + $0xe8] sm:$0xff]  ;;  %v14193_v6 = vld [vmem:[#allocation2 + $0xf0] sm:$0xff] }
 0x4c3   : > { %11203 = vmatprep.mubr.msk.bf16.mxu0 %vm1848_vm4, %v3591_v2  ;;  %v14197_v2 = vld [vmem:[#allocation2 + $0xf8] sm:$0xff] }
 0x4c5   : > { %v3467_v22 = vpop.permute.xlu0 %3466 }
 0x4c6   : > { %v3558_v11 = vsel %vm1759_vm2, %v15452_v35, %v3467_v22 }
 0x4c9   : > { %v3513_v61 = vpop.permute.xlu1 %3512 }
 0x4ca   : > { %v3593_v9 = vsel %vm1808_vm3, %v3555_v36, %v3513_v61  ;;  %v14226_v36 = vld [vmem:[%s15253_s7 + $0x10] sm:$0xff]  }
 0x4cb   : > { %11204 = vmatmul.mubr.msk.bf16.gmra.mrb[208].mxu0 %vm1848_vm4, %v3593_v9  ;;  %11593 = vmatprep.subr.bf16.mxu1 %v14226_v36  ;;  %v14235_v9 = vld [vmem:[%s15251_s5] sm:$0xff] }
 0x4cd   : > { %v3469_v59 = vpop.permute.xlu1 %3468 }
 0x4ce   : > { %v3561_v41 = vsel %vm1759_vm2, %v15455_v56, %v3469_v59 }
 0x4d1   : > { %v3515_v33 = vpop.permute.xlu0 %3514 }
 0x4d2   : > { %v3595_v20 = vsel %vm1808_vm3, %v3558_v11, %v3515_v33  ;;  %v14242_v11 = vld [vmem:[%s15252_s6] sm:$0xff] }
 0x4d3   : > { %11207 = vmatprep.mubr.msk.bf16.mxu0 %vm1848_vm4, %v3595_v20  ;;  %v14248_v20 = vld [vmem:[%s15251_s5 + $0x8] sm:$0xff] }
 0x4d5   : > { %v3471_v4 = vpop.permute.xlu0 %3470 }
 0x4d6   : > { %v3564_v31 = vsel %vm1759_vm2, %v15458_v16, %v3471_v4 }
 0x4d9   : > { %v3517_v25 = vpop.permute.xlu1 %3516 }
 0x4da   : > { %v3597_v28 = vsel %vm1808_vm3, %v3561_v41, %v3517_v25  ;;  %v14256_v41 = vld [vmem:[%s15252_s6 + $0x8] sm:$0xff] }
 0x4db   : > { %11208 = vmatmul.mubr.msk.bf16.gmra.mrb[212].mxu0 %vm1848_vm4, %v3597_v28 }
 0x4dd   : > { %v3473_v45 = vpop.permute.xlu1 %3472 }
 0x4de   : > { %v3567_v40 = vsel %vm1759_vm2, %v15461_v43, %v3473_v45 }
 0x4e1   : > { %v3519_v17 = vpop.permute.xlu0 %3518 }
 0x4e2   : > { %v3599_v49 = vsel %vm1808_vm3, %v3564_v31, %v3519_v17 }
 0x4e3   : > { %11211 = vmatprep.mubr.msk.bf16.mxu0 %vm1848_vm4, %v3599_v49 }
 0x4e5   : > { %v3475_v48 = vpop.permute.xlu0 %3474 }
 0x4e6   : > { %v3570_v10 = vsel %vm1759_vm2, %v15464_v1, %v3475_v48 }
 0x4e9   : > { %v3521_v14 = vpop.permute.xlu1 %3520 }
 0x4ea   : > { %v3601_v38 = vsel %vm1808_vm3, %v3567_v40, %v3521_v14 }
 0x4eb   : > { %11212 = vmatmul.mubr.msk.bf16.gmra.mrb[216].mxu0 %vm1848_vm4, %v3601_v38 }
 0x4ed   : > { %v3477_v50 = vpop.permute.xlu1 %3476 }
 0x4ee   : > { %v3573_v21 = vsel %vm1759_vm2, %v15465_v37, %v3477_v50 }
 0x4f1   : > { %v3523_v26 = vpop.permute.xlu0 %3522 }
 0x4f2   : > { %v3603_v55 = vsel %vm1808_vm3, %v3570_v10, %v3523_v26 }
 0x4f3   : > { %11215 = vmatprep.mubr.msk.bf16.mxu0 %vm1848_vm4, %v3603_v55 }
 0x4f9   : > { %v3525_v19 = vpop.permute.xlu1 %3524 }
 0x4fa   : > { %v3605_v52 = vsel %vm1808_vm3, %v3573_v21, %v3525_v19 }
 0x4fb   : > { %11216 = vmatmul.mubr.msk.bf16.gmra.mrb[220].mxu0 %vm1848_vm4, %v3605_v52 }
 0x4fc   : > { %11221 = vmatprep.mubr.msk.bf16.mxu0 %vm392_vm5, %v3957_v42 }
 0x503   : > { %11222 = vmatmul.mubr.msk.bf16.vlgmr.msra.gmra.mrb[224].mxu0 %vm392_vm5, %v14142_v63 }
 0x504   : > { %11225 = vmatprep.mubr.msk.bf16.mxu0 %vm392_vm5, %v14144_v13  ;;  %11254 = vmatpush3.bf16.msra.mxu0 %v12693_v3  ;;  %v14177_v3 = vld [vmem:[#allocation2 + $0xd0] sm:$0xff] }
 0x505   : > { %11287 = vmatprep.subr.bf16.mxu0 %v12694_v24 }
 0x50b   : > { %11226 = vmatmul.mubr.msk.bf16.gmra.mrb[228].mxu0 %vm392_vm5, %v14153_v53 }
 0x50c   : > { %11229 = vmatprep.mubr.msk.bf16.mxu0 %vm392_vm5, %v14157_v54 }
 0x513   : > { %11230 = vmatmul.mubr.msk.bf16.gmra.mrb[232].mxu0 %vm392_vm5, %v14161_v62 }
 0x514   : > { %11233 = vmatprep.mubr.msk.bf16.mxu0 %vm392_vm5, %v14165_v12 }
 0x51b   : > { %11234 = vmatmul.mubr.msk.bf16.gmra.mrb[236].mxu0 %vm392_vm5, %v14169_v47 }
 0x51c   : > { %11237 = vmatprep.mubr.msk.bf16.mxu0 %vm392_vm5, %v3965_v0 }
 0x523   : > { %11238 = vmatmul.mubr.msk.bf16.gmra.mrb[240].mxu0 %vm392_vm5, %v14177_v3 }
 0x524   : > { %11241 = vmatprep.mubr.msk.bf16.mxu0 %vm392_vm5, %v14179_v46 }
 0x52b   : > { %11242 = vmatmul.mubr.msk.bf16.gmra.mrb[244].mxu0 %vm392_vm5, %v14185_v44 }
 0x52c   : > { %11245 = vmatprep.mubr.msk.bf16.mxu0 %vm392_vm5, %v14189_v32 }
 0x533   : > { %11246 = vmatmul.mubr.msk.bf16.gmra.mrb[248].mxu0 %vm392_vm5, %v14193_v6 }
 0x534   : > { %11249 = vmatprep.mubr.msk.bf16.mxu0 %vm392_vm5, %v14197_v2 }
 0x53b   : > { %11250 = vmatmul.mubr.msk.bf16.gmra.mrb[252].mxu0 %vm392_vm5, %v14201_v34 }
 0x53c   : > { %11255 = vmatprep.mubr.msk.bf16.mxu0 %vm392_vm5, %v3938_v8 }
 0x543   : > { %11256 = vmatmul.mubr.msk.bf16.vlgmr.msra.gmra.mrb[224].mxu0 %vm392_vm5, %v3957_v42 }
 0x544   : > { %11259 = vmatprep.mubr.msk.bf16.mxu0 %vm392_vm5, %v14142_v63  ;;  %11288 = vmatpush3.bf16.msra.mxu0 %v12694_v24 }
 0x545   : > { %11321 = vmatprep.subr.bf16.mxu0 %v14209_v23 }
 0x54b   : > { %11260 = vmatmul.mubr.msk.bf16.gmra.mrb[228].mxu0 %vm392_vm5, %v14144_v13 }
 0x54c   : > { %11263 = vmatprep.mubr.msk.bf16.mxu0 %vm392_vm5, %v14153_v53 }
 0x553   : > { %11264 = vmatmul.mubr.msk.bf16.gmra.mrb[232].mxu0 %vm392_vm5, %v14157_v54 }
 0x554   : > { %11267 = vmatprep.mubr.msk.bf16.mxu0 %vm392_vm5, %v14161_v62 }
 0x55b   : > { %11268 = vmatmul.mubr.msk.bf16.gmra.mrb[236].mxu0 %vm392_vm5, %v14165_v12 }
 0x55c   : > { %11271 = vmatprep.mubr.msk.bf16.mxu0 %vm392_vm5, %v3946_v57 }
 0x55e   : > { %v11189_v61 = vpop.f32.mrb[192].mxu0 }
 0x55f   : > { %v3811_v22 = vmul.f32 %v14235_v9, %v11189_v61  ;;  %v3682_v60 = vpop.f32.mrb[193].mxu0 }
 0x560   : > { %v3809_v30 = vmul.f32 %v14235_v9, %v3682_v60  ;;  %v11190_v35 = vpop.f32.mrb[194].mxu0 }
 0x561   : > { %v3843_v33 = vadd.f32 %v14242_v11, %v3811_v22  ;;  %v3812_v59 = vmul.f32 %v14248_v20, %v11190_v35  ;;  %v3685_v7 = vpop.f32.mrb[195].mxu0 }
 0x562   : > { %v3841_v39 = vadd.f32 %v14242_v11, %v3809_v30  ;;  %v3810_v56 = vmul.f32 %v14248_v20, %v3685_v7  ;;  %v14304_v30 = vld [vmem:[%s15253_s7 + $0x20] sm:$0xff]  }
 0x563   : > { %v3844_v25 = vadd.f32 %v14256_v41, %v3812_v59  ;;  %11272 = vmatmul.mubr.msk.bf16.gmra.mrb[240].mxu0 %vm392_vm5, %v3965_v0  ;;  %v3875_v4 = vmax.f32 %v3843_v33, 0.0 }
 0x564   : > { %v3842_v28 = vadd.f32 %v14256_v41, %v3810_v56  ;;  %11275 = vmatprep.mubr.msk.bf16.mxu0 %vm392_vm5, %v14177_v3  ;;  %v3873_v18 = vmax.f32 %v3841_v39, 0.0 }
 0x565   : > { %v3876_v27 = vmax.f32 %v3844_v25, 0.0 }
 0x566   : > { %v3874_v16 = vmax.f32 %v3842_v28, 0.0 }
 0x567   : > { %v3906_v31 = vpack.c.bf16 %v3876_v27, %v3875_v4 }
 0x568   : > { %v3905_v17 = vpack.c.bf16 %v3874_v16, %v3873_v18 }
 0x569   : > { %3923 = vst.msk [vmem:[#allocation2 + $0x68] sm:$0xff] %vm392_vm5, %v3906_v31 }
 0x56a   : > { %3922 = vst.msk [vmem:[#allocation2 + $0x60] sm:$0xff] %vm392_vm5, %v3905_v17 }
 0x56b   : > { %11276 = vmatmul.mubr.msk.bf16.gmra.mrb[244].mxu0 %vm392_vm5, %v14179_v46 }
 0x56c   : > { %11279 = vmatprep.mubr.msk.bf16.mxu0 %vm392_vm5, %v14185_v44 }
 0x56e   : > { %v11193_v49 = vpop.f32.mrb[196].mxu0 }
 0x56f   : > { %v3815_v45 = vmul.f32 %v14235_v9, %v11193_v49  ;;  %v3698_v58 = vpop.f32.mrb[197].mxu0 }
 0x570   : > { %v3813_v15 = vmul.f32 %v14235_v9, %v3698_v58  ;;  %v11194_v43 = vpop.f32.mrb[198].mxu0  ;;  %v14279_v1 = vld [vmem:[#allocation2 + $0x68] sm:$0xff] }
 0x571   : > { %v3847_v40 = vadd.f32 %v14242_v11, %v3815_v45  ;;  %v3816_v14 = vmul.f32 %v14248_v20, %v11194_v43  ;;  %v3701_v38 = vpop.f32.mrb[199].mxu0  ;;  %v14273_v48 = vld [vmem:[#allocation2 + $0x60] sm:$0xff] }
 0x572   : > { %v3845_v51 = vadd.f32 %v14242_v11, %v3813_v15  ;;  %v3814_v29 = vmul.f32 %v14248_v20, %v3701_v38  ;;  %11532 = vmatmul.mubr.msk.bf16.gmra.mrb[228].mxu1 %vm392_vm5, %v14273_v48 }
 0x573   : > { %v3848_v10 = vadd.f32 %v14256_v41, %v3816_v14  ;;  %11280 = vmatmul.mubr.msk.bf16.gmra.mrb[248].mxu0 %vm392_vm5, %v14189_v32  ;;  %11535 = vmatprep.mubr.msk.bf16.mxu1 %vm392_vm5, %v14279_v1  ;;  %v3879_v55 = vmax.f32 %v3847_v40, 0.0  ;;  %v14338_v14 = vld [vmem:[#allocation2 + $0x108] sm:$0xff] }
 0x574   : > { %v3846_v26 = vadd.f32 %v14256_v41, %v3814_v29  ;;  %11283 = vmatprep.mubr.msk.bf16.mxu0 %vm392_vm5, %v14193_v6  ;;  %v3877_v37 = vmax.f32 %v3845_v51, 0.0 }
 0x575   : > { %v3880_v50 = vmax.f32 %v3848_v10, 0.0 }
 0x576   : > { %v3878_v21 = vmax.f32 %v3846_v26, 0.0 }
 0x577   : > { %v3908_v19 = vpack.c.bf16 %v3880_v50, %v3879_v55 }
 0x578   : > { %v3907_v42 = vpack.c.bf16 %v3878_v21, %v3877_v37  ;;  %v14349_v21 = vld [vmem:[#allocation2 + $0x110] sm:$0xff] }
 0x579   : > { %3925 = vst.msk [vmem:[#allocation2 + $0x78] sm:$0xff] %vm392_vm5, %v3908_v19  ;;  %v14354_v19 = vld [vmem:[#allocation2 + $0x48] sm:$0xff] }
 0x57a   : > { %3924 = vst.msk [vmem:[#allocation2 + $0x70] sm:$0xff] %vm392_vm5, %v3907_v42  ;;  %v14356_v42 = vld [vmem:[#allocation2 + $0x118] sm:$0xff] }
 0x57b   : > { %11284 = vmatmul.mubr.msk.bf16.gmra.mrb[252].mxu0 %vm392_vm5, %v14197_v2 }
 0x57c   : > { %11289 = vmatprep.mubr.msk.bf16.mxu0 %vm392_vm5, %v14142_v63 }
 0x57e   : > { %v11197_v52 = vpop.f32.mrb[200].mxu0 }
 0x57f   : > { %v3819_v24 = vmul.f32 %v14235_v9, %v11197_v52  ;;  %v3714_v0 = vpop.f32.mrb[201].mxu0 }
 0x580   : > { %v3817_v5 = vmul.f32 %v14235_v9, %v3714_v0  ;;  %v11198_v8 = vpop.f32.mrb[202].mxu0  ;;  %v14310_v33 = vld [vmem:[#allocation2 + $0x78] sm:$0xff] }
 0x581   : > { %v3851_v57 = vadd.f32 %v14242_v11, %v3819_v24  ;;  %v3820_v61 = vmul.f32 %v14248_v20, %v11198_v8  ;;  %v3717_v22 = vpop.f32.mrb[203].mxu0  ;;  %v14299_v60 = vld [vmem:[#allocation2 + $0x70] sm:$0xff] }
 0x582   : > { %v3849_v63 = vadd.f32 %v14242_v11, %v3817_v5  ;;  %v3818_v35 = vmul.f32 %v14248_v20, %v3717_v22  ;;  %11536 = vmatmul.mubr.msk.bf16.gmra.mrb[232].mxu1 %vm392_vm5, %v14299_v60 }
 0x583   : > { %v3852_v59 = vadd.f32 %v14256_v41, %v3820_v61  ;;  %11290 = vmatmul.mubr.msk.bf16.vlgmr.msra.gmra.mrb[224].mxu0 %vm392_vm5, %v14144_v13  ;;  %11539 = vmatprep.mubr.msk.bf16.mxu1 %vm392_vm5, %v14310_v33  ;;  %v3883_v39 = vmax.f32 %v3851_v57, 0.0 }
 0x584   : > { %v3850_v7 = vadd.f32 %v14256_v41, %v3818_v35  ;;  %11293 = vmatprep.mubr.msk.bf16.mxu0 %vm392_vm5, %v14153_v53  ;;  %11322 = vmatpush3.bf16.msra.mxu0 %v14209_v23  ;;  %v3881_v25 = vmax.f32 %v3849_v63, 0.0 }
 0x585   : > { %v3884_v56 = vmax.f32 %v3852_v59, 0.0  ;;  %11355 = vmatprep.subr.bf16.mxu0 %v14304_v30 }
 0x586   : > { %v3882_v28 = vmax.f32 %v3850_v7, 0.0 }
 0x587   : > { %v3910_v4 = vpack.c.bf16 %v3884_v56, %v3883_v39 }
 0x588   : > { %v3909_v27 = vpack.c.bf16 %v3882_v28, %v3881_v25 }
 0x589   : > { %3927 = vst.msk [vmem:[#allocation2 + $0x88] sm:$0xff] %vm392_vm5, %v3910_v4 }
 0x58a   : > { %3926 = vst.msk [vmem:[#allocation2 + $0x80] sm:$0xff] %vm392_vm5, %v3909_v27 }
 0x58b   : > { %11294 = vmatmul.mubr.msk.bf16.gmra.mrb[228].mxu0 %vm392_vm5, %v14157_v54 }
 0x58c   : > { %11297 = vmatprep.mubr.msk.bf16.mxu0 %vm392_vm5, %v14161_v62 }
 0x58e   : > { %v11201_v18 = vpop.f32.mrb[204].mxu0 }
 0x58f   : > { %v3823_v23 = vmul.f32 %v14235_v9, %v11201_v18  ;;  %v3730_v16 = vpop.f32.mrb[205].mxu0 }
 0x590   : > { %v3821_v31 = vmul.f32 %v14235_v9, %v3730_v16  ;;  %v11202_v17 = vpop.f32.mrb[206].mxu0 }
 0x591   : > { %v3855_v49 = vadd.f32 %v14242_v11, %v3823_v23  ;;  %v3824_v45 = vmul.f32 %v14248_v20, %v11202_v17  ;;  %v3733_v58 = vpop.f32.mrb[207].mxu0  ;;  %v14332_v15 = vld [vmem:[#allocation2 + $0x80] sm:$0xff] }
 0x592   : > { %v3853_v43 = vadd.f32 %v14242_v11, %v3821_v31  ;;  %v3822_v40 = vmul.f32 %v14248_v20, %v3733_v58  ;;  %11540 = vmatmul.mubr.msk.bf16.gmra.mrb[236].mxu1 %vm392_vm5, %v14332_v15 }
 0x593   : > { %v3856_v38 = vadd.f32 %v14256_v41, %v3824_v45  ;;  %11298 = vmatmul.mubr.msk.bf16.gmra.mrb[232].mxu0 %vm392_vm5, %v14165_v12  ;;  %11543 = vmatprep.mubr.msk.bf16.mxu1 %vm392_vm5, %v14338_v14  ;;  %v3887_v29 = vmax.f32 %v3855_v49, 0.0 }
 0x594   : > { %v3854_v51 = vadd.f32 %v14256_v41, %v3822_v40  ;;  %11301 = vmatprep.mubr.msk.bf16.mxu0 %vm392_vm5, %v14169_v47  ;;  %v3885_v26 = vmax.f32 %v3853_v43, 0.0 }
 0x595   : > { %v3888_v10 = vmax.f32 %v3856_v38, 0.0 }
 0x596   : > { %v3886_v55 = vmax.f32 %v3854_v51, 0.0 }
 0x597   : > { %v3912_v50 = vpack.c.bf16 %v3888_v10, %v3887_v29 }
 0x598   : > { %v3911_v37 = vpack.c.bf16 %v3886_v55, %v3885_v26 }
 0x599   : > { %3929 = vst.msk [vmem:[#allocation2 + $0x98] sm:$0xff] %vm392_vm5, %v3912_v50 }
 0x59a   : > { %3928 = vst.msk [vmem:[#allocation2 + $0x90] sm:$0xff] %vm392_vm5, %v3911_v37  ;;  %11544 = vmatmul.mubr.msk.bf16.gmra.mrb[240].mxu1 %vm392_vm5, %v14349_v21 }
 0x59b   : > { %11302 = vmatmul.mubr.msk.bf16.gmra.mrb[236].mxu0 %vm392_vm5, %v14354_v19  ;;  %11547 = vmatprep.mubr.msk.bf16.mxu1 %vm392_vm5, %v14356_v42 }
 0x59c   : > { %11305 = vmatprep.mubr.msk.bf16.mxu0 %vm392_vm5, %v14177_v3 }
 0x59e   : > { %v11205_v52 = vpop.f32.mrb[208].mxu0 }
 0x59f   : > { %v3827_v24 = vmul.f32 %v14235_v9, %v11205_v52  ;;  %v3746_v0 = vpop.f32.mrb[209].mxu0 }
 0x5a0   : > { %v3825_v5 = vmul.f32 %v14235_v9, %v3746_v0  ;;  %v11206_v8 = vpop.f32.mrb[210].mxu0 }
 0x5a1   : > { %v3859_v57 = vadd.f32 %v14242_v11, %v3827_v24  ;;  %v3828_v61 = vmul.f32 %v14248_v20, %v11206_v8  ;;  %v3749_v22 = vpop.f32.mrb[211].mxu0 }
 0x5a2   : > { %v3857_v63 = vadd.f32 %v14242_v11, %v3825_v5  ;;  %v3826_v35 = vmul.f32 %v14248_v20, %v3749_v22 }
 0x5a3   : > { %v3860_v59 = vadd.f32 %v14256_v41, %v3828_v61  ;;  %11306 = vmatmul.mubr.msk.bf16.gmra.mrb[240].mxu0 %vm392_vm5, %v14179_v46  ;;  %v3891_v7 = vmax.f32 %v3859_v57, 0.0 }
 0x5a4   : > { %v3858_v3 = vadd.f32 %v14256_v41, %v3826_v35  ;;  %11309 = vmatprep.mubr.msk.bf16.mxu0 %vm392_vm5, %v14185_v44  ;;  %v3889_v56 = vmax.f32 %v3857_v63, 0.0 }
 0x5a5   : > { %v3892_v39 = vmax.f32 %v3860_v59, 0.0  ;;  %v14417_v59 = vld [vmem:[%s15253_s7 + $0x28] sm:$0xff]  }
 0x5a6   : > { %v3890_v25 = vmax.f32 %v3858_v3, 0.0 }
 0x5a7   : > { %v3914_v28 = vpack.c.bf16 %v3892_v39, %v3891_v7 }
 0x5a8   : > { %v3913_v4 = vpack.c.bf16 %v3890_v25, %v3889_v56 }
 0x5a9   : > { %3931 = vst.msk [vmem:[#allocation2 + $0x128] sm:$0xff] %vm392_vm5, %v3914_v28 }
 0x5aa   : > { %3930 = vst.msk [vmem:[#allocation2 + $0x120] sm:$0xff] %vm392_vm5, %v3913_v4 }
 0x5ab   : > { %11310 = vmatmul.mubr.msk.bf16.gmra.mrb[244].mxu0 %vm392_vm5, %v14189_v32 }
 0x5ac   : > { %11313 = vmatprep.mubr.msk.bf16.mxu0 %vm392_vm5, %v14193_v6 }
 0x5ae   : > { %v11209_v27 = vpop.f32.mrb[212].mxu0 }
 0x5af   : > { %v3831_v18 = vmul.f32 %v14235_v9, %v11209_v27  ;;  %v3762_v23 = vpop.f32.mrb[213].mxu0 }
 0x5b0   : > { %v3829_v16 = vmul.f32 %v14235_v9, %v3762_v23  ;;  %v11210_v31 = vpop.f32.mrb[214].mxu0  ;;  %v14392_v38 = vld [vmem:[#allocation2 + $0x128] sm:$0xff] }
 0x5b1   : > { %v3863_v17 = vadd.f32 %v14242_v11, %v3831_v18  ;;  %v3832_v49 = vmul.f32 %v14248_v20, %v11210_v31  ;;  %v3765_v45 = vpop.f32.mrb[215].mxu0  ;;  %v14386_v58 = vld [vmem:[#allocation2 + $0x120] sm:$0xff] }
 0x5b2   : > { %v3861_v43 = vadd.f32 %v14242_v11, %v3829_v16  ;;  %v3830_v40 = vmul.f32 %v14248_v20, %v3765_v45  ;;  %11548 = vmatmul.mubr.msk.bf16.gmra.mrb[244].mxu1 %vm392_vm5, %v14386_v58 }
 0x5b3   : > { %v3864_v51 = vadd.f32 %v14256_v41, %v3832_v49  ;;  %11314 = vmatmul.mubr.msk.bf16.gmra.mrb[248].mxu0 %vm392_vm5, %v14197_v2  ;;  %11551 = vmatprep.mubr.msk.bf16.mxu1 %vm392_vm5, %v14392_v38  ;;  %v3895_v10 = vmax.f32 %v3863_v17, 0.0 }
 0x5b4   : > { %v3862_v29 = vadd.f32 %v14256_v41, %v3830_v40  ;;  %11317 = vmatprep.mubr.msk.bf16.mxu0 %vm392_vm5, %v14201_v34  ;;  %v3893_v55 = vmax.f32 %v3861_v43, 0.0 }
 0x5b5   : > { %v3896_v26 = vmax.f32 %v3864_v51, 0.0 }
 0x5b6   : > { %v3894_v50 = vmax.f32 %v3862_v29, 0.0 }
 0x5b7   : > { %v3916_v37 = vpack.c.bf16 %v3896_v26, %v3895_v10 }
 0x5b8   : > { %v3915_v52 = vpack.c.bf16 %v3894_v50, %v3893_v55 }
 0x5b9   : > { %3933 = vst.msk [vmem:[#allocation2 + $0x138] sm:$0xff] %vm392_vm5, %v3916_v37 }
 0x5ba   : > { %3932 = vst.msk [vmem:[#allocation2 + $0x130] sm:$0xff] %vm392_vm5, %v3915_v52 }
 0x5bb   : > { %11318 = vmatmul.mubr.msk.bf16.gmra.mrb[252].mxu0 %vm392_vm5, %v14338_v14 }
 0x5bc   : > { %11323 = vmatprep.mubr.msk.bf16.mxu0 %vm392_vm5, %v14144_v13 }
 0x5be   : > { %v11213_v24 = vpop.f32.mrb[216].mxu0 }
 0x5bf   : > { %v3835_v0 = vmul.f32 %v14235_v9, %v11213_v24  ;;  %v3778_v5 = vpop.f32.mrb[217].mxu0  ;;  %v12699_v24 = vld [vmem:[%s15253_s7 + $0x18] sm:$0xff]  }
 0x5c0   : > { %v3833_v8 = vmul.f32 %v14235_v9, %v3778_v5  ;;  %v11214_v57 = vpop.f32.mrb[218].mxu0  ;;  %v14423_v7 = vld [vmem:[#allocation2 + $0x138] sm:$0xff]  ;;  %v12703_v5 = vld [vmem:[%s15253_s7 + $0x28] sm:$0xff]  }
 0x5c1   : > { %v3867_v61 = vadd.f32 %v14242_v11, %v3835_v0  ;;  %v3836_v22 = vmul.f32 %v14248_v20, %v11214_v57  ;;  %v3781_v63 = vpop.f32.mrb[219].mxu0  ;;  %v14412_v35 = vld [vmem:[#allocation2 + $0x130] sm:$0xff]  ;;  %v14475_v0 = vld [vmem:[#allocation2 + $0x58] sm:$0xff] }
 0x5c2   : > { %v3865_v13 = vadd.f32 %v14242_v11, %v3833_v8  ;;  %v3834_v3 = vmul.f32 %v14248_v20, %v3781_v63  ;;  %11552 = vmatmul.mubr.msk.bf16.gmra.mrb[248].mxu1 %vm392_vm5, %v14412_v35  ;;  %v14712_v8 = vld [vmem:[#allocation2 + $0x98] sm:$0xff] }
 0x5c3   : > { %v3868_v39 = vadd.f32 %v14256_v41, %v3836_v22  ;;  %11324 = vmatmul.mubr.msk.bf16.vlgmr.msra.gmra.mrb[224].mxu0 %vm392_vm5, %v14153_v53  ;;  %11555 = vmatprep.mubr.msk.bf16.mxu1 %vm392_vm5, %v14423_v7  ;;  %v3899_v25 = vmax.f32 %v3867_v61, 0.0  ;;  %v5741_v57 = vld [vmem:[#allocation2 + $0x38] sm:$0xff]  ;;  %v5742_v61 = vld [vmem:[#allocation2 + $0x40] sm:$0xff] }
 0x5c4   : > { %v3866_v56 = vadd.f32 %v14256_v41, %v3834_v3  ;;  %11327 = vmatprep.mubr.msk.bf16.mxu0 %vm392_vm5, %v14157_v54  ;;  %11356 = vmatpush3.bf16.msra.mxu0 %v14304_v30  ;;  %v3897_v4 = vmax.f32 %v3865_v13, 0.0  ;;  %v12707_v63 = vld [vmem:[%s15253_s7 + $0x38] sm:$0xff]   ;;  %v8069_v3 = vld [vmem:[#allocation2 + $0xa8] sm:$0xff] }
 0x5c5   : > { %v3900_v28 = vmax.f32 %v3868_v39, 0.0  ;;  %11389 = vmatprep.subr.bf16.mxu0 %v14417_v59  ;;  %v6019_v13 = vld [vmem:[#allocation2 + $0x118] sm:$0xff] }
 0x5c6   : > { %v3898_v27 = vmax.f32 %v3866_v56, 0.0  ;;  %v8609_v39 = vld [vmem:[#allocation2 + $0x178] sm:$0xff]  ;;  %v14916_v56 = vld [vmem:[%s15254_s8] sm:$0xff] }
 0x5c7   : > { %v3918_v18 = vpack.c.bf16 %v3900_v28, %v3899_v25  ;;  %v14922_v25 = vld [vmem:[%s15255_s9] sm:$0xff] }
 0x5c8   : > { %v3917_v23 = vpack.c.bf16 %v3898_v27, %v3897_v4  ;;  %v14927_v4 = vld [vmem:[%s15254_s8 + $0x8] sm:$0xff] }
 0x5c9   : > { %3935 = vst.msk [vmem:[#allocation2 + $0x148] sm:$0xff] %vm392_vm5, %v3918_v18 }
 0x5ca   : > { %3934 = vst.msk [vmem:[#allocation2 + $0x140] sm:$0xff] %vm392_vm5, %v3917_v23 }
 0x5cb   : > { %11328 = vmatmul.mubr.msk.bf16.gmra.mrb[228].mxu0 %vm392_vm5, %v14161_v62 }
 0x5cc   : > { %11331 = vmatprep.mubr.msk.bf16.mxu0 %vm392_vm5, %v14165_v12 }
 0x5ce   : > { %v11217_v16 = vpop.f32.mrb[220].mxu0 }
 0x5cf   : > { %v3839_v30 = vmul.f32 %v14235_v9, %v11217_v16  ;;  %v3794_v31 = vpop.f32.mrb[221].mxu0  ;;  %v14934_v16 = vld [vmem:[%s15255_s9 + $0x8] sm:$0xff] }
 0x5d0   : > { %v3837_v17 = vmul.f32 %v14235_v9, %v3794_v31  ;;  %v11218_v49 = vpop.f32.mrb[222].mxu0 }
 0x5d1   : > { %v3871_v45 = vadd.f32 %v14242_v11, %v3839_v30  ;;  %v3840_v43 = vmul.f32 %v14248_v20, %v11218_v49  ;;  %v3797_v40 = vpop.f32.mrb[223].mxu0  ;;  %v14445_v51 = vld [vmem:[#allocation2 + $0x140] sm:$0xff] }
 0x5d2   : > { %v3869_v29 = vadd.f32 %v14242_v11, %v3837_v17  ;;  %v3838_v10 = vmul.f32 %v14248_v20, %v3797_v40  ;;  %11556 = vmatmul.mubr.msk.bf16.gmra.mrb[252].mxu1 %vm392_vm5, %v14445_v51 }
 0x5d3   : > { %v3872_v26 = vadd.f32 %v14256_v41, %v3840_v43  ;;  %11332 = vmatmul.mubr.msk.bf16.gmra.mrb[232].mxu0 %vm392_vm5, %v14169_v47  ;;  %11561 = vmatprep.mubr.msk.bf16.mxu1 %vm392_vm5, %v14169_v47  ;;  %v3903_v55 = vmax.f32 %v3871_v45, 0.0 }
 0x5d4   : > { %v3870_v9 = vadd.f32 %v14256_v41, %v3838_v10  ;;  %11335 = vmatprep.mubr.msk.bf16.mxu0 %vm392_vm5, %v14354_v19  ;;  %v3901_v50 = vmax.f32 %v3869_v29, 0.0  ;;  %v14466_v41 = vld [vmem:[#allocation2 + $0x50] sm:$0xff] }
 0x5d5   : > { %v3904_v11 = vmax.f32 %v3872_v26, 0.0 }
 0x5d6   : > { %v3902_v20 = vmax.f32 %v3870_v9, 0.0 }
 0x5d7   : > { %v3920_v37 = vpack.c.bf16 %v3904_v11, %v3903_v55 }
 0x5d8   : > { %v3919_v52 = vpack.c.bf16 %v3902_v20, %v3901_v50 }
 0x5d9   : > { %3937 = vst.msk [vmem:[#allocation2 + $0x158] sm:$0xff] %vm392_vm5, %v3920_v37 }
 0x5da   : > { %3936 = vst.msk [vmem:[#allocation2 + $0x150] sm:$0xff] %vm392_vm5, %v3919_v52  ;;  %11562 = vmatmul.mubr.msk.bf16.vlgmr.msra.gmra.mrb[224].mxu1 %vm392_vm5, %v14354_v19 }
 0x5db   : > { %11336 = vmatmul.mubr.msk.bf16.gmra.mrb[236].mxu0 %vm392_vm5, %v14466_v41  ;;  %11565 = vmatprep.mubr.msk.bf16.mxu1 %vm392_vm5, %v14466_v41 }
 0x5dc   : > { %11594 = vmatpush3.bf16.msra.mxu1 %v14226_v36  ;;  %11339 = vmatprep.mubr.msk.bf16.mxu0 %vm392_vm5, %v14179_v46  ;;  %v12702_v46 = vld [vmem:[%s15253_s7 + $0x30] sm:$0xff]   ;;  %v12704_v36 = vld [vmem:[%s15253_s7 + $0x38] sm:$0xff]  }
 0x5dd   : > { %11627 = vmatprep.subr.bf16.mxu1 %v12699_v24 }
 0x5e0   : > { %v14744_v22 = vld [vmem:[#allocation2 + $0x158] sm:$0xff] }
 0x5e2   : > { %11566 = vmatmul.mubr.msk.bf16.gmra.mrb[228].mxu1 %vm392_vm5, %v14475_v0 }
 0x5e3   : > { %11340 = vmatmul.mubr.msk.bf16.gmra.mrb[240].mxu0 %vm392_vm5, %v14185_v44  ;;  %11569 = vmatprep.mubr.msk.bf16.mxu1 %vm392_vm5, %v14273_v48 }
 0x5e4   : > { %11343 = vmatprep.mubr.msk.bf16.mxu0 %vm392_vm5, %v14189_v32 }
 0x5ea   : > { %11570 = vmatmul.mubr.msk.bf16.gmra.mrb[232].mxu1 %vm392_vm5, %v14279_v1 }
 0x5eb   : > { %11344 = vmatmul.mubr.msk.bf16.gmra.mrb[244].mxu0 %vm392_vm5, %v14193_v6  ;;  %11573 = vmatprep.mubr.msk.bf16.mxu1 %vm392_vm5, %v14299_v60 }
 0x5ec   : > { %11347 = vmatprep.mubr.msk.bf16.mxu0 %vm392_vm5, %v14197_v2 }
 0x5f2   : > { %11574 = vmatmul.mubr.msk.bf16.gmra.mrb[236].mxu1 %vm392_vm5, %v14310_v33 }
 0x5f3   : > { %11348 = vmatmul.mubr.msk.bf16.gmra.mrb[248].mxu0 %vm392_vm5, %v14201_v34  ;;  %11577 = vmatprep.mubr.msk.bf16.mxu1 %vm392_vm5, %v14201_v34 }
 0x5f4   : > { %11351 = vmatprep.mubr.msk.bf16.mxu0 %vm392_vm5, %v14338_v14 }
 0x5fa   : > { %11578 = vmatmul.mubr.msk.bf16.gmra.mrb[240].mxu1 %vm392_vm5, %v14338_v14 }
 0x5fb   : > { %11352 = vmatmul.mubr.msk.bf16.gmra.mrb[252].mxu0 %vm392_vm5, %v14349_v21  ;;  %11581 = vmatprep.mubr.msk.bf16.mxu1 %vm392_vm5, %v14349_v21 }
 0x5fc   : > { %11357 = vmatprep.mubr.msk.bf16.mxu0 %vm392_vm5, %v14153_v53  ;;  %v12701_v53 = vld [vmem:[%s15253_s7 + $0x20] sm:$0xff]  }
 0x602   : > { %11582 = vmatmul.mubr.msk.bf16.gmra.mrb[244].mxu1 %vm392_vm5, %v14356_v42 }
 0x603   : > { %11358 = vmatmul.mubr.msk.bf16.vlgmr.msra.gmra.mrb[224].mxu0 %vm392_vm5, %v14157_v54  ;;  %11585 = vmatprep.mubr.msk.bf16.mxu1 %vm392_vm5, %v14386_v58 }
 0x604   : > { %11361 = vmatprep.mubr.msk.bf16.mxu0 %vm392_vm5, %v14161_v62  ;;  %11390 = vmatpush3.bf16.msra.mxu0 %v14417_v59  ;;  %v6018_v59 = vld [vmem:[#allocation2 + $0x110] sm:$0xff] }
 0x605   : > { %11423 = vmatprep.subr.bf16.mxu0 %v12702_v46 }
 0x60a   : > { %11586 = vmatmul.mubr.msk.bf16.gmra.mrb[248].mxu1 %vm392_vm5, %v14392_v38 }
 0x60b   : > { %11362 = vmatmul.mubr.msk.bf16.gmra.mrb[228].mxu0 %vm392_vm5, %v14165_v12  ;;  %11589 = vmatprep.mubr.msk.bf16.mxu1 %vm392_vm5, %v14412_v35 }
 0x60c   : > { %11365 = vmatprep.mubr.msk.bf16.mxu0 %vm392_vm5, %v14169_v47 }
 0x612   : > { %11590 = vmatmul.mubr.msk.bf16.gmra.mrb[252].mxu1 %vm392_vm5, %v14423_v7 }
 0x613   : > { %11366 = vmatmul.mubr.msk.bf16.gmra.mrb[232].mxu0 %vm392_vm5, %v14354_v19  ;;  %11595 = vmatprep.mubr.msk.bf16.mxu1 %vm392_vm5, %v14466_v41 }
 0x614   : > { %11369 = vmatprep.mubr.msk.bf16.mxu0 %vm392_vm5, %v14466_v41 }
 0x61a   : > { %11596 = vmatmul.mubr.msk.bf16.vlgmr.msra.gmra.mrb[224].mxu1 %vm392_vm5, %v14475_v0 }
 0x61b   : > { %11370 = vmatmul.mubr.msk.bf16.gmra.mrb[236].mxu0 %vm392_vm5, %v14475_v0  ;;  %11599 = vmatprep.mubr.msk.bf16.mxu1 %vm392_vm5, %v14273_v48 }
 0x61c   : > { %11628 = vmatpush3.bf16.msra.mxu1 %v12699_v24  ;;  %11373 = vmatprep.mubr.msk.bf16.mxu0 %vm392_vm5, %v14185_v44  ;;  %v14564_v44 = vld [vmem:[#allocation2 + $0x88] sm:$0xff] }
 0x61d   : > { %11661 = vmatprep.subr.bf16.mxu1 %v12701_v53 }
 0x622   : > { %11600 = vmatmul.mubr.msk.bf16.gmra.mrb[228].mxu1 %vm392_vm5, %v14279_v1 }
 0x623   : > { %11374 = vmatmul.mubr.msk.bf16.gmra.mrb[240].mxu0 %vm392_vm5, %v14189_v32  ;;  %11603 = vmatprep.mubr.msk.bf16.mxu1 %vm392_vm5, %v14299_v60 }
 0x624   : > { %11377 = vmatprep.mubr.msk.bf16.mxu0 %vm392_vm5, %v14193_v6 }
 0x62a   : > { %11604 = vmatmul.mubr.msk.bf16.gmra.mrb[232].mxu1 %vm392_vm5, %v14310_v33 }
 0x62b   : > { %11378 = vmatmul.mubr.msk.bf16.gmra.mrb[244].mxu0 %vm392_vm5, %v14197_v2  ;;  %11607 = vmatprep.mubr.msk.bf16.mxu1 %vm392_vm5, %v14332_v15 }
 0x62c   : > { %11381 = vmatprep.mubr.msk.bf16.mxu0 %vm392_vm5, %v14201_v34 }
 0x632   : > { %11608 = vmatmul.mubr.msk.bf16.gmra.mrb[236].mxu1 %vm392_vm5, %v14564_v44 }
 0x633   : > { %11382 = vmatmul.mubr.msk.bf16.gmra.mrb[248].mxu0 %vm392_vm5, %v14338_v14  ;;  %11611 = vmatprep.mubr.msk.bf16.mxu1 %vm392_vm5, %v14349_v21 }
 0x634   : > { %11385 = vmatprep.mubr.msk.bf16.mxu0 %vm392_vm5, %v14349_v21 }
 0x63a   : > { %11612 = vmatmul.mubr.msk.bf16.gmra.mrb[240].mxu1 %vm392_vm5, %v14356_v42 }
 0x63b   : > { %11386 = vmatmul.mubr.msk.bf16.gmra.mrb[252].mxu0 %vm392_vm5, %v14356_v42  ;;  %11615 = vmatprep.mubr.msk.bf16.mxu1 %vm392_vm5, %v14386_v58 }
 0x63c   : > { %11391 = vmatprep.mubr.msk.bf16.mxu0 %vm392_vm5, %v14157_v54  ;;  %v14601_v54 = vld [vmem:[#allocation2 + $0x148] sm:$0xff] }
 0x642   : > { %11616 = vmatmul.mubr.msk.bf16.gmra.mrb[244].mxu1 %vm392_vm5, %v14392_v38 }
 0x643   : > { %11392 = vmatmul.mubr.msk.bf16.vlgmr.msra.gmra.mrb[224].mxu0 %vm392_vm5, %v14161_v62  ;;  %11619 = vmatprep.mubr.msk.bf16.mxu1 %vm392_vm5, %v14412_v35 }
 0x644   : > { %11395 = vmatprep.mubr.msk.bf16.mxu0 %vm392_vm5, %v14165_v12  ;;  %11424 = vmatpush3.bf16.msra.mxu0 %v12702_v46 }
 0x645   : > { %11457 = vmatprep.subr.bf16.mxu0 %v12704_v36 }
 0x64a   : > { %11620 = vmatmul.mubr.msk.bf16.gmra.mrb[248].mxu1 %vm392_vm5, %v14423_v7 }
 0x64b   : > { %11396 = vmatmul.mubr.msk.bf16.gmra.mrb[228].mxu0 %vm392_vm5, %v14169_v47  ;;  %11623 = vmatprep.mubr.msk.bf16.mxu1 %vm392_vm5, %v14445_v51 }
 0x64c   : > { %11399 = vmatprep.mubr.msk.bf16.mxu0 %vm392_vm5, %v14354_v19 }
 0x652   : > { %11624 = vmatmul.mubr.msk.bf16.gmra.mrb[252].mxu1 %vm392_vm5, %v14601_v54 }
 0x653   : > { %11400 = vmatmul.mubr.msk.bf16.gmra.mrb[232].mxu0 %vm392_vm5, %v14466_v41  ;;  %11629 = vmatprep.mubr.msk.bf16.mxu1 %vm392_vm5, %v14475_v0 }
 0x654   : > { %11403 = vmatprep.mubr.msk.bf16.mxu0 %vm392_vm5, %v14475_v0 }
 0x65a   : > { %11630 = vmatmul.mubr.msk.bf16.vlgmr.msra.gmra.mrb[224].mxu1 %vm392_vm5, %v14273_v48 }
 0x65b   : > { %11404 = vmatmul.mubr.msk.bf16.gmra.mrb[236].mxu0 %vm392_vm5, %v14273_v48  ;;  %11633 = vmatprep.mubr.msk.bf16.mxu1 %vm392_vm5, %v14279_v1 }
 0x65c   : > { %11662 = vmatpush3.bf16.msra.mxu1 %v12701_v53  ;;  %11407 = vmatprep.mubr.msk.bf16.mxu0 %vm392_vm5, %v14189_v32  ;;  %v14638_v32 = vld [vmem:[#allocation2 + $0x90] sm:$0xff] }
 0x65d   : > { %11695 = vmatprep.subr.bf16.mxu1 %v12703_v5 }
 0x662   : > { %11634 = vmatmul.mubr.msk.bf16.gmra.mrb[228].mxu1 %vm392_vm5, %v14299_v60 }
 0x663   : > { %11408 = vmatmul.mubr.msk.bf16.gmra.mrb[240].mxu0 %vm392_vm5, %v14193_v6  ;;  %11637 = vmatprep.mubr.msk.bf16.mxu1 %vm392_vm5, %v14310_v33  ;;  %v12706_v6 = vld [vmem:[%s15253_s7 + $0x40] sm:$0xff]  }
 0x664   : > { %11411 = vmatprep.mubr.msk.bf16.mxu0 %vm392_vm5, %v14197_v2  ;;  %v5483_v2 = vld [vmem:[#allocation2 + $0xf8] sm:$0xff] }
 0x66a   : > { %11638 = vmatmul.mubr.msk.bf16.gmra.mrb[232].mxu1 %vm392_vm5, %v14332_v15 }
 0x66b   : > { %11412 = vmatmul.mubr.msk.bf16.gmra.mrb[244].mxu0 %vm392_vm5, %v14201_v34  ;;  %11641 = vmatprep.mubr.msk.bf16.mxu1 %vm392_vm5, %v14564_v44  ;;  %v14700_v34 = vld [vmem:[#allocation2 + $0x100] sm:$0xff] }
 0x66c   : > { %11415 = vmatprep.mubr.msk.bf16.mxu0 %vm392_vm5, %v14338_v14 }
 0x672   : > { %11642 = vmatmul.mubr.msk.bf16.gmra.mrb[236].mxu1 %vm392_vm5, %v14638_v32 }
 0x673   : > { %11416 = vmatmul.mubr.msk.bf16.gmra.mrb[248].mxu0 %vm392_vm5, %v14349_v21  ;;  %11645 = vmatprep.mubr.msk.bf16.mxu1 %vm392_vm5, %v14356_v42 }
 0x674   : > { %11419 = vmatprep.mubr.msk.bf16.mxu0 %vm392_vm5, %v14356_v42 }
 0x67a   : > { %11646 = vmatmul.mubr.msk.bf16.gmra.mrb[240].mxu1 %vm392_vm5, %v14386_v58 }
 0x67b   : > { %11420 = vmatmul.mubr.msk.bf16.gmra.mrb[252].mxu0 %vm392_vm5, %v14386_v58  ;;  %11649 = vmatprep.mubr.msk.bf16.mxu1 %vm392_vm5, %v14392_v38 }
 0x67c   : > { %11425 = vmatprep.mubr.msk.bf16.mxu0 %vm392_vm5, %v14161_v62  ;;  %v14675_v62 = vld [vmem:[#allocation2 + $0x150] sm:$0xff] }
 0x682   : > { %11650 = vmatmul.mubr.msk.bf16.gmra.mrb[244].mxu1 %vm392_vm5, %v14412_v35 }
 0x683   : > { %11426 = vmatmul.mubr.msk.bf16.vlgmr.msra.gmra.mrb[224].mxu0 %vm392_vm5, %v14165_v12  ;;  %11653 = vmatprep.mubr.msk.bf16.mxu1 %vm392_vm5, %v14423_v7  ;;  %v12705_v12 = vld [vmem:[%s15253_s7 + $0x30] sm:$0xff]  }
 0x684   : > { %11429 = vmatprep.mubr.msk.bf16.mxu0 %vm392_vm5, %v14169_v47  ;;  %11458 = vmatpush3.bf16.msra.mxu0 %v12704_v36  ;;  %v5482_v47 = vld [vmem:[#allocation2 + $0xf0] sm:$0xff] }
 0x685   : > { %11491 = vmatprep.subr.bf16.mxu0 %v12706_v6 }
 0x68a   : > { %11654 = vmatmul.mubr.msk.bf16.gmra.mrb[248].mxu1 %vm392_vm5, %v14445_v51 }
 0x68b   : > { %11430 = vmatmul.mubr.msk.bf16.gmra.mrb[228].mxu0 %vm392_vm5, %v14354_v19  ;;  %11657 = vmatprep.mubr.msk.bf16.mxu1 %vm392_vm5, %v14601_v54 }
 0x68c   : > { %11433 = vmatprep.mubr.msk.bf16.mxu0 %vm392_vm5, %v14466_v41 }
 0x692   : > { %11658 = vmatmul.mubr.msk.bf16.gmra.mrb[252].mxu1 %vm392_vm5, %v14675_v62 }
 0x693   : > { %11434 = vmatmul.mubr.msk.bf16.gmra.mrb[232].mxu0 %vm392_vm5, %v14475_v0  ;;  %11663 = vmatprep.mubr.msk.bf16.mxu1 %vm392_vm5, %v14273_v48 }
 0x694   : > { %11437 = vmatprep.mubr.msk.bf16.mxu0 %vm392_vm5, %v14273_v48 }
 0x69a   : > { %11664 = vmatmul.mubr.msk.bf16.vlgmr.msra.gmra.mrb[224].mxu1 %vm392_vm5, %v14279_v1 }
 0x69b   : > { %11438 = vmatmul.mubr.msk.bf16.gmra.mrb[236].mxu0 %vm392_vm5, %v14279_v1  ;;  %11667 = vmatprep.mubr.msk.bf16.mxu1 %vm392_vm5, %v14299_v60 }
 0x69c   : > { %11696 = vmatpush3.bf16.msra.mxu1 %v12703_v5  ;;  %11441 = vmatprep.mubr.msk.bf16.mxu0 %vm392_vm5, %v5482_v47 }
 0x69d   : > { %11729 = vmatprep.subr.bf16.mxu1 %v12705_v12 }
 0x6a2   : > { %11668 = vmatmul.mubr.msk.bf16.gmra.mrb[228].mxu1 %vm392_vm5, %v14310_v33 }
 0x6a3   : > { %11442 = vmatmul.mubr.msk.bf16.gmra.mrb[240].mxu0 %vm392_vm5, %v5483_v2  ;;  %11671 = vmatprep.mubr.msk.bf16.mxu1 %vm392_vm5, %v14332_v15 }
 0x6a4   : > { %11445 = vmatprep.mubr.msk.bf16.mxu0 %vm392_vm5, %v14700_v34 }
 0x6aa   : > { %11672 = vmatmul.mubr.msk.bf16.gmra.mrb[232].mxu1 %vm392_vm5, %v14564_v44 }
 0x6ab   : > { %11446 = vmatmul.mubr.msk.bf16.gmra.mrb[244].mxu0 %vm392_vm5, %v14338_v14  ;;  %11675 = vmatprep.mubr.msk.bf16.mxu1 %vm392_vm5, %v14638_v32 }
 0x6ac   : > { %11449 = vmatprep.mubr.msk.bf16.mxu0 %vm392_vm5, %v14349_v21 }
 0x6b2   : > { %11676 = vmatmul.mubr.msk.bf16.gmra.mrb[236].mxu1 %vm392_vm5, %v14712_v8 }
 0x6b3   : > { %11450 = vmatmul.mubr.msk.bf16.gmra.mrb[248].mxu0 %vm392_vm5, %v14356_v42  ;;  %11679 = vmatprep.mubr.msk.bf16.mxu1 %vm392_vm5, %v14386_v58 }
 0x6b4   : > { %11453 = vmatprep.mubr.msk.bf16.mxu0 %vm392_vm5, %v14386_v58 }
 0x6ba   : > { %11680 = vmatmul.mubr.msk.bf16.gmra.mrb[240].mxu1 %vm392_vm5, %v14392_v38 }
 0x6bb   : > { %11454 = vmatmul.mubr.msk.bf16.gmra.mrb[252].mxu0 %vm392_vm5, %v14392_v38  ;;  %11683 = vmatprep.mubr.msk.bf16.mxu1 %vm392_vm5, %v14412_v35 }
 0x6bc   : > { %11459 = vmatprep.mubr.msk.bf16.mxu0 %vm392_vm5, %v5741_v57 }
 0x6c2   : > { %11684 = vmatmul.mubr.msk.bf16.gmra.mrb[244].mxu1 %vm392_vm5, %v14423_v7 }
 0x6c3   : > { %11460 = vmatmul.mubr.msk.bf16.vlgmr.msra.gmra.mrb[224].mxu0 %vm392_vm5, %v5742_v61  ;;  %11687 = vmatprep.mubr.msk.bf16.mxu1 %vm392_vm5, %v14445_v51 }
 0x6c4   : > { %11463 = vmatprep.mubr.msk.bf16.mxu0 %vm392_vm5, %v14354_v19  ;;  %11492 = vmatpush3.bf16.msra.mxu0 %v12706_v6 }
 0x6ca   : > { %11688 = vmatmul.mubr.msk.bf16.gmra.mrb[248].mxu1 %vm392_vm5, %v14601_v54 }
 0x6cb   : > { %11464 = vmatmul.mubr.msk.bf16.gmra.mrb[228].mxu0 %vm392_vm5, %v14466_v41  ;;  %11691 = vmatprep.mubr.msk.bf16.mxu1 %vm392_vm5, %v14675_v62 }
 0x6cc   : > { %11467 = vmatprep.mubr.msk.bf16.mxu0 %vm392_vm5, %v14475_v0 }
 0x6d2   : > { %11692 = vmatmul.mubr.msk.bf16.gmra.mrb[252].mxu1 %vm392_vm5, %v14744_v22 }
 0x6d3   : > { %11468 = vmatmul.mubr.msk.bf16.gmra.mrb[232].mxu0 %vm392_vm5, %v14273_v48  ;;  %11697 = vmatprep.mubr.msk.bf16.mxu1 %vm392_vm5, %v14279_v1  ;;  %v14780_v48 = vld [vmem:[#allocation2 + $0xa0] sm:$0xff] }
 0x6d4   : > { %11471 = vmatprep.mubr.msk.bf16.mxu0 %vm392_vm5, %v14279_v1  ;;  %v6012_v1 = vld [vmem:[#allocation2 + $0x60] sm:$0xff] }
 0x6da   : > { %11698 = vmatmul.mubr.msk.bf16.vlgmr.msra.gmra.mrb[224].mxu1 %vm392_vm5, %v14299_v60 }
 0x6db   : > { %11472 = vmatmul.mubr.msk.bf16.gmra.mrb[236].mxu0 %vm392_vm5, %v14299_v60  ;;  %11701 = vmatprep.mubr.msk.bf16.mxu1 %vm392_vm5, %v14310_v33  ;;  %v14812_v60 = vld [vmem:[#allocation2 + $0x160] sm:$0xff]  ;;  %v6013_v33 = vld [vmem:[#allocation2 + $0x68] sm:$0xff] }
 0x6dc   : > { %11730 = vmatpush3.bf16.msra.mxu1 %v12705_v12  ;;  %11475 = vmatprep.mubr.msk.bf16.mxu0 %vm392_vm5, %v5483_v2 }
 0x6dd   : > { %11763 = vmatprep.subr.bf16.mxu1 %v12707_v63 }
 0x6e2   : > { %11702 = vmatmul.mubr.msk.bf16.gmra.mrb[228].mxu1 %vm392_vm5, %v14332_v15  ;;  %v8062_v15 = vld [vmem:[#allocation2 + $0x70] sm:$0xff] }
 0x6e3   : > { %11476 = vmatmul.mubr.msk.bf16.gmra.mrb[240].mxu0 %vm392_vm5, %v14700_v34  ;;  %11705 = vmatprep.mubr.msk.bf16.mxu1 %vm392_vm5, %v14564_v44 }
 0x6e4   : > { %11479 = vmatprep.mubr.msk.bf16.mxu0 %vm392_vm5, %v14338_v14  ;;  %v8063_v14 = vld [vmem:[#allocation2 + $0x78] sm:$0xff] }
 0x6ea   : > { %11706 = vmatmul.mubr.msk.bf16.gmra.mrb[232].mxu1 %vm392_vm5, %v14638_v32 }
 0x6eb   : > { %11480 = vmatmul.mubr.msk.bf16.gmra.mrb[244].mxu0 %vm392_vm5, %v14349_v21  ;;  %11709 = vmatprep.mubr.msk.bf16.mxu1 %vm392_vm5, %v14712_v8  ;;  %v12708_v21 = vld [vmem:[%s15253_s7 + $0x40] sm:$0xff]  }
 0x6ec   : > { %11483 = vmatprep.mubr.msk.bf16.mxu0 %vm392_vm5, %v14356_v42  ;;  %v6017_v42 = vld [vmem:[#allocation2 + $0x108] sm:$0xff] }
 0x6f2   : > { %11710 = vmatmul.mubr.msk.bf16.gmra.mrb[236].mxu1 %vm392_vm5, %v14780_v48 }
 0x6f3   : > { %11484 = vmatmul.mubr.msk.bf16.gmra.mrb[248].mxu0 %vm392_vm5, %v14386_v58  ;;  %11713 = vmatprep.mubr.msk.bf16.mxu1 %vm392_vm5, %v14392_v38 }
 0x6f4   : > { %11487 = vmatprep.mubr.msk.bf16.mxu0 %vm392_vm5, %v14392_v38 }
 0x6fa   : > { %11714 = vmatmul.mubr.msk.bf16.gmra.mrb[240].mxu1 %vm392_vm5, %v14412_v35 }
 0x6fb   : > { %11488 = vmatmul.mubr.msk.bf16.gmra.mrb[252].mxu0 %vm392_vm5, %v14412_v35  ;;  %11717 = vmatprep.mubr.msk.bf16.mxu1 %vm392_vm5, %v14423_v7 }
 0x6fc   : > { %11493 = vmatprep.mubr.msk.bf16.mxu0 %vm392_vm5, %v5742_v61 }
 0x702   : > { %11718 = vmatmul.mubr.msk.bf16.gmra.mrb[244].mxu1 %vm392_vm5, %v14445_v51 }
 0x703   : > { %11494 = vmatmul.mubr.msk.bf16.vlgmr.msra.gmra.mrb[224].mxu0 %vm392_vm5, %v14354_v19  ;;  %11721 = vmatprep.mubr.msk.bf16.mxu1 %vm392_vm5, %v14601_v54  ;;  %v8064_v19 = vld [vmem:[#allocation2 + $0x80] sm:$0xff] }
 0x704   : > { %11497 = vmatprep.mubr.msk.bf16.mxu0 %vm392_vm5, %v14466_v41 }
 0x70a   : > { %11722 = vmatmul.mubr.msk.bf16.gmra.mrb[248].mxu1 %vm392_vm5, %v14675_v62 }
 0x70b   : > { %11498 = vmatmul.mubr.msk.bf16.gmra.mrb[228].mxu0 %vm392_vm5, %v14475_v0  ;;  %11725 = vmatprep.mubr.msk.bf16.mxu1 %vm392_vm5, %v14744_v22 }
 0x70c   : > { %11501 = vmatprep.mubr.msk.bf16.mxu0 %vm392_vm5, %v6012_v1 }
 0x712   : > { %11726 = vmatmul.mubr.msk.bf16.gmra.mrb[252].mxu1 %vm392_vm5, %v14812_v60 }
 0x713   : > { %11502 = vmatmul.mubr.msk.bf16.gmra.mrb[232].mxu0 %vm392_vm5, %v6013_v33  ;;  %11731 = vmatprep.mubr.msk.bf16.mxu1 %vm392_vm5, %v8062_v15 }
 0x714   : > { %11505 = vmatprep.mubr.msk.bf16.mxu0 %vm392_vm5, %v8062_v15 }
 0x71a   : > { %11732 = vmatmul.mubr.msk.bf16.vlgmr.msra.gmra.mrb[224].mxu1 %vm392_vm5, %v8063_v14 }
 0x71b   : > { %11506 = vmatmul.mubr.msk.bf16.gmra.mrb[236].mxu0 %vm392_vm5, %v8063_v14  ;;  %11735 = vmatprep.mubr.msk.bf16.mxu1 %vm392_vm5, %v8064_v19 }
 0x71c   : > { %11764 = vmatpush3.bf16.msra.mxu1 %v12707_v63  ;;  %11509 = vmatprep.mubr.msk.bf16.mxu0 %vm392_vm5, %v14700_v34 }
 0x71d   : > { %11797 = vmatprep.subr.bf16.mxu1 %v12708_v21 }
 0x722   : > { %11736 = vmatmul.mubr.msk.bf16.gmra.mrb[228].mxu1 %vm392_vm5, %v14564_v44 }
 0x723   : > { %11510 = vmatmul.mubr.msk.bf16.gmra.mrb[240].mxu0 %vm392_vm5, %v6017_v42  ;;  %11739 = vmatprep.mubr.msk.bf16.mxu1 %vm392_vm5, %v14638_v32 }
 0x724   : > { %11513 = vmatprep.mubr.msk.bf16.mxu0 %vm392_vm5, %v6018_v59 }
 0x72a   : > { %11740 = vmatmul.mubr.msk.bf16.gmra.mrb[232].mxu1 %vm392_vm5, %v14712_v8 }
 0x72b   : > { %11514 = vmatmul.mubr.msk.bf16.gmra.mrb[244].mxu0 %vm392_vm5, %v6019_v13  ;;  %11743 = vmatprep.mubr.msk.bf16.mxu1 %vm392_vm5, %v14780_v48 }
 0x72c   : > { %11517 = vmatprep.mubr.msk.bf16.mxu0 %vm392_vm5, %v14386_v58  ;;  %v8077_v58 = vld [vmem:[#allocation2 + $0x168] sm:$0xff] }
 0x732   : > { %11744 = vmatmul.mubr.msk.bf16.gmra.mrb[236].mxu1 %vm392_vm5, %v8069_v3 }
 0x733   : > { %11518 = vmatmul.mubr.msk.bf16.gmra.mrb[248].mxu0 %vm392_vm5, %v14392_v38  ;;  %11747 = vmatprep.mubr.msk.bf16.mxu1 %vm392_vm5, %v14412_v35  ;;  %v8335_v38 = vld [vmem:[#allocation2 + $0xb0] sm:$0xff] }
 0x734   : > { %11521 = vmatprep.mubr.msk.bf16.mxu0 %vm392_vm5, %v14412_v35  ;;  %v8343_v35 = vld [vmem:[#allocation2 + $0x170] sm:$0xff] }
 0x73a   : > { %11748 = vmatmul.mubr.msk.bf16.gmra.mrb[240].mxu1 %vm392_vm5, %v14423_v7 }
 0x73b   : > { %11522 = vmatmul.mubr.msk.bf16.gmra.mrb[252].mxu0 %vm392_vm5, %v14423_v7  ;;  %11751 = vmatprep.mubr.msk.bf16.mxu1 %vm392_vm5, %v14445_v51 }
 0x742   : > { %11752 = vmatmul.mubr.msk.bf16.gmra.mrb[244].mxu1 %vm392_vm5, %v14601_v54 }
 0x743   : > { %11755 = vmatprep.mubr.msk.bf16.mxu1 %vm392_vm5, %v14675_v62 }
 0x74a   : > { %11756 = vmatmul.mubr.msk.bf16.gmra.mrb[248].mxu1 %vm392_vm5, %v14744_v22 }
 0x74b   : > { %11759 = vmatprep.mubr.msk.bf16.mxu1 %vm392_vm5, %v14812_v60 }
 0x752   : > { %11760 = vmatmul.mubr.msk.bf16.gmra.mrb[252].mxu1 %vm392_vm5, %v8077_v58 }
 0x753   : > { %11765 = vmatprep.mubr.msk.bf16.mxu1 %vm392_vm5, %v8063_v14 }
 0x75a   : > { %11766 = vmatmul.mubr.msk.bf16.vlgmr.msra.gmra.mrb[224].mxu1 %vm392_vm5, %v8064_v19 }
 0x75b   : > { %11769 = vmatprep.mubr.msk.bf16.mxu1 %vm392_vm5, %v14564_v44  ;;  %11798 = vmatpush3.bf16.msra.mxu1 %v12708_v21 }
 0x762   : > { %11770 = vmatmul.mubr.msk.bf16.gmra.mrb[228].mxu1 %vm392_vm5, %v14638_v32 }
 0x763   : > { %11773 = vmatprep.mubr.msk.bf16.mxu1 %vm392_vm5, %v14712_v8 }
 0x76a   : > { %11774 = vmatmul.mubr.msk.bf16.gmra.mrb[232].mxu1 %vm392_vm5, %v14780_v48 }
 0x76b   : > { %11777 = vmatprep.mubr.msk.bf16.mxu1 %vm392_vm5, %v8069_v3 }
 0x772   : > { %11778 = vmatmul.mubr.msk.bf16.gmra.mrb[236].mxu1 %vm392_vm5, %v8335_v38 }
 0x773   : > { %11781 = vmatprep.mubr.msk.bf16.mxu1 %vm392_vm5, %v14423_v7  ;;  %v8601_v7 = vld [vmem:[#allocation2 + $0xb8] sm:$0xff] }
 0x77a   : > { %11782 = vmatmul.mubr.msk.bf16.gmra.mrb[240].mxu1 %vm392_vm5, %v14445_v51 }
 0x77b   : > { %11785 = vmatprep.mubr.msk.bf16.mxu1 %vm392_vm5, %v14601_v54 }
 0x782   : > { %11786 = vmatmul.mubr.msk.bf16.gmra.mrb[244].mxu1 %vm392_vm5, %v14675_v62 }
 0x783   : > { %11789 = vmatprep.mubr.msk.bf16.mxu1 %vm392_vm5, %v14744_v22 }
 0x78a   : > { %11790 = vmatmul.mubr.msk.bf16.gmra.mrb[248].mxu1 %vm392_vm5, %v14812_v60 }
 0x78b   : > { %11793 = vmatprep.mubr.msk.bf16.mxu1 %vm392_vm5, %v8077_v58 }
 0x792   : > { %11794 = vmatmul.mubr.msk.bf16.gmra.mrb[252].mxu1 %vm392_vm5, %v8343_v35 }
 0x793   : > { %11799 = vmatprep.mubr.msk.bf16.mxu1 %vm392_vm5, %v8064_v19 }
 0x79a   : > { %11800 = vmatmul.mubr.msk.bf16.vlgmr.msra.gmra.mrb[224].mxu1 %vm392_vm5, %v14564_v44 }
 0x79b   : > { %11803 = vmatprep.mubr.msk.bf16.mxu1 %vm392_vm5, %v14638_v32 }
 0x7a2   : > { %11804 = vmatmul.mubr.msk.bf16.gmra.mrb[228].mxu1 %vm392_vm5, %v14712_v8 }
 0x7a3   : > { %11807 = vmatprep.mubr.msk.bf16.mxu1 %vm392_vm5, %v14780_v48 }
 0x7aa   : > { %11808 = vmatmul.mubr.msk.bf16.gmra.mrb[232].mxu1 %vm392_vm5, %v8069_v3 }
 0x7ab   : > { %11811 = vmatprep.mubr.msk.bf16.mxu1 %vm392_vm5, %v8335_v38 }
 0x7b2   : > { %11812 = vmatmul.mubr.msk.bf16.gmra.mrb[236].mxu1 %vm392_vm5, %v8601_v7 }
 0x7b3   : > { %11815 = vmatprep.mubr.msk.bf16.mxu1 %vm392_vm5, %v14445_v51 }
 0x7ba   : > { %11816 = vmatmul.mubr.msk.bf16.gmra.mrb[240].mxu1 %vm392_vm5, %v14601_v54 }
 0x7bb   : > { %11819 = vmatprep.mubr.msk.bf16.mxu1 %vm392_vm5, %v14675_v62 }
 0x7c2   : > { %11820 = vmatmul.mubr.msk.bf16.gmra.mrb[244].mxu1 %vm392_vm5, %v14744_v22 }
 0x7c3   : > { %11823 = vmatprep.mubr.msk.bf16.mxu1 %vm392_vm5, %v14812_v60 }
 0x7ca   : > { %11824 = vmatmul.mubr.msk.bf16.gmra.mrb[248].mxu1 %vm392_vm5, %v8077_v58 }
 0x7cb   : > { %11827 = vmatprep.mubr.msk.bf16.mxu1 %vm392_vm5, %v8343_v35 }
 0x7d2   : > { %11828 = vmatmul.mubr.msk.bf16.gmra.mrb[252].mxu1 %vm392_vm5, %v8609_v39 }
 0x7d6   : > { %v11495_v28 = vpop.f32.mrb[224].mxu0 }
 0x7d7   : > { %v6276_v27 = vmul.f32 %v11495_v28, %v14916_v56  ;;  %v6115_v18 = vpop.f32.mrb[225].mxu0 }
 0x7d8   : > { %v6274_v23 = vmul.f32 %v6115_v18, %v14916_v56  ;;  %v11496_v30 = vpop.f32.mrb[226].mxu0 }
 0x7d9   : > { %v6308_v31 = vadd.f32 %v6276_v27, %v14922_v25  ;;  %v6277_v17 = vmul.f32 %v11496_v30, %v14927_v4  ;;  %v6118_v49 = vpop.f32.mrb[227].mxu0 }
 0x7da   : > { %v6306_v45 = vadd.f32 %v6274_v23, %v14922_v25  ;;  %v6275_v43 = vmul.f32 %v6118_v49, %v14927_v4 }
 0x7db   : > { %v6340_v40 = vmax.f32 %v6308_v31, 0.0  ;;  %v6309_v51 = vadd.f32 %v6277_v17, %v14934_v16 }
 0x7dc   : > { %v6338_v29 = vmax.f32 %v6306_v45, 0.0  ;;  %v6307_v10 = vadd.f32 %v6275_v43, %v14934_v16 }
 0x7dd   : > { %v9916_v26 = vpack.c.bf16 %v6340_v40, %v6340_v40  ;;  %v6341_v9 = vmax.f32 %v6309_v51, 0.0 }
 0x7de   : > { %v9914_v55 = vpack.c.bf16 %v6338_v29, %v6338_v29  ;;  %v6339_v11 = vmax.f32 %v6307_v10, 0.0  ;;  %v11499_v50 = vpop.f32.mrb[228].mxu0 }
 0x7df   : > { %6501 = vst.msk [vmem:[%s14944_s27 + $0x8] sm:$0xf] %vm6498_vm6, %v9916_v26  ;;  %v9917_v20 = vpack.c.bf16 %v6341_v9, %v6341_v9  ;;  %v6280_v37 = vmul.f32 %v11499_v50, %v14916_v56  ;;  %v6131_v52 = vpop.f32.mrb[229].mxu0 }
 0x7e0   : > { %6499 = vst.msk [vmem:[%s14944_s27] sm:$0xf] %vm6498_vm6, %v9914_v55  ;;  %v9915_v24 = vpack.c.bf16 %v6339_v11, %v6339_v11  ;;  %v6278_v41 = vmul.f32 %v6131_v52, %v14916_v56  ;;  %v11500_v0 = vpop.f32.mrb[230].mxu0 }
 0x7e1   : > { %6502 = vst.msk [vmem:[%s14944_s27 + $0xc] sm:$0xf] %vm6498_vm6, %v9917_v20  ;;  %v6312_v46 = vadd.f32 %v6280_v37, %v14922_v25  ;;  %v6281_v53 = vmul.f32 %v11500_v0, %v14927_v4  ;;  %v6134_v44 = vpop.f32.mrb[231].mxu0 }
 0x7e2   : > { %6500 = vst.msk [vmem:[%s14944_s27 + $0x4] sm:$0xf] %vm6498_vm6, %v9915_v24  ;;  %v6310_v36 = vadd.f32 %v6278_v41, %v14922_v25  ;;  %v6279_v54 = vmul.f32 %v6134_v44, %v14927_v4 }
 0x7e3   : > { %v6344_v5 = vmax.f32 %v6312_v46, 0.0  ;;  %v6313_v32 = vadd.f32 %v6281_v53, %v14934_v16 }
 0x7e4   : > { %v6342_v6 = vmax.f32 %v6310_v36, 0.0  ;;  %v6311_v62 = vadd.f32 %v6279_v54, %v14934_v16 }
 0x7e5   : > { %v9920_v12 = vpack.c.bf16 %v6344_v5, %v6344_v5  ;;  %v6345_v47 = vmax.f32 %v6313_v32, 0.0 }
 0x7e6   : > { %v9918_v2 = vpack.c.bf16 %v6342_v6, %v6342_v6  ;;  %v6343_v34 = vmax.f32 %v6311_v62, 0.0  ;;  %v11503_v8 = vpop.f32.mrb[232].mxu0 }
 0x7e7   : > { %6505 = vst.msk [vmem:[%s14944_s27 + $0x18] sm:$0xf] %vm6498_vm6, %v9920_v12  ;;  %v9921_v57 = vpack.c.bf16 %v6345_v47, %v6345_v47  ;;  %v6284_v61 = vmul.f32 %v11503_v8, %v14916_v56  ;;  %v6147_v22 = vpop.f32.mrb[233].mxu0 }
 0x7e8   : > { %6503 = vst.msk [vmem:[%s14944_s27 + $0x10] sm:$0xf] %vm6498_vm6, %v9918_v2  ;;  %v9919_v63 = vpack.c.bf16 %v6343_v34, %v6343_v34  ;;  %v6282_v48 = vmul.f32 %v6147_v22, %v14916_v56  ;;  %v11504_v1 = vpop.f32.mrb[234].mxu0 }
 0x7e9   : > { %6506 = vst.msk [vmem:[%s14944_s27 + $0x1c] sm:$0xf] %vm6498_vm6, %v9921_v57  ;;  %v6316_v60 = vadd.f32 %v6284_v61, %v14922_v25  ;;  %v6285_v33 = vmul.f32 %v11504_v1, %v14927_v4  ;;  %v6150_v15 = vpop.f32.mrb[235].mxu0 }
 0x7ea   : > { %6504 = vst.msk [vmem:[%s14944_s27 + $0x14] sm:$0xf] %vm6498_vm6, %v9919_v63  ;;  %v6314_v14 = vadd.f32 %v6282_v48, %v14922_v25  ;;  %v6283_v21 = vmul.f32 %v6150_v15, %v14927_v4 }
 0x7eb   : > { %v6348_v19 = vmax.f32 %v6316_v60, 0.0  ;;  %v6317_v42 = vadd.f32 %v6285_v33, %v14934_v16 }
 0x7ec   : > { %v6346_v59 = vmax.f32 %v6314_v14, 0.0  ;;  %v6315_v13 = vadd.f32 %v6283_v21, %v14934_v16 }
 0x7ed   : > { %v9924_v3 = vpack.c.bf16 %v6348_v19, %v6348_v19  ;;  %v6349_v58 = vmax.f32 %v6317_v42, 0.0 }
 0x7ee   : > { %v9922_v38 = vpack.c.bf16 %v6346_v59, %v6346_v59  ;;  %v6347_v35 = vmax.f32 %v6315_v13, 0.0  ;;  %v11507_v7 = vpop.f32.mrb[236].mxu0 }
 0x7ef   : > { %6509 = vst.msk [vmem:[%s14944_s27 + $0x28] sm:$0xf] %vm6498_vm6, %v9924_v3  ;;  %v9925_v39 = vpack.c.bf16 %v6349_v58, %v6349_v58  ;;  %v6288_v28 = vmul.f32 %v11507_v7, %v14916_v56  ;;  %v6163_v27 = vpop.f32.mrb[237].mxu0 }
 0x7f0   : > { %6507 = vst.msk [vmem:[%s14944_s27 + $0x20] sm:$0xf] %vm6498_vm6, %v9922_v38  ;;  %v9923_v18 = vpack.c.bf16 %v6347_v35, %v6347_v35  ;;  %v6286_v23 = vmul.f32 %v6163_v27, %v14916_v56  ;;  %v11508_v30 = vpop.f32.mrb[238].mxu0 }
 0x7f1   : > { %6510 = vst.msk [vmem:[%s14944_s27 + $0x2c] sm:$0xf] %vm6498_vm6, %v9925_v39  ;;  %v6320_v31 = vadd.f32 %v6288_v28, %v14922_v25  ;;  %v6289_v17 = vmul.f32 %v11508_v30, %v14927_v4  ;;  %v6166_v49 = vpop.f32.mrb[239].mxu0 }
 0x7f2   : > { %6508 = vst.msk [vmem:[%s14944_s27 + $0x24] sm:$0xf] %vm6498_vm6, %v9923_v18  ;;  %v6318_v45 = vadd.f32 %v6286_v23, %v14922_v25  ;;  %v6287_v43 = vmul.f32 %v6166_v49, %v14927_v4 }
 0x7f3   : > { %v6352_v40 = vmax.f32 %v6320_v31, 0.0  ;;  %v6321_v51 = vadd.f32 %v6289_v17, %v14934_v16 }
 0x7f4   : > { %v6350_v29 = vmax.f32 %v6318_v45, 0.0  ;;  %v6319_v10 = vadd.f32 %v6287_v43, %v14934_v16 }
 0x7f5   : > { %v9928_v26 = vpack.c.bf16 %v6352_v40, %v6352_v40  ;;  %v6353_v9 = vmax.f32 %v6321_v51, 0.0 }
 0x7f6   : > { %v9926_v55 = vpack.c.bf16 %v6350_v29, %v6350_v29  ;;  %v6351_v11 = vmax.f32 %v6319_v10, 0.0  ;;  %v11511_v50 = vpop.f32.mrb[240].mxu0 }
 0x7f7   : > { %6513 = vst.msk [vmem:[%s14944_s27 + $0x38] sm:$0xf] %vm6498_vm6, %v9928_v26  ;;  %v9929_v20 = vpack.c.bf16 %v6353_v9, %v6353_v9  ;;  %v6292_v37 = vmul.f32 %v11511_v50, %v14916_v56  ;;  %v6179_v52 = vpop.f32.mrb[241].mxu0 }
 0x7f8   : > { %6511 = vst.msk [vmem:[%s14944_s27 + $0x30] sm:$0xf] %vm6498_vm6, %v9926_v55  ;;  %v9927_v24 = vpack.c.bf16 %v6351_v11, %v6351_v11  ;;  %v6290_v41 = vmul.f32 %v6179_v52, %v14916_v56  ;;  %v11512_v0 = vpop.f32.mrb[242].mxu0 }
 0x7f9   : > { %6514 = vst.msk [vmem:[%s14944_s27 + $0x3c] sm:$0xf] %vm6498_vm6, %v9929_v20  ;;  %v6324_v46 = vadd.f32 %v6292_v37, %v14922_v25  ;;  %v6293_v53 = vmul.f32 %v11512_v0, %v14927_v4  ;;  %v6182_v44 = vpop.f32.mrb[243].mxu0 }
 0x7fa   : > { %6512 = vst.msk [vmem:[%s14944_s27 + $0x34] sm:$0xf] %vm6498_vm6, %v9927_v24  ;;  %v6322_v36 = vadd.f32 %v6290_v41, %v14922_v25  ;;  %v6291_v54 = vmul.f32 %v6182_v44, %v14927_v4 }
 0x7fb   : > { %v6356_v5 = vmax.f32 %v6324_v46, 0.0  ;;  %v6325_v32 = vadd.f32 %v6293_v53, %v14934_v16 }
 0x7fc   : > { %v6354_v6 = vmax.f32 %v6322_v36, 0.0  ;;  %v6323_v62 = vadd.f32 %v6291_v54, %v14934_v16 }
 0x7fd   : > { %v9932_v12 = vpack.c.bf16 %v6356_v5, %v6356_v5  ;;  %v6357_v47 = vmax.f32 %v6325_v32, 0.0 }
 0x7fe   : > { %v9930_v2 = vpack.c.bf16 %v6354_v6, %v6354_v6  ;;  %v6355_v34 = vmax.f32 %v6323_v62, 0.0  ;;  %v11515_v8 = vpop.f32.mrb[244].mxu0 }
 0x7ff   : > { %6517 = vst.msk [vmem:[%s14944_s27 + $0x88] sm:$0xf] %vm6498_vm6, %v9932_v12  ;;  %v9933_v57 = vpack.c.bf16 %v6357_v47, %v6357_v47  ;;  %v6296_v61 = vmul.f32 %v11515_v8, %v14916_v56  ;;  %v6195_v22 = vpop.f32.mrb[245].mxu0 }
 0x800   : > { %6515 = vst.msk [vmem:[%s14944_s27 + $0x80] sm:$0xf] %vm6498_vm6, %v9930_v2  ;;  %v9931_v63 = vpack.c.bf16 %v6355_v34, %v6355_v34  ;;  %v6294_v48 = vmul.f32 %v6195_v22, %v14916_v56  ;;  %v11516_v1 = vpop.f32.mrb[246].mxu0 }
 0x801   : > { %6518 = vst.msk [vmem:[%s14944_s27 + $0x8c] sm:$0xf] %vm6498_vm6, %v9933_v57  ;;  %v6328_v60 = vadd.f32 %v6296_v61, %v14922_v25  ;;  %v6297_v33 = vmul.f32 %v11516_v1, %v14927_v4  ;;  %v6198_v15 = vpop.f32.mrb[247].mxu0 }
 0x802   : > { %6516 = vst.msk [vmem:[%s14944_s27 + $0x84] sm:$0xf] %vm6498_vm6, %v9931_v63  ;;  %v6326_v14 = vadd.f32 %v6294_v48, %v14922_v25  ;;  %v6295_v21 = vmul.f32 %v6198_v15, %v14927_v4 }
 0x803   : > { %v6360_v19 = vmax.f32 %v6328_v60, 0.0  ;;  %v6329_v42 = vadd.f32 %v6297_v33, %v14934_v16 }
 0x804   : > { %v6358_v59 = vmax.f32 %v6326_v14, 0.0  ;;  %v6327_v13 = vadd.f32 %v6295_v21, %v14934_v16 }
 0x805   : > { %v9936_v3 = vpack.c.bf16 %v6360_v19, %v6360_v19  ;;  %v6361_v58 = vmax.f32 %v6329_v42, 0.0 }
 0x806   : > { %v9934_v38 = vpack.c.bf16 %v6358_v59, %v6358_v59  ;;  %v6359_v35 = vmax.f32 %v6327_v13, 0.0  ;;  %v11519_v7 = vpop.f32.mrb[248].mxu0 }
 0x807   : > { %6521 = vst.msk [vmem:[%s14944_s27 + $0x98] sm:$0xf] %vm6498_vm6, %v9936_v3  ;;  %v9937_v39 = vpack.c.bf16 %v6361_v58, %v6361_v58  ;;  %v6300_v28 = vmul.f32 %v11519_v7, %v14916_v56  ;;  %v6211_v27 = vpop.f32.mrb[249].mxu0 }
 0x808   : > { %6519 = vst.msk [vmem:[%s14944_s27 + $0x90] sm:$0xf] %vm6498_vm6, %v9934_v38  ;;  %v9935_v18 = vpack.c.bf16 %v6359_v35, %v6359_v35  ;;  %v6298_v23 = vmul.f32 %v6211_v27, %v14916_v56  ;;  %v11520_v30 = vpop.f32.mrb[250].mxu0 }
 0x809   : > { %6522 = vst.msk [vmem:[%s14944_s27 + $0x9c] sm:$0xf] %vm6498_vm6, %v9937_v39  ;;  %v6332_v31 = vadd.f32 %v6300_v28, %v14922_v25  ;;  %v6301_v17 = vmul.f32 %v11520_v30, %v14927_v4  ;;  %v6214_v49 = vpop.f32.mrb[251].mxu0 }
 0x80a   : > { %6520 = vst.msk [vmem:[%s14944_s27 + $0x94] sm:$0xf] %vm6498_vm6, %v9935_v18  ;;  %v6330_v45 = vadd.f32 %v6298_v23, %v14922_v25  ;;  %v6299_v43 = vmul.f32 %v6214_v49, %v14927_v4 }
 0x80b   : > { %v6364_v40 = vmax.f32 %v6332_v31, 0.0  ;;  %v6333_v51 = vadd.f32 %v6301_v17, %v14934_v16 }
 0x80c   : > { %v6362_v29 = vmax.f32 %v6330_v45, 0.0  ;;  %v6331_v10 = vadd.f32 %v6299_v43, %v14934_v16 }
 0x80d   : > { %v9940_v26 = vpack.c.bf16 %v6364_v40, %v6364_v40  ;;  %v6365_v9 = vmax.f32 %v6333_v51, 0.0 }
 0x80e   : > { %v9938_v55 = vpack.c.bf16 %v6362_v29, %v6362_v29  ;;  %v6363_v11 = vmax.f32 %v6331_v10, 0.0  ;;  %v11523_v50 = vpop.f32.mrb[252].mxu0 }
 0x80f   : > { %6525 = vst.msk [vmem:[%s14944_s27 + $0xa8] sm:$0xf] %vm6498_vm6, %v9940_v26  ;;  %v9941_v20 = vpack.c.bf16 %v6365_v9, %v6365_v9  ;;  %v6304_v37 = vmul.f32 %v11523_v50, %v14916_v56  ;;  %v6227_v52 = vpop.f32.mrb[253].mxu0 }
 0x810   : > { %6523 = vst.msk [vmem:[%s14944_s27 + $0xa0] sm:$0xf] %vm6498_vm6, %v9938_v55  ;;  %v9939_v24 = vpack.c.bf16 %v6363_v11, %v6363_v11  ;;  %v6302_v41 = vmul.f32 %v6227_v52, %v14916_v56  ;;  %v11524_v0 = vpop.f32.mrb[254].mxu0 }
 0x811   : > { %6526 = vst.msk [vmem:[%s14944_s27 + $0xac] sm:$0xf] %vm6498_vm6, %v9941_v20  ;;  %v6336_v46 = vadd.f32 %v6304_v37, %v14922_v25  ;;  %v6305_v53 = vmul.f32 %v11524_v0, %v14927_v4  ;;  %v6230_v44 = vpop.f32.mrb[255].mxu0 }
 0x812   : > { %6524 = vst.msk [vmem:[%s14944_s27 + $0xa4] sm:$0xf] %vm6498_vm6, %v9939_v24  ;;  %v6334_v36 = vadd.f32 %v6302_v41, %v14922_v25  ;;  %v6303_v54 = vmul.f32 %v6230_v44, %v14927_v4 }
 0x813   : > { %v6368_v5 = vmax.f32 %v6336_v46, 0.0  ;;  %v6337_v32 = vadd.f32 %v6305_v53, %v14934_v16 }
 0x814   : > { %v6366_v6 = vmax.f32 %v6334_v36, 0.0  ;;  %v6335_v62 = vadd.f32 %v6303_v54, %v14934_v16 }
 0x815   : > { %v9944_v12 = vpack.c.bf16 %v6368_v5, %v6368_v5  ;;  %v6369_v47 = vmax.f32 %v6337_v32, 0.0 }
 0x816   : > { %v9942_v2 = vpack.c.bf16 %v6366_v6, %v6366_v6  ;;  %v6367_v34 = vmax.f32 %v6335_v62, 0.0 }
 0x817   : > { %6529 = vst.msk [vmem:[%s14944_s27 + $0xb8] sm:$0xf] %vm6498_vm6, %v9944_v12  ;;  %v9945_v8 = vpack.c.bf16 %v6369_v47, %v6369_v47 }
 0x818   : > { %6527 = vst.msk [vmem:[%s14944_s27 + $0xb0] sm:$0xf] %vm6498_vm6, %v9942_v2  ;;  %v9943_v57 = vpack.c.bf16 %v6367_v34, %v6367_v34 }
 0x819   : > { %6530 = vst.msk [vmem:[%s14944_s27 + $0xbc] sm:$0xf] %vm6498_vm6, %v9945_v8 }
 0x81a   : > { %6528 = vst.msk [vmem:[%s14944_s27 + $0xb4] sm:$0xf] %vm6498_vm6, %v9943_v57 }
 0x86d   : > { %v11801_v61 = vpop.f32.mrb[224].mxu1 }
 0x86e   : > { %v8861_v22 = vmul.f32 %v11801_v61, %v14916_v56  ;;  %v8700_v63 = vpop.f32.mrb[225].mxu1 }
 0x86f   : > { %v8859_v48 = vmul.f32 %v8700_v63, %v14916_v56  ;;  %v11802_v1 = vpop.f32.mrb[226].mxu1 }
 0x870   : > { %v8893_v60 = vadd.f32 %v8861_v22, %v14922_v25  ;;  %v8862_v33 = vmul.f32 %v11802_v1, %v14927_v4  ;;  %v8703_v15 = vpop.f32.mrb[227].mxu1 }
 0x871   : > { %v8891_v14 = vadd.f32 %v8859_v48, %v14922_v25  ;;  %v8860_v21 = vmul.f32 %v8703_v15, %v14927_v4 }
 0x872   : > { %v8925_v19 = vmax.f32 %v8893_v60, 0.0  ;;  %v8894_v42 = vadd.f32 %v8862_v33, %v14934_v16 }
 0x873   : > { %v8923_v59 = vmax.f32 %v8891_v14, 0.0  ;;  %v8892_v13 = vadd.f32 %v8860_v21, %v14934_v16 }
 0x874   : > { %v9948_v3 = vpack.c.bf16 %v8925_v19, %v8925_v19  ;;  %v8926_v58 = vmax.f32 %v8894_v42, 0.0 }
 0x875   : > { %v9946_v38 = vpack.c.bf16 %v8923_v59, %v8923_v59  ;;  %v8924_v35 = vmax.f32 %v8892_v13, 0.0  ;;  %v11805_v7 = vpop.f32.mrb[228].mxu1 }
 0x876   : > { %9877 = vst.msk [vmem:[%s14944_s27 + $0x48] sm:$0xf] %vm6498_vm6, %v9948_v3  ;;  %v9949_v39 = vpack.c.bf16 %v8926_v58, %v8926_v58  ;;  %v8865_v28 = vmul.f32 %v11805_v7, %v14916_v56  ;;  %v8716_v27 = vpop.f32.mrb[229].mxu1 }
 0x877   : > { %9875 = vst.msk [vmem:[%s14944_s27 + $0x40] sm:$0xf] %vm6498_vm6, %v9946_v38  ;;  %v9947_v18 = vpack.c.bf16 %v8924_v35, %v8924_v35  ;;  %v8863_v23 = vmul.f32 %v8716_v27, %v14916_v56  ;;  %v11806_v30 = vpop.f32.mrb[230].mxu1 }
 0x878   : > { %9878 = vst.msk [vmem:[%s14944_s27 + $0x4c] sm:$0xf] %vm6498_vm6, %v9949_v39  ;;  %v8897_v31 = vadd.f32 %v8865_v28, %v14922_v25  ;;  %v8866_v17 = vmul.f32 %v11806_v30, %v14927_v4  ;;  %v8719_v49 = vpop.f32.mrb[231].mxu1 }
 0x879   : > { %9876 = vst.msk [vmem:[%s14944_s27 + $0x44] sm:$0xf] %vm6498_vm6, %v9947_v18  ;;  %v8895_v45 = vadd.f32 %v8863_v23, %v14922_v25  ;;  %v8864_v43 = vmul.f32 %v8719_v49, %v14927_v4 }
 0x87a   : > { %v8929_v40 = vmax.f32 %v8897_v31, 0.0  ;;  %v8898_v51 = vadd.f32 %v8866_v17, %v14934_v16 }
 0x87b   : > { %v8927_v29 = vmax.f32 %v8895_v45, 0.0  ;;  %v8896_v10 = vadd.f32 %v8864_v43, %v14934_v16 }
 0x87c   : > { %v9952_v26 = vpack.c.bf16 %v8929_v40, %v8929_v40  ;;  %v8930_v9 = vmax.f32 %v8898_v51, 0.0 }
 0x87d   : > { %v9950_v55 = vpack.c.bf16 %v8927_v29, %v8927_v29  ;;  %v8928_v11 = vmax.f32 %v8896_v10, 0.0  ;;  %v11809_v50 = vpop.f32.mrb[232].mxu1 }
 0x87e   : > { %9881 = vst.msk [vmem:[%s14944_s27 + $0x58] sm:$0xf] %vm6498_vm6, %v9952_v26  ;;  %v9953_v20 = vpack.c.bf16 %v8930_v9, %v8930_v9  ;;  %v8869_v37 = vmul.f32 %v11809_v50, %v14916_v56  ;;  %v8732_v52 = vpop.f32.mrb[233].mxu1 }
 0x87f   : > { %9879 = vst.msk [vmem:[%s14944_s27 + $0x50] sm:$0xf] %vm6498_vm6, %v9950_v55  ;;  %v9951_v24 = vpack.c.bf16 %v8928_v11, %v8928_v11  ;;  %v8867_v41 = vmul.f32 %v8732_v52, %v14916_v56  ;;  %v11810_v0 = vpop.f32.mrb[234].mxu1 }
 0x880   : > { %9882 = vst.msk [vmem:[%s14944_s27 + $0x5c] sm:$0xf] %vm6498_vm6, %v9953_v20  ;;  %v8901_v46 = vadd.f32 %v8869_v37, %v14922_v25  ;;  %v8870_v53 = vmul.f32 %v11810_v0, %v14927_v4  ;;  %v8735_v44 = vpop.f32.mrb[235].mxu1 }
 0x881   : > { %9880 = vst.msk [vmem:[%s14944_s27 + $0x54] sm:$0xf] %vm6498_vm6, %v9951_v24  ;;  %v8899_v36 = vadd.f32 %v8867_v41, %v14922_v25  ;;  %v8868_v54 = vmul.f32 %v8735_v44, %v14927_v4 }
 0x882   : > { %v8933_v5 = vmax.f32 %v8901_v46, 0.0  ;;  %v8902_v32 = vadd.f32 %v8870_v53, %v14934_v16 }
 0x883   : > { %v8931_v6 = vmax.f32 %v8899_v36, 0.0  ;;  %v8900_v62 = vadd.f32 %v8868_v54, %v14934_v16 }
 0x884   : > { %v9956_v12 = vpack.c.bf16 %v8933_v5, %v8933_v5  ;;  %v8934_v47 = vmax.f32 %v8902_v32, 0.0 }
 0x885   : > { %v9954_v2 = vpack.c.bf16 %v8931_v6, %v8931_v6  ;;  %v8932_v34 = vmax.f32 %v8900_v62, 0.0  ;;  %v11813_v8 = vpop.f32.mrb[236].mxu1 }
 0x886   : > { %9885 = vst.msk [vmem:[%s14944_s27 + $0x68] sm:$0xf] %vm6498_vm6, %v9956_v12  ;;  %v9957_v57 = vpack.c.bf16 %v8934_v47, %v8934_v47  ;;  %v8873_v61 = vmul.f32 %v11813_v8, %v14916_v56  ;;  %v8748_v22 = vpop.f32.mrb[237].mxu1 }
 0x887   : > { %9883 = vst.msk [vmem:[%s14944_s27 + $0x60] sm:$0xf] %vm6498_vm6, %v9954_v2  ;;  %v9955_v63 = vpack.c.bf16 %v8932_v34, %v8932_v34  ;;  %v8871_v48 = vmul.f32 %v8748_v22, %v14916_v56  ;;  %v11814_v1 = vpop.f32.mrb[238].mxu1 }
 0x888   : > { %9886 = vst.msk [vmem:[%s14944_s27 + $0x6c] sm:$0xf] %vm6498_vm6, %v9957_v57  ;;  %v8905_v60 = vadd.f32 %v8873_v61, %v14922_v25  ;;  %v8874_v33 = vmul.f32 %v11814_v1, %v14927_v4  ;;  %v8751_v15 = vpop.f32.mrb[239].mxu1 }
 0x889   : > { %9884 = vst.msk [vmem:[%s14944_s27 + $0x64] sm:$0xf] %vm6498_vm6, %v9955_v63  ;;  %v8903_v14 = vadd.f32 %v8871_v48, %v14922_v25  ;;  %v8872_v21 = vmul.f32 %v8751_v15, %v14927_v4 }
 0x88a   : > { %v8937_v19 = vmax.f32 %v8905_v60, 0.0  ;;  %v8906_v42 = vadd.f32 %v8874_v33, %v14934_v16 }
 0x88b   : > { %v8935_v59 = vmax.f32 %v8903_v14, 0.0  ;;  %v8904_v13 = vadd.f32 %v8872_v21, %v14934_v16 }
 0x88c   : > { %v9960_v3 = vpack.c.bf16 %v8937_v19, %v8937_v19  ;;  %v8938_v58 = vmax.f32 %v8906_v42, 0.0 }
 0x88d   : > { %v9958_v38 = vpack.c.bf16 %v8935_v59, %v8935_v59  ;;  %v8936_v35 = vmax.f32 %v8904_v13, 0.0  ;;  %v11817_v7 = vpop.f32.mrb[240].mxu1 }
 0x88e   : > { %9889 = vst.msk [vmem:[%s14944_s27 + $0x78] sm:$0xf] %vm6498_vm6, %v9960_v3  ;;  %v9961_v39 = vpack.c.bf16 %v8938_v58, %v8938_v58  ;;  %v8877_v28 = vmul.f32 %v11817_v7, %v14916_v56  ;;  %v8764_v27 = vpop.f32.mrb[241].mxu1 }
 0x88f   : > { %9887 = vst.msk [vmem:[%s14944_s27 + $0x70] sm:$0xf] %vm6498_vm6, %v9958_v38  ;;  %v9959_v18 = vpack.c.bf16 %v8936_v35, %v8936_v35  ;;  %v8875_v23 = vmul.f32 %v8764_v27, %v14916_v56  ;;  %v11818_v30 = vpop.f32.mrb[242].mxu1 }
 0x890   : > { %9890 = vst.msk [vmem:[%s14944_s27 + $0x7c] sm:$0xf] %vm6498_vm6, %v9961_v39  ;;  %v8909_v31 = vadd.f32 %v8877_v28, %v14922_v25  ;;  %v8878_v17 = vmul.f32 %v11818_v30, %v14927_v4  ;;  %v8767_v49 = vpop.f32.mrb[243].mxu1 }
 0x891   : > { %9888 = vst.msk [vmem:[%s14944_s27 + $0x74] sm:$0xf] %vm6498_vm6, %v9959_v18  ;;  %v8907_v45 = vadd.f32 %v8875_v23, %v14922_v25  ;;  %v8876_v43 = vmul.f32 %v8767_v49, %v14927_v4 }
 0x892   : > { %v8941_v40 = vmax.f32 %v8909_v31, 0.0  ;;  %v8910_v51 = vadd.f32 %v8878_v17, %v14934_v16 }
 0x893   : > { %v8939_v29 = vmax.f32 %v8907_v45, 0.0  ;;  %v8908_v10 = vadd.f32 %v8876_v43, %v14934_v16 }
 0x894   : > { %v9964_v26 = vpack.c.bf16 %v8941_v40, %v8941_v40  ;;  %v8942_v9 = vmax.f32 %v8910_v51, 0.0 }
 0x895   : > { %v9962_v55 = vpack.c.bf16 %v8939_v29, %v8939_v29  ;;  %v8940_v11 = vmax.f32 %v8908_v10, 0.0  ;;  %v11821_v50 = vpop.f32.mrb[244].mxu1 }
 0x896   : > { %9893 = vst.msk [vmem:[%s14944_s27 + $0xc8] sm:$0xf] %vm6498_vm6, %v9964_v26  ;;  %v9965_v20 = vpack.c.bf16 %v8942_v9, %v8942_v9  ;;  %v8881_v37 = vmul.f32 %v11821_v50, %v14916_v56  ;;  %v8780_v52 = vpop.f32.mrb[245].mxu1 }
 0x897   : > { %9891 = vst.msk [vmem:[%s14944_s27 + $0xc0] sm:$0xf] %vm6498_vm6, %v9962_v55  ;;  %v9963_v24 = vpack.c.bf16 %v8940_v11, %v8940_v11  ;;  %v8879_v41 = vmul.f32 %v8780_v52, %v14916_v56  ;;  %v11822_v0 = vpop.f32.mrb[246].mxu1 }
 0x898   : > { %9894 = vst.msk [vmem:[%s14944_s27 + $0xcc] sm:$0xf] %vm6498_vm6, %v9965_v20  ;;  %v8913_v46 = vadd.f32 %v8881_v37, %v14922_v25  ;;  %v8882_v53 = vmul.f32 %v11822_v0, %v14927_v4  ;;  %v8783_v44 = vpop.f32.mrb[247].mxu1 }
 0x899   : > { %9892 = vst.msk [vmem:[%s14944_s27 + $0xc4] sm:$0xf] %vm6498_vm6, %v9963_v24  ;;  %v8911_v36 = vadd.f32 %v8879_v41, %v14922_v25  ;;  %v8880_v54 = vmul.f32 %v8783_v44, %v14927_v4 }
 0x89a   : > { %v8945_v5 = vmax.f32 %v8913_v46, 0.0  ;;  %v8914_v32 = vadd.f32 %v8882_v53, %v14934_v16 }
 0x89b   : > { %v8943_v6 = vmax.f32 %v8911_v36, 0.0  ;;  %v8912_v62 = vadd.f32 %v8880_v54, %v14934_v16 }
 0x89c   : > { %v9968_v12 = vpack.c.bf16 %v8945_v5, %v8945_v5  ;;  %v8946_v47 = vmax.f32 %v8914_v32, 0.0 }
 0x89d   : > { %v9966_v2 = vpack.c.bf16 %v8943_v6, %v8943_v6  ;;  %v8944_v34 = vmax.f32 %v8912_v62, 0.0  ;;  %v11825_v8 = vpop.f32.mrb[248].mxu1 }
 0x89e   : > { %9897 = vst.msk [vmem:[%s14944_s27 + $0xd8] sm:$0xf] %vm6498_vm6, %v9968_v12  ;;  %v9969_v57 = vpack.c.bf16 %v8946_v47, %v8946_v47  ;;  %v8885_v61 = vmul.f32 %v11825_v8, %v14916_v56  ;;  %v8796_v22 = vpop.f32.mrb[249].mxu1 }
 0x89f   : > { %9895 = vst.msk [vmem:[%s14944_s27 + $0xd0] sm:$0xf] %vm6498_vm6, %v9966_v2  ;;  %v9967_v63 = vpack.c.bf16 %v8944_v34, %v8944_v34  ;;  %v8883_v48 = vmul.f32 %v8796_v22, %v14916_v56  ;;  %v11826_v1 = vpop.f32.mrb[250].mxu1 }
 0x8a0   : > { %9898 = vst.msk [vmem:[%s14944_s27 + $0xdc] sm:$0xf] %vm6498_vm6, %v9969_v57  ;;  %v8917_v60 = vadd.f32 %v8885_v61, %v14922_v25  ;;  %v8886_v33 = vmul.f32 %v11826_v1, %v14927_v4  ;;  %v8799_v15 = vpop.f32.mrb[251].mxu1 }
 0x8a1   : > { %9896 = vst.msk [vmem:[%s14944_s27 + $0xd4] sm:$0xf] %vm6498_vm6, %v9967_v63  ;;  %v8915_v14 = vadd.f32 %v8883_v48, %v14922_v25  ;;  %v8884_v21 = vmul.f32 %v8799_v15, %v14927_v4 }
 0x8a2   : > { %v8949_v19 = vmax.f32 %v8917_v60, 0.0  ;;  %v8918_v42 = vadd.f32 %v8886_v33, %v14934_v16 }
 0x8a3   : > { %v8947_v59 = vmax.f32 %v8915_v14, 0.0  ;;  %v8916_v13 = vadd.f32 %v8884_v21, %v14934_v16 }
 0x8a4   : > { %v9972_v3 = vpack.c.bf16 %v8949_v19, %v8949_v19  ;;  %v8950_v58 = vmax.f32 %v8918_v42, 0.0 }
 0x8a5   : > { %v9970_v38 = vpack.c.bf16 %v8947_v59, %v8947_v59  ;;  %v8948_v35 = vmax.f32 %v8916_v13, 0.0  ;;  %v11829_v7 = vpop.f32.mrb[252].mxu1 }
 0x8a6   : > { %9901 = vst.msk [vmem:[%s14944_s27 + $0xe8] sm:$0xf] %vm6498_vm6, %v9972_v3  ;;  %v9973_v39 = vpack.c.bf16 %v8950_v58, %v8950_v58  ;;  %v8889_v28 = vmul.f32 %v11829_v7, %v14916_v56  ;;  %v8812_v27 = vpop.f32.mrb[253].mxu1 }
 0x8a7   : > { %9899 = vst.msk [vmem:[%s14944_s27 + $0xe0] sm:$0xf] %vm6498_vm6, %v9970_v38  ;;  %v9971_v18 = vpack.c.bf16 %v8948_v35, %v8948_v35  ;;  %v8887_v23 = vmul.f32 %v8812_v27, %v14916_v56  ;;  %v11830_v30 = vpop.f32.mrb[254].mxu1 }
 0x8a8   : > { %9902 = vst.msk [vmem:[%s14944_s27 + $0xec] sm:$0xf] %vm6498_vm6, %v9973_v39  ;;  %v8921_v31 = vadd.f32 %v8889_v28, %v14922_v25  ;;  %v8890_v17 = vmul.f32 %v11830_v30, %v14927_v4  ;;  %v8815_v49 = vpop.f32.mrb[255].mxu1 }
 0x8a9   : > { %9900 = vst.msk [vmem:[%s14944_s27 + $0xe4] sm:$0xf] %vm6498_vm6, %v9971_v18  ;;  %v8919_v45 = vadd.f32 %v8887_v23, %v14922_v25  ;;  %v8888_v43 = vmul.f32 %v8815_v49, %v14927_v4 }
 0x8aa   : > { %v8953_v40 = vmax.f32 %v8921_v31, 0.0  ;;  %v8922_v56 = vadd.f32 %v8890_v17, %v14934_v16 }
 0x8ab   : > { %v8951_v51 = vmax.f32 %v8919_v45, 0.0  ;;  %v8920_v29 = vadd.f32 %v8888_v43, %v14934_v16 }
 0x8ac   : > { %v9976_v10 = vpack.c.bf16 %v8953_v40, %v8953_v40  ;;  %v8954_v26 = vmax.f32 %v8922_v56, 0.0 }
 0x8ad   : > { %v9974_v9 = vpack.c.bf16 %v8951_v51, %v8951_v51  ;;  %v8952_v55 = vmax.f32 %v8920_v29, 0.0 }
 0x8ae   : > { %9905 = vst.msk [vmem:[%s14944_s27 + $0xf8] sm:$0xf] %vm6498_vm6, %v9976_v10  ;;  %v9977_v25 = vpack.c.bf16 %v8954_v26, %v8954_v26 }
 0x8af   : > { %9903 = vst.msk [vmem:[%s14944_s27 + $0xf0] sm:$0xf] %vm6498_vm6, %v9974_v9  ;;  %v9975_v4 = vpack.c.bf16 %v8952_v55, %v8952_v55 }
 0x8b0   : > { %9906 = vst.msk [vmem:[%s14944_s27 + $0xfc] sm:$0xf] %vm6498_vm6, %v9977_v25 }
 0x8b1   : > { %9904 = vst.msk [vmem:[%s14944_s27 + $0xf4] sm:$0xf] %vm6498_vm6, %v9975_v4 }
 0x8b2   : > { %12758 = shalt.err (!%p12755_p7)
}
 0x8b3   : > { %s12759_s30 = scalar_lea.hbm %s15193_s26, 4096  ;;  %s12763_s12 = scalar_lea.hbm %s15256_s10, 8192 }
 0x8b4   : > { %p12760_p8 = scmp.ne.s32.totalorder %s15193_s26, %s12759_s30  ;;  %p12764_p1 = scmp.lt.u32.totalorder %s15193_s26, %s15256_s10 }
 0x8b5   : > { %p12765_p0 = scmp.lt.u32.totalorder %s12763_s12, %s12759_s30  ;;  %p12767_p6 = scmp.lt.u32.totalorder %s12759_s30, %s15193_s26 }
 0x8b6   : > { %p12761_p11 = pnand %p12760_p8, %p15466_p9 }
 0x8b7   : > { %p12766_p5 = por %p12765_p0, %p12764_p1 }
 0x8b8   : > { %p12762_p13 = pneg %p12761_p11 }
 0x8b9   : > { %p12768_p10 = por %p12767_p6, %p12766_p5 }
 0x8bb   : > { %p12769_p12 = pnand %p12768_p10, %p12762_p13 }
 0x8bd   : > { %12772 = shalt.err (!%p12769_p12)
}
 0x8be   : > { %s12821_s18 = smov 64   ;;  %s12822_s20 = smov 4  }
 0x8bf   : > { %12347 = dma.vmem_to_hbm [thread:$0]  (%p15466_p9), %s15195_s25, 4096, %s15193_s26, %s15205_s17, %s12821_s18, %s12821_s18, %s12822_s20  }
 0x8c0 PF: > { %p12359_p2 = scmp.ge.s32.totalorder %s12811_s16, 2  ;;  %s9146_s28 = sand.u32 1, %s12799_s13  }
 0x8c1   : > { %p15467_p3 = scmp.ne.s32.totalorder %s15311_s24, 0  ;;  %s9147_s30 = scalar_lea.sflag [#allocation5], %s9146_s28 }
 0x8c3   : > { %p12354_p4 = pnand %p12359_p2, %p15467_p3 }
 0x8c5   : > { %12794 = dma.done.wait (!%p12354_p4), %s9147_s30, 4096  }
 0x8c6   : > { %12796 = vsyncadd (!%p12354_p4), %s9147_s30, 4294963200  ;;  %p21_p7 = scmp.ge.s32.totalorder %s12903_s19, 4   ;;  %s15468_s13 = smov %s12803_s14 }
 0x8c7   : > { %s15469_s14 = smov %s12807_s15  ;;  %s15470_s15 = smov %s12914_s22 }
 0x8c8   : > { %s15471_s16 = smov %s12903_s19  ;;  %23 = sbr.rel (!%p21_p7) target bundleno = 4 (0x4), region = 129 }
 0x8cf   :  { %9152 = vsyncpa [#allocation4], 1 }
 0x8d0   :  { %9154 = vsyncpa [#allocation4 + $0x1], 1 }
 0x8d1   :  { %9155 = vsyncpa [#allocation5], 1 }
 0x8d2   :  { %9157 = vsyncpa [#allocation5 + $0x1], 1 }

</bundles_post_ra>
